<compile_context>
chip_gen: v7x
topology: tpu7x:2x2x1
jax: 0.10.0
libtpu: 0.0.40
codegen_flags: <defaults>
</compile_context>

<pallas_src>
import functools

import jax
import jax.numpy as jnp
from jax.experimental import pallas as pl
from jax.experimental.pallas import tpu as pltpu


def _round_up(n: int, m: int) -> int:
    return ((n + m - 1) // m) * m


def _dqn_fused_kernel(d3_ref, wconv_ref, bconv_ref, wfc_ref, bfc_ref,
                      wout_ref, bout_ref, out_ref):
    """Fused conv+ReLU -> fc+ReLU -> output for one batch tile.

    d3_ref   : (n_chunks, Btile, CKK*PC)  im2col patches, chunked over positions
    wconv_ref: (CKK*PC, OC*PC)            block-diagonal conv weight (PC copies)
    bconv_ref: (1, OC*PC)
    wfc_ref  : (n_chunks, OC*PC, FCp)     fc weight regrouped per spatial chunk
    bfc_ref  : (1, FCp)
    wout_ref : (FCp, NAp)
    bout_ref : (1, NAp)
    out_ref  : (Btile, NAp)
    """
    n_chunks = d3_ref.shape[0]
    btile = d3_ref.shape[1]
    fcp = wfc_ref.shape[-1]

    h = jnp.zeros((btile, fcp), jnp.float32)
    for ci in range(n_chunks):                       # small static loop (13 iters)
        # Conv for PC spatial positions of every sample in the tile:
        # (Btile, CKK*PC) @ (CKK*PC, OC*PC) -> (Btile, 128), lane-dense.
        a = jnp.dot(d3_ref[ci], wconv_ref[...],
                    preferred_element_type=jnp.float32)
        a = jnp.maximum(a + bconv_ref[...], 0.0)
        # fc contribution of this chunk: (Btile, 128) @ (128, FCp).
        h = h + jnp.dot(a, wfc_ref[ci], preferred_element_type=jnp.float32)
    h = jnp.maximum(h + bfc_ref[...], 0.0)

    q = jnp.dot(h, wout_ref[...], preferred_element_type=jnp.float32)
    out_ref[...] = (q + bout_ref[...]).astype(out_ref.dtype)


def _dqn_forward(x, params, *, ksize: int, n_actions: int, max_batch_tile: int):
    """Jitted forward: host-side im2col/retile (XLA) + one fused Pallas call."""
    wconv_big, bconv_row, wfc_chunks, bfc_row, wout_pad, bout_row = params
    x = x.astype(jnp.float32)
    B, C, H, W = x.shape
    K = ksize
    Ho, Wo = H - K + 1, W - K + 1
    HW = Ho * Wo
    CKK = C * K * K
    n_chunks, ocpc, FCp = wfc_chunks.shape
    PC = wconv_big.shape[0] // CKK
    HWp = n_chunks * PC
    NAp = wout_pad.shape[-1]

    # im2col with k = c*K*K + i*K + j (matches w_conv.reshape(OC, C*K*K)),
    # then re-tile so each chunk is a (B, CKK*PC) slab of PC output positions.
    cols = [x[:, :, i:i + Ho, j:j + Wo] for i in range(K) for j in range(K)]
    pats = jnp.stack(cols, axis=2).reshape(B, CKK, HW)          # (B, CKK, HW)
    pats = jnp.pad(pats, ((0, 0), (0, 0), (0, HWp - HW)))       # (B, CKK, HWp)
    d3 = pats.reshape(B, CKK, n_chunks, PC)
    d3 = d3.transpose(2, 0, 1, 3).reshape(n_chunks, B, CKK * PC)

    # Batch tiling (pad B up to a multiple of the tile; padded rows are junk
    # and sliced off after the call).
    btile = min(max_batch_tile, _round_up(B, 8))
    Bp = _round_up(B, btile)
    if Bp != B:
        d3 = jnp.pad(d3, ((0, 0), (0, Bp - B), (0, 0)))
    n_blocks = Bp // btile

    out = pl.pallas_call(
        _dqn_fused_kernel,
        out_shape=jax.ShapeDtypeStruct((Bp, NAp), jnp.float32),
        grid=(n_blocks,),
        in_specs=[
            pl.BlockSpec((n_chunks, btile, CKK * PC), lambda b: (0, b, 0)),
            pl.BlockSpec((CKK * PC, ocpc), lambda b: (0, 0)),
            pl.BlockSpec((1, ocpc), lambda b: (0, 0)),
            pl.BlockSpec((n_chunks, ocpc, FCp), lambda b: (0, 0, 0)),
            pl.BlockSpec((1, FCp), lambda b: (0, 0)),
            pl.BlockSpec((FCp, NAp), lambda b: (0, 0)),
            pl.BlockSpec((1, NAp), lambda b: (0, 0)),
        ],
        out_specs=pl.BlockSpec((btile, NAp), lambda b: (b, 0)),
        compiler_params=pltpu.CompilerParams(
            dimension_semantics=("parallel",),
            vmem_limit_bytes=32 * 1024 * 1024),
    )(d3, wconv_big, bconv_row, wfc_chunks, bfc_row, wout_pad, bout_row)

    return out[:B, :n_actions]


class DeepQNetworkPallas:
    """Pallas re-implementation of DeepQNetwork.forward (single fused kernel)."""

    def __init__(self, state_shape, n_actions, kernel_size, conv_out_channels,
                 fc_out_features, seed=0, max_batch_tile=128):
        C, H, W = state_shape
        K = kernel_size
        Ho, Wo = H - K + 1, W - K + 1
        HW = Ho * Wo
        CKK = C * K * K
        OC = conv_out_channels
        FC = fc_out_features
        flat = HW * OC
        self.ksize = K
        self.n_actions = n_actions

        key = jax.random.PRNGKey(seed)
        k1, k2, k3, k4, k5, k6 = jax.random.split(key, 6)
        s_conv = 1.0 / float(CKK) ** 0.5
        s_fc = 1.0 / float(flat) ** 0.5
        s_out = 1.0 / float(FC) ** 0.5

        # PyTorch-shaped master parameters (deterministic synthetic init).
        self.w_conv = jax.random.uniform(k1, (OC, C, K, K), jnp.float32, -s_conv, s_conv)
        self.b_conv = jax.random.uniform(k2, (OC,), jnp.float32, -s_conv, s_conv)
        self.w_fc = jax.random.uniform(k3, (FC, flat), jnp.float32, -s_fc, s_fc)
        self.b_fc = jax.random.uniform(k4, (FC,), jnp.float32, -s_fc, s_fc)
        self.w_out = jax.random.uniform(k5, (n_actions, FC), jnp.float32, -s_out, s_out)
        self.b_out = jax.random.uniform(k6, (n_actions,), jnp.float32, -s_out, s_out)

        # ---- one-time kernel-friendly re-layouts (hoisted out of forward) ----
        PC = max(1, 128 // OC)                 # spatial positions folded per chunk
        OCPC = OC * PC                         # conv-activation lane width (128)
        HWp = _round_up(HW, PC)
        n_chunks = HWp // PC
        FCp = _round_up(max(FC, 128), 128)
        NAp = _round_up(max(n_actions, 128), 128)

        wconv_flat = self.w_conv.reshape(OC, CKK)                      # (OC, CKK)
        # Block-diagonal conv weight: PC shifted copies of Wconv so the conv
        # matmul output has OC folded into a dense 128-wide lane dim.
        eye = jnp.eye(PC, dtype=jnp.float32)
        wconv_big = (wconv_flat.T[:, None, :, None] * eye[None, :, None, :]
                     ).reshape(CKK * PC, OCPC)                         # (CKK*PC, OC*PC)
        bconv_row = jnp.repeat(self.b_conv, PC).reshape(1, OCPC)

        # fc weight regrouped per chunk; PyTorch NCHW-flatten order (o*HW + hw)
        # plus the HW->HWp and FC->FCp zero paddings are folded in here.
        wfc3 = self.w_fc.T.reshape(OC, HW, FC)
        wfc3 = jnp.pad(wfc3, ((0, 0), (0, HWp - HW), (0, FCp - FC)))   # (OC,HWp,FCp)
        wfc_chunks = wfc3.reshape(OC, n_chunks, PC, FCp).transpose(1, 0, 2, 3)
        wfc_chunks = wfc_chunks.reshape(n_chunks, OCPC, FCp)
        bfc_row = jnp.pad(self.b_fc, (0, FCp - FC)).reshape(1, FCp)

        wout_pad = jnp.zeros((FCp, NAp), jnp.float32)
        wout_pad = wout_pad.at[:FC, :n_actions].set(self.w_out.T)
        bout_row = jnp.pad(self.b_out, (0, NAp - n_actions)).reshape(1, NAp)

        self._params = (wconv_big, bconv_row, wfc_chunks, bfc_row,
                        wout_pad, bout_row)
        self._fwd = jax.jit(functools.partial(
            _dqn_forward, ksize=K, n_actions=n_actions,
            max_batch_tile=max_batch_tile))

    def forward(self, x):
        return self._fwd(jnp.asarray(x, jnp.float32), self._params)

    __call__ = forward


def _reference_forward(x, net):
    """Pure-JAX reference matching the PyTorch module semantics (f32, HIGHEST)."""
    hp = jax.lax.Precision.HIGHEST
    y = jax.lax.conv_general_dilated(
        x, net.w_conv, window_strides=(1, 1), padding="VALID",
        dimension_numbers=("NCHW", "OIHW", "NCHW"), precision=hp)
    y = jnp.maximum(y + net.b_conv.reshape(1, -1, 1, 1), 0.0)
    y = y.reshape(y.shape[0], -1)                   # NCHW flatten, like x.view(B,-1)
    h = jnp.maximum(jnp.dot(y, net.w_fc.T, precision=hp) + net.b_fc, 0.0)
    return jnp.dot(h, net.w_out.T, precision=hp) + net.b_out


if __name__ == "__main__":
    # Small shapes consistent with the module: state_shape=(4,16,16), batch=2.
    state_shape = (4, 16, 16)
    n_actions = 4
    kernel_size = 3
    conv_out_channels = 8
    fc_out_features = 32

    net = DeepQNetworkPallas(state_shape, n_actions, kernel_size,
                             conv_out_channels, fc_out_features, seed=0)

    x = jax.random.normal(jax.random.PRNGKey(0), (2,) + state_shape, jnp.float32)
    q_values = net(x)
    jax.block_until_ready(q_values)

    assert q_values.shape == (2, n_actions)
    assert q_values.dtype == jnp.float32

    ref = _reference_forward(x, net)
    assert jnp.allclose(q_values, ref, rtol=1e-3, atol=1e-3), (q_values, ref)
    print("KERNEL_OK")
</pallas_src>

<mosaic_0001>
module attributes {stable_mosaic.version = 11 : i64} {
  func.func @_dqn_fused_kernel(%arg0: i32, %arg1: memref<13x8x576xf32, #tpu.memory_space<vmem>>, %arg2: memref<576x128xf32, #tpu.memory_space<vmem>>, %arg3: memref<1x128xf32, #tpu.memory_space<vmem>>, %arg4: memref<13x128x128xf32, #tpu.memory_space<vmem>>, %arg5: memref<1x128xf32, #tpu.memory_space<vmem>>, %arg6: memref<128x128xf32, #tpu.memory_space<vmem>>, %arg7: memref<1x128xf32, #tpu.memory_space<vmem>>, %arg8: memref<8x128xf32, #tpu.memory_space<vmem>>) attributes {dimension_semantics = [#tpu.dimension_semantics<parallel>], iteration_bounds = array<i64: 1>, scalar_prefetch = 0 : i64, scratch_operands = 0 : i64, tpu.core_type = #tpu.core_type<tc>, window_params = [{transform_indices = @transform_0, window_bounds = array<i64: 13, 8, 576>}, {pipeline_mode = #tpu.pipeline_mode<synchronous>, transform_indices = @transform_1, window_bounds = array<i64: 576, 128>}, {pipeline_mode = #tpu.pipeline_mode<synchronous>, transform_indices = @transform_2, window_bounds = array<i64: 1, 128>}, {pipeline_mode = #tpu.pipeline_mode<synchronous>, transform_indices = @transform_3, window_bounds = array<i64: 13, 128, 128>}, {pipeline_mode = #tpu.pipeline_mode<synchronous>, transform_indices = @transform_4, window_bounds = array<i64: 1, 128>}, {pipeline_mode = #tpu.pipeline_mode<synchronous>, transform_indices = @transform_5, window_bounds = array<i64: 128, 128>}, {pipeline_mode = #tpu.pipeline_mode<synchronous>, transform_indices = @transform_6, window_bounds = array<i64: 1, 128>}, {transform_indices = @transform_7, window_bounds = array<i64: 8, 128>}]} {
    %cst = arith.constant 0.000000e+00 : f32
    %0 = vector.broadcast %cst : f32 to vector<8x128xf32>
    %c0 = arith.constant 0 : index
    %c0_0 = arith.constant 0 : index
    %c0_1 = arith.constant 0 : index
    %1 = vector.load %arg1[%c0, %c0_0, %c0_1] : memref<13x8x576xf32, #tpu.memory_space<vmem>>, vector<1x8x576xf32>
    %2 = vector.shape_cast %1 : vector<1x8x576xf32> to vector<8x576xf32>
    %c0_2 = arith.constant 0 : index
    %c0_3 = arith.constant 0 : index
    %3 = vector.load %arg2[%c0_2, %c0_3] : memref<576x128xf32, #tpu.memory_space<vmem>>, vector<576x128xf32>
    %cst_4 = arith.constant dense<0.000000e+00> : vector<8x128xf32>
    %4 = tpu.matmul %2, %3, %cst_4 {dimension_numbers = #tpu.dot_dimension_numbers<[1], [0], [0], [1], [0, 0, 1, 1], [], []>} : vector<8x576xf32>, vector<576x128xf32>, vector<8x128xf32> -> vector<8x128xf32>
    %c0_5 = arith.constant 0 : index
    %c0_6 = arith.constant 0 : index
    %5 = vector.load %arg3[%c0_5, %c0_6] : memref<1x128xf32, #tpu.memory_space<vmem>>, vector<1x128xf32>
    %6 = vector.broadcast %5 : vector<1x128xf32> to vector<8x128xf32>
    %7 = arith.addf %4, %6 : vector<8x128xf32>
    %cst_7 = arith.constant 0.000000e+00 : f32
    %8 = vector.broadcast %cst_7 : f32 to vector<8x128xf32>
    %9 = arith.maximumf %7, %8 : vector<8x128xf32>
    %c0_8 = arith.constant 0 : index
    %c0_9 = arith.constant 0 : index
    %c0_10 = arith.constant 0 : index
    %10 = vector.load %arg4[%c0_8, %c0_9, %c0_10] : memref<13x128x128xf32, #tpu.memory_space<vmem>>, vector<1x128x128xf32>
    %11 = vector.shape_cast %10 : vector<1x128x128xf32> to vector<128x128xf32>
    %cst_11 = arith.constant dense<0.000000e+00> : vector<8x128xf32>
    %12 = tpu.matmul %9, %11, %cst_11 {dimension_numbers = #tpu.dot_dimension_numbers<[1], [0], [0], [1], [0, 0, 1, 1], [], []>} : vector<8x128xf32>, vector<128x128xf32>, vector<8x128xf32> -> vector<8x128xf32>
    %13 = arith.addf %0, %12 : vector<8x128xf32>
    %c1 = arith.constant 1 : index
    %c0_12 = arith.constant 0 : index
    %c0_13 = arith.constant 0 : index
    %14 = vector.load %arg1[%c1, %c0_12, %c0_13] : memref<13x8x576xf32, #tpu.memory_space<vmem>>, vector<1x8x576xf32>
    %15 = vector.shape_cast %14 : vector<1x8x576xf32> to vector<8x576xf32>
    %c0_14 = arith.constant 0 : index
    %c0_15 = arith.constant 0 : index
    %16 = vector.load %arg2[%c0_14, %c0_15] : memref<576x128xf32, #tpu.memory_space<vmem>>, vector<576x128xf32>
    %cst_16 = arith.constant dense<0.000000e+00> : vector<8x128xf32>
    %17 = tpu.matmul %15, %16, %cst_16 {dimension_numbers = #tpu.dot_dimension_numbers<[1], [0], [0], [1], [0, 0, 1, 1], [], []>} : vector<8x576xf32>, vector<576x128xf32>, vector<8x128xf32> -> vector<8x128xf32>
    %c0_17 = arith.constant 0 : index
    %c0_18 = arith.constant 0 : index
    %18 = vector.load %arg3[%c0_17, %c0_18] : memref<1x128xf32, #tpu.memory_space<vmem>>, vector<1x128xf32>
    %19 = vector.broadcast %18 : vector<1x128xf32> to vector<8x128xf32>
    %20 = arith.addf %17, %19 : vector<8x128xf32>
    %cst_19 = arith.constant 0.000000e+00 : f32
    %21 = vector.broadcast %cst_19 : f32 to vector<8x128xf32>
    %22 = arith.maximumf %20, %21 : vector<8x128xf32>
    %c1_20 = arith.constant 1 : index
    %c0_21 = arith.constant 0 : index
    %c0_22 = arith.constant 0 : index
    %23 = vector.load %arg4[%c1_20, %c0_21, %c0_22] : memref<13x128x128xf32, #tpu.memory_space<vmem>>, vector<1x128x128xf32>
    %24 = vector.shape_cast %23 : vector<1x128x128xf32> to vector<128x128xf32>
    %cst_23 = arith.constant dense<0.000000e+00> : vector<8x128xf32>
    %25 = tpu.matmul %22, %24, %cst_23 {dimension_numbers = #tpu.dot_dimension_numbers<[1], [0], [0], [1], [0, 0, 1, 1], [], []>} : vector<8x128xf32>, vector<128x128xf32>, vector<8x128xf32> -> vector<8x128xf32>
    %26 = arith.addf %13, %25 : vector<8x128xf32>
    %c2 = arith.constant 2 : index
    %c0_24 = arith.constant 0 : index
    %c0_25 = arith.constant 0 : index
    %27 = vector.load %arg1[%c2, %c0_24, %c0_25] : memref<13x8x576xf32, #tpu.memory_space<vmem>>, vector<1x8x576xf32>
    %28 = vector.shape_cast %27 : vector<1x8x576xf32> to vector<8x576xf32>
    %c0_26 = arith.constant 0 : index
    %c0_27 = arith.constant 0 : index
    %29 = vector.load %arg2[%c0_26, %c0_27] : memref<576x128xf32, #tpu.memory_space<vmem>>, vector<576x128xf32>
    %cst_28 = arith.constant dense<0.000000e+00> : vector<8x128xf32>
    %30 = tpu.matmul %28, %29, %cst_28 {dimension_numbers = #tpu.dot_dimension_numbers<[1], [0], [0], [1], [0, 0, 1, 1], [], []>} : vector<8x576xf32>, vector<576x128xf32>, vector<8x128xf32> -> vector<8x128xf32>
    %c0_29 = arith.constant 0 : index
    %c0_30 = arith.constant 0 : index
    %31 = vector.load %arg3[%c0_29, %c0_30] : memref<1x128xf32, #tpu.memory_space<vmem>>, vector<1x128xf32>
    %32 = vector.broadcast %31 : vector<1x128xf32> to vector<8x128xf32>
    %33 = arith.addf %30, %32 : vector<8x128xf32>
    %cst_31 = arith.constant 0.000000e+00 : f32
    %34 = vector.broadcast %cst_31 : f32 to vector<8x128xf32>
    %35 = arith.maximumf %33, %34 : vector<8x128xf32>
    %c2_32 = arith.constant 2 : index
    %c0_33 = arith.constant 0 : index
    %c0_34 = arith.constant 0 : index
    %36 = vector.load %arg4[%c2_32, %c0_33, %c0_34] : memref<13x128x128xf32, #tpu.memory_space<vmem>>, vector<1x128x128xf32>
    %37 = vector.shape_cast %36 : vector<1x128x128xf32> to vector<128x128xf32>
    %cst_35 = arith.constant dense<0.000000e+00> : vector<8x128xf32>
    %38 = tpu.matmul %35, %37, %cst_35 {dimension_numbers = #tpu.dot_dimension_numbers<[1], [0], [0], [1], [0, 0, 1, 1], [], []>} : vector<8x128xf32>, vector<128x128xf32>, vector<8x128xf32> -> vector<8x128xf32>
    %39 = arith.addf %26, %38 : vector<8x128xf32>
    %c3 = arith.constant 3 : index
    %c0_36 = arith.constant 0 : index
    %c0_37 = arith.constant 0 : index
    %40 = vector.load %arg1[%c3, %c0_36, %c0_37] : memref<13x8x576xf32, #tpu.memory_space<vmem>>, vector<1x8x576xf32>
    %41 = vector.shape_cast %40 : vector<1x8x576xf32> to vector<8x576xf32>
    %c0_38 = arith.constant 0 : index
    %c0_39 = arith.constant 0 : index
    %42 = vector.load %arg2[%c0_38, %c0_39] : memref<576x128xf32, #tpu.memory_space<vmem>>, vector<576x128xf32>
    %cst_40 = arith.constant dense<0.000000e+00> : vector<8x128xf32>
    %43 = tpu.matmul %41, %42, %cst_40 {dimension_numbers = #tpu.dot_dimension_numbers<[1], [0], [0], [1], [0, 0, 1, 1], [], []>} : vector<8x576xf32>, vector<576x128xf32>, vector<8x128xf32> -> vector<8x128xf32>
    %c0_41 = arith.constant 0 : index
    %c0_42 = arith.constant 0 : index
    %44 = vector.load %arg3[%c0_41, %c0_42] : memref<1x128xf32, #tpu.memory_space<vmem>>, vector<1x128xf32>
    %45 = vector.broadcast %44 : vector<1x128xf32> to vector<8x128xf32>
    %46 = arith.addf %43, %45 : vector<8x128xf32>
    %cst_43 = arith.constant 0.000000e+00 : f32
    %47 = vector.broadcast %cst_43 : f32 to vector<8x128xf32>
    %48 = arith.maximumf %46, %47 : vector<8x128xf32>
    %c3_44 = arith.constant 3 : index
    %c0_45 = arith.constant 0 : index
    %c0_46 = arith.constant 0 : index
    %49 = vector.load %arg4[%c3_44, %c0_45, %c0_46] : memref<13x128x128xf32, #tpu.memory_space<vmem>>, vector<1x128x128xf32>
    %50 = vector.shape_cast %49 : vector<1x128x128xf32> to vector<128x128xf32>
    %cst_47 = arith.constant dense<0.000000e+00> : vector<8x128xf32>
    %51 = tpu.matmul %48, %50, %cst_47 {dimension_numbers = #tpu.dot_dimension_numbers<[1], [0], [0], [1], [0, 0, 1, 1], [], []>} : vector<8x128xf32>, vector<128x128xf32>, vector<8x128xf32> -> vector<8x128xf32>
    %52 = arith.addf %39, %51 : vector<8x128xf32>
    %c4 = arith.constant 4 : index
    %c0_48 = arith.constant 0 : index
    %c0_49 = arith.constant 0 : index
    %53 = vector.load %arg1[%c4, %c0_48, %c0_49] : memref<13x8x576xf32, #tpu.memory_space<vmem>>, vector<1x8x576xf32>
    %54 = vector.shape_cast %53 : vector<1x8x576xf32> to vector<8x576xf32>
    %c0_50 = arith.constant 0 : index
    %c0_51 = arith.constant 0 : index
    %55 = vector.load %arg2[%c0_50, %c0_51] : memref<576x128xf32, #tpu.memory_space<vmem>>, vector<576x128xf32>
    %cst_52 = arith.constant dense<0.000000e+00> : vector<8x128xf32>
    %56 = tpu.matmul %54, %55, %cst_52 {dimension_numbers = #tpu.dot_dimension_numbers<[1], [0], [0], [1], [0, 0, 1, 1], [], []>} : vector<8x576xf32>, vector<576x128xf32>, vector<8x128xf32> -> vector<8x128xf32>
    %c0_53 = arith.constant 0 : index
    %c0_54 = arith.constant 0 : index
    %57 = vector.load %arg3[%c0_53, %c0_54] : memref<1x128xf32, #tpu.memory_space<vmem>>, vector<1x128xf32>
    %58 = vector.broadcast %57 : vector<1x128xf32> to vector<8x128xf32>
    %59 = arith.addf %56, %58 : vector<8x128xf32>
    %cst_55 = arith.constant 0.000000e+00 : f32
    %60 = vector.broadcast %cst_55 : f32 to vector<8x128xf32>
    %61 = arith.maximumf %59, %60 : vector<8x128xf32>
    %c4_56 = arith.constant 4 : index
    %c0_57 = arith.constant 0 : index
    %c0_58 = arith.constant 0 : index
    %62 = vector.load %arg4[%c4_56, %c0_57, %c0_58] : memref<13x128x128xf32, #tpu.memory_space<vmem>>, vector<1x128x128xf32>
    %63 = vector.shape_cast %62 : vector<1x128x128xf32> to vector<128x128xf32>
    %cst_59 = arith.constant dense<0.000000e+00> : vector<8x128xf32>
    %64 = tpu.matmul %61, %63, %cst_59 {dimension_numbers = #tpu.dot_dimension_numbers<[1], [0], [0], [1], [0, 0, 1, 1], [], []>} : vector<8x128xf32>, vector<128x128xf32>, vector<8x128xf32> -> vector<8x128xf32>
    %65 = arith.addf %52, %64 : vector<8x128xf32>
    %c5 = arith.constant 5 : index
    %c0_60 = arith.constant 0 : index
    %c0_61 = arith.constant 0 : index
    %66 = vector.load %arg1[%c5, %c0_60, %c0_61] : memref<13x8x576xf32, #tpu.memory_space<vmem>>, vector<1x8x576xf32>
    %67 = vector.shape_cast %66 : vector<1x8x576xf32> to vector<8x576xf32>
    %c0_62 = arith.constant 0 : index
    %c0_63 = arith.constant 0 : index
    %68 = vector.load %arg2[%c0_62, %c0_63] : memref<576x128xf32, #tpu.memory_space<vmem>>, vector<576x128xf32>
    %cst_64 = arith.constant dense<0.000000e+00> : vector<8x128xf32>
    %69 = tpu.matmul %67, %68, %cst_64 {dimension_numbers = #tpu.dot_dimension_numbers<[1], [0], [0], [1], [0, 0, 1, 1], [], []>} : vector<8x576xf32>, vector<576x128xf32>, vector<8x128xf32> -> vector<8x128xf32>
    %c0_65 = arith.constant 0 : index
    %c0_66 = arith.constant 0 : index
    %70 = vector.load %arg3[%c0_65, %c0_66] : memref<1x128xf32, #tpu.memory_space<vmem>>, vector<1x128xf32>
    %71 = vector.broadcast %70 : vector<1x128xf32> to vector<8x128xf32>
    %72 = arith.addf %69, %71 : vector<8x128xf32>
    %cst_67 = arith.constant 0.000000e+00 : f32
    %73 = vector.broadcast %cst_67 : f32 to vector<8x128xf32>
    %74 = arith.maximumf %72, %73 : vector<8x128xf32>
    %c5_68 = arith.constant 5 : index
    %c0_69 = arith.constant 0 : index
    %c0_70 = arith.constant 0 : index
    %75 = vector.load %arg4[%c5_68, %c0_69, %c0_70] : memref<13x128x128xf32, #tpu.memory_space<vmem>>, vector<1x128x128xf32>
    %76 = vector.shape_cast %75 : vector<1x128x128xf32> to vector<128x128xf32>
    %cst_71 = arith.constant dense<0.000000e+00> : vector<8x128xf32>
    %77 = tpu.matmul %74, %76, %cst_71 {dimension_numbers = #tpu.dot_dimension_numbers<[1], [0], [0], [1], [0, 0, 1, 1], [], []>} : vector<8x128xf32>, vector<128x128xf32>, vector<8x128xf32> -> vector<8x128xf32>
    %78 = arith.addf %65, %77 : vector<8x128xf32>
    %c6 = arith.constant 6 : index
    %c0_72 = arith.constant 0 : index
    %c0_73 = arith.constant 0 : index
    %79 = vector.load %arg1[%c6, %c0_72, %c0_73] : memref<13x8x576xf32, #tpu.memory_space<vmem>>, vector<1x8x576xf32>
    %80 = vector.shape_cast %79 : vector<1x8x576xf32> to vector<8x576xf32>
    %c0_74 = arith.constant 0 : index
    %c0_75 = arith.constant 0 : index
    %81 = vector.load %arg2[%c0_74, %c0_75] : memref<576x128xf32, #tpu.memory_space<vmem>>, vector<576x128xf32>
    %cst_76 = arith.constant dense<0.000000e+00> : vector<8x128xf32>
    %82 = tpu.matmul %80, %81, %cst_76 {dimension_numbers = #tpu.dot_dimension_numbers<[1], [0], [0], [1], [0, 0, 1, 1], [], []>} : vector<8x576xf32>, vector<576x128xf32>, vector<8x128xf32> -> vector<8x128xf32>
    %c0_77 = arith.constant 0 : index
    %c0_78 = arith.constant 0 : index
    %83 = vector.load %arg3[%c0_77, %c0_78] : memref<1x128xf32, #tpu.memory_space<vmem>>, vector<1x128xf32>
    %84 = vector.broadcast %83 : vector<1x128xf32> to vector<8x128xf32>
    %85 = arith.addf %82, %84 : vector<8x128xf32>
    %cst_79 = arith.constant 0.000000e+00 : f32
    %86 = vector.broadcast %cst_79 : f32 to vector<8x128xf32>
    %87 = arith.maximumf %85, %86 : vector<8x128xf32>
    %c6_80 = arith.constant 6 : index
    %c0_81 = arith.constant 0 : index
    %c0_82 = arith.constant 0 : index
    %88 = vector.load %arg4[%c6_80, %c0_81, %c0_82] : memref<13x128x128xf32, #tpu.memory_space<vmem>>, vector<1x128x128xf32>
    %89 = vector.shape_cast %88 : vector<1x128x128xf32> to vector<128x128xf32>
    %cst_83 = arith.constant dense<0.000000e+00> : vector<8x128xf32>
    %90 = tpu.matmul %87, %89, %cst_83 {dimension_numbers = #tpu.dot_dimension_numbers<[1], [0], [0], [1], [0, 0, 1, 1], [], []>} : vector<8x128xf32>, vector<128x128xf32>, vector<8x128xf32> -> vector<8x128xf32>
    %91 = arith.addf %78, %90 : vector<8x128xf32>
    %c7 = arith.constant 7 : index
    %c0_84 = arith.constant 0 : index
    %c0_85 = arith.constant 0 : index
    %92 = vector.load %arg1[%c7, %c0_84, %c0_85] : memref<13x8x576xf32, #tpu.memory_space<vmem>>, vector<1x8x576xf32>
    %93 = vector.shape_cast %92 : vector<1x8x576xf32> to vector<8x576xf32>
    %c0_86 = arith.constant 0 : index
    %c0_87 = arith.constant 0 : index
    %94 = vector.load %arg2[%c0_86, %c0_87] : memref<576x128xf32, #tpu.memory_space<vmem>>, vector<576x128xf32>
    %cst_88 = arith.constant dense<0.000000e+00> : vector<8x128xf32>
    %95 = tpu.matmul %93, %94, %cst_88 {dimension_numbers = #tpu.dot_dimension_numbers<[1], [0], [0], [1], [0, 0, 1, 1], [], []>} : vector<8x576xf32>, vector<576x128xf32>, vector<8x128xf32> -> vector<8x128xf32>
    %c0_89 = arith.constant 0 : index
    %c0_90 = arith.constant 0 : index
    %96 = vector.load %arg3[%c0_89, %c0_90] : memref<1x128xf32, #tpu.memory_space<vmem>>, vector<1x128xf32>
    %97 = vector.broadcast %96 : vector<1x128xf32> to vector<8x128xf32>
    %98 = arith.addf %95, %97 : vector<8x128xf32>
    %cst_91 = arith.constant 0.000000e+00 : f32
    %99 = vector.broadcast %cst_91 : f32 to vector<8x128xf32>
    %100 = arith.maximumf %98, %99 : vector<8x128xf32>
    %c7_92 = arith.constant 7 : index
    %c0_93 = arith.constant 0 : index
    %c0_94 = arith.constant 0 : index
    %101 = vector.load %arg4[%c7_92, %c0_93, %c0_94] : memref<13x128x128xf32, #tpu.memory_space<vmem>>, vector<1x128x128xf32>
    %102 = vector.shape_cast %101 : vector<1x128x128xf32> to vector<128x128xf32>
    %cst_95 = arith.constant dense<0.000000e+00> : vector<8x128xf32>
    %103 = tpu.matmul %100, %102, %cst_95 {dimension_numbers = #tpu.dot_dimension_numbers<[1], [0], [0], [1], [0, 0, 1, 1], [], []>} : vector<8x128xf32>, vector<128x128xf32>, vector<8x128xf32> -> vector<8x128xf32>
    %104 = arith.addf %91, %103 : vector<8x128xf32>
    %c8 = arith.constant 8 : index
    %c0_96 = arith.constant 0 : index
    %c0_97 = arith.constant 0 : index
    %105 = vector.load %arg1[%c8, %c0_96, %c0_97] : memref<13x8x576xf32, #tpu.memory_space<vmem>>, vector<1x8x576xf32>
    %106 = vector.shape_cast %105 : vector<1x8x576xf32> to vector<8x576xf32>
    %c0_98 = arith.constant 0 : index
    %c0_99 = arith.constant 0 : index
    %107 = vector.load %arg2[%c0_98, %c0_99] : memref<576x128xf32, #tpu.memory_space<vmem>>, vector<576x128xf32>
    %cst_100 = arith.constant dense<0.000000e+00> : vector<8x128xf32>
    %108 = tpu.matmul %106, %107, %cst_100 {dimension_numbers = #tpu.dot_dimension_numbers<[1], [0], [0], [1], [0, 0, 1, 1], [], []>} : vector<8x576xf32>, vector<576x128xf32>, vector<8x128xf32> -> vector<8x128xf32>
    %c0_101 = arith.constant 0 : index
    %c0_102 = arith.constant 0 : index
    %109 = vector.load %arg3[%c0_101, %c0_102] : memref<1x128xf32, #tpu.memory_space<vmem>>, vector<1x128xf32>
    %110 = vector.broadcast %109 : vector<1x128xf32> to vector<8x128xf32>
    %111 = arith.addf %108, %110 : vector<8x128xf32>
    %cst_103 = arith.constant 0.000000e+00 : f32
    %112 = vector.broadcast %cst_103 : f32 to vector<8x128xf32>
    %113 = arith.maximumf %111, %112 : vector<8x128xf32>
    %c8_104 = arith.constant 8 : index
    %c0_105 = arith.constant 0 : index
    %c0_106 = arith.constant 0 : index
    %114 = vector.load %arg4[%c8_104, %c0_105, %c0_106] : memref<13x128x128xf32, #tpu.memory_space<vmem>>, vector<1x128x128xf32>
    %115 = vector.shape_cast %114 : vector<1x128x128xf32> to vector<128x128xf32>
    %cst_107 = arith.constant dense<0.000000e+00> : vector<8x128xf32>
    %116 = tpu.matmul %113, %115, %cst_107 {dimension_numbers = #tpu.dot_dimension_numbers<[1], [0], [0], [1], [0, 0, 1, 1], [], []>} : vector<8x128xf32>, vector<128x128xf32>, vector<8x128xf32> -> vector<8x128xf32>
    %117 = arith.addf %104, %116 : vector<8x128xf32>
    %c9 = arith.constant 9 : index
    %c0_108 = arith.constant 0 : index
    %c0_109 = arith.constant 0 : index
    %118 = vector.load %arg1[%c9, %c0_108, %c0_109] : memref<13x8x576xf32, #tpu.memory_space<vmem>>, vector<1x8x576xf32>
    %119 = vector.shape_cast %118 : vector<1x8x576xf32> to vector<8x576xf32>
    %c0_110 = arith.constant 0 : index
    %c0_111 = arith.constant 0 : index
    %120 = vector.load %arg2[%c0_110, %c0_111] : memref<576x128xf32, #tpu.memory_space<vmem>>, vector<576x128xf32>
    %cst_112 = arith.constant dense<0.000000e+00> : vector<8x128xf32>
    %121 = tpu.matmul %119, %120, %cst_112 {dimension_numbers = #tpu.dot_dimension_numbers<[1], [0], [0], [1], [0, 0, 1, 1], [], []>} : vector<8x576xf32>, vector<576x128xf32>, vector<8x128xf32> -> vector<8x128xf32>
    %c0_113 = arith.constant 0 : index
    %c0_114 = arith.constant 0 : index
    %122 = vector.load %arg3[%c0_113, %c0_114] : memref<1x128xf32, #tpu.memory_space<vmem>>, vector<1x128xf32>
    %123 = vector.broadcast %122 : vector<1x128xf32> to vector<8x128xf32>
    %124 = arith.addf %121, %123 : vector<8x128xf32>
    %cst_115 = arith.constant 0.000000e+00 : f32
    %125 = vector.broadcast %cst_115 : f32 to vector<8x128xf32>
    %126 = arith.maximumf %124, %125 : vector<8x128xf32>
    %c9_116 = arith.constant 9 : index
    %c0_117 = arith.constant 0 : index
    %c0_118 = arith.constant 0 : index
    %127 = vector.load %arg4[%c9_116, %c0_117, %c0_118] : memref<13x128x128xf32, #tpu.memory_space<vmem>>, vector<1x128x128xf32>
    %128 = vector.shape_cast %127 : vector<1x128x128xf32> to vector<128x128xf32>
    %cst_119 = arith.constant dense<0.000000e+00> : vector<8x128xf32>
    %129 = tpu.matmul %126, %128, %cst_119 {dimension_numbers = #tpu.dot_dimension_numbers<[1], [0], [0], [1], [0, 0, 1, 1], [], []>} : vector<8x128xf32>, vector<128x128xf32>, vector<8x128xf32> -> vector<8x128xf32>
    %130 = arith.addf %117, %129 : vector<8x128xf32>
    %c10 = arith.constant 10 : index
    %c0_120 = arith.constant 0 : index
    %c0_121 = arith.constant 0 : index
    %131 = vector.load %arg1[%c10, %c0_120, %c0_121] : memref<13x8x576xf32, #tpu.memory_space<vmem>>, vector<1x8x576xf32>
    %132 = vector.shape_cast %131 : vector<1x8x576xf32> to vector<8x576xf32>
    %c0_122 = arith.constant 0 : index
    %c0_123 = arith.constant 0 : index
    %133 = vector.load %arg2[%c0_122, %c0_123] : memref<576x128xf32, #tpu.memory_space<vmem>>, vector<576x128xf32>
    %cst_124 = arith.constant dense<0.000000e+00> : vector<8x128xf32>
    %134 = tpu.matmul %132, %133, %cst_124 {dimension_numbers = #tpu.dot_dimension_numbers<[1], [0], [0], [1], [0, 0, 1, 1], [], []>} : vector<8x576xf32>, vector<576x128xf32>, vector<8x128xf32> -> vector<8x128xf32>
    %c0_125 = arith.constant 0 : index
    %c0_126 = arith.constant 0 : index
    %135 = vector.load %arg3[%c0_125, %c0_126] : memref<1x128xf32, #tpu.memory_space<vmem>>, vector<1x128xf32>
    %136 = vector.broadcast %135 : vector<1x128xf32> to vector<8x128xf32>
    %137 = arith.addf %134, %136 : vector<8x128xf32>
    %cst_127 = arith.constant 0.000000e+00 : f32
    %138 = vector.broadcast %cst_127 : f32 to vector<8x128xf32>
    %139 = arith.maximumf %137, %138 : vector<8x128xf32>
    %c10_128 = arith.constant 10 : index
    %c0_129 = arith.constant 0 : index
    %c0_130 = arith.constant 0 : index
    %140 = vector.load %arg4[%c10_128, %c0_129, %c0_130] : memref<13x128x128xf32, #tpu.memory_space<vmem>>, vector<1x128x128xf32>
    %141 = vector.shape_cast %140 : vector<1x128x128xf32> to vector<128x128xf32>
    %cst_131 = arith.constant dense<0.000000e+00> : vector<8x128xf32>
    %142 = tpu.matmul %139, %141, %cst_131 {dimension_numbers = #tpu.dot_dimension_numbers<[1], [0], [0], [1], [0, 0, 1, 1], [], []>} : vector<8x128xf32>, vector<128x128xf32>, vector<8x128xf32> -> vector<8x128xf32>
    %143 = arith.addf %130, %142 : vector<8x128xf32>
    %c11 = arith.constant 11 : index
    %c0_132 = arith.constant 0 : index
    %c0_133 = arith.constant 0 : index
    %144 = vector.load %arg1[%c11, %c0_132, %c0_133] : memref<13x8x576xf32, #tpu.memory_space<vmem>>, vector<1x8x576xf32>
    %145 = vector.shape_cast %144 : vector<1x8x576xf32> to vector<8x576xf32>
    %c0_134 = arith.constant 0 : index
    %c0_135 = arith.constant 0 : index
    %146 = vector.load %arg2[%c0_134, %c0_135] : memref<576x128xf32, #tpu.memory_space<vmem>>, vector<576x128xf32>
    %cst_136 = arith.constant dense<0.000000e+00> : vector<8x128xf32>
    %147 = tpu.matmul %145, %146, %cst_136 {dimension_numbers = #tpu.dot_dimension_numbers<[1], [0], [0], [1], [0, 0, 1, 1], [], []>} : vector<8x576xf32>, vector<576x128xf32>, vector<8x128xf32> -> vector<8x128xf32>
    %c0_137 = arith.constant 0 : index
    %c0_138 = arith.constant 0 : index
    %148 = vector.load %arg3[%c0_137, %c0_138] : memref<1x128xf32, #tpu.memory_space<vmem>>, vector<1x128xf32>
    %149 = vector.broadcast %148 : vector<1x128xf32> to vector<8x128xf32>
    %150 = arith.addf %147, %149 : vector<8x128xf32>
    %cst_139 = arith.constant 0.000000e+00 : f32
    %151 = vector.broadcast %cst_139 : f32 to vector<8x128xf32>
    %152 = arith.maximumf %150, %151 : vector<8x128xf32>
    %c11_140 = arith.constant 11 : index
    %c0_141 = arith.constant 0 : index
    %c0_142 = arith.constant 0 : index
    %153 = vector.load %arg4[%c11_140, %c0_141, %c0_142] : memref<13x128x128xf32, #tpu.memory_space<vmem>>, vector<1x128x128xf32>
    %154 = vector.shape_cast %153 : vector<1x128x128xf32> to vector<128x128xf32>
    %cst_143 = arith.constant dense<0.000000e+00> : vector<8x128xf32>
    %155 = tpu.matmul %152, %154, %cst_143 {dimension_numbers = #tpu.dot_dimension_numbers<[1], [0], [0], [1], [0, 0, 1, 1], [], []>} : vector<8x128xf32>, vector<128x128xf32>, vector<8x128xf32> -> vector<8x128xf32>
    %156 = arith.addf %143, %155 : vector<8x128xf32>
    %c12 = arith.constant 12 : index
    %c0_144 = arith.constant 0 : index
    %c0_145 = arith.constant 0 : index
    %157 = vector.load %arg1[%c12, %c0_144, %c0_145] : memref<13x8x576xf32, #tpu.memory_space<vmem>>, vector<1x8x576xf32>
    %158 = vector.shape_cast %157 : vector<1x8x576xf32> to vector<8x576xf32>
    %c0_146 = arith.constant 0 : index
    %c0_147 = arith.constant 0 : index
    %159 = vector.load %arg2[%c0_146, %c0_147] : memref<576x128xf32, #tpu.memory_space<vmem>>, vector<576x128xf32>
    %cst_148 = arith.constant dense<0.000000e+00> : vector<8x128xf32>
    %160 = tpu.matmul %158, %159, %cst_148 {dimension_numbers = #tpu.dot_dimension_numbers<[1], [0], [0], [1], [0, 0, 1, 1], [], []>} : vector<8x576xf32>, vector<576x128xf32>, vector<8x128xf32> -> vector<8x128xf32>
    %c0_149 = arith.constant 0 : index
    %c0_150 = arith.constant 0 : index
    %161 = vector.load %arg3[%c0_149, %c0_150] : memref<1x128xf32, #tpu.memory_space<vmem>>, vector<1x128xf32>
    %162 = vector.broadcast %161 : vector<1x128xf32> to vector<8x128xf32>
    %163 = arith.addf %160, %162 : vector<8x128xf32>
    %cst_151 = arith.constant 0.000000e+00 : f32
    %164 = vector.broadcast %cst_151 : f32 to vector<8x128xf32>
    %165 = arith.maximumf %163, %164 : vector<8x128xf32>
    %c12_152 = arith.constant 12 : index
    %c0_153 = arith.constant 0 : index
    %c0_154 = arith.constant 0 : index
    %166 = vector.load %arg4[%c12_152, %c0_153, %c0_154] : memref<13x128x128xf32, #tpu.memory_space<vmem>>, vector<1x128x128xf32>
    %167 = vector.shape_cast %166 : vector<1x128x128xf32> to vector<128x128xf32>
    %cst_155 = arith.constant dense<0.000000e+00> : vector<8x128xf32>
    %168 = tpu.matmul %165, %167, %cst_155 {dimension_numbers = #tpu.dot_dimension_numbers<[1], [0], [0], [1], [0, 0, 1, 1], [], []>} : vector<8x128xf32>, vector<128x128xf32>, vector<8x128xf32> -> vector<8x128xf32>
    %169 = arith.addf %156, %168 : vector<8x128xf32>
    %c0_156 = arith.constant 0 : index
    %c0_157 = arith.constant 0 : index
    %170 = vector.load %arg5[%c0_156, %c0_157] : memref<1x128xf32, #tpu.memory_space<vmem>>, vector<1x128xf32>
    %171 = vector.broadcast %170 : vector<1x128xf32> to vector<8x128xf32>
    %172 = arith.addf %169, %171 : vector<8x128xf32>
    %cst_158 = arith.constant 0.000000e+00 : f32
    %173 = vector.broadcast %cst_158 : f32 to vector<8x128xf32>
    %174 = arith.maximumf %172, %173 : vector<8x128xf32>
    %c0_159 = arith.constant 0 : index
    %c0_160 = arith.constant 0 : index
    %175 = vector.load %arg6[%c0_159, %c0_160] : memref<128x128xf32, #tpu.memory_space<vmem>>, vector<128x128xf32>
    %cst_161 = arith.constant dense<0.000000e+00> : vector<8x128xf32>
    %176 = tpu.matmul %174, %175, %cst_161 {dimension_numbers = #tpu.dot_dimension_numbers<[1], [0], [0], [1], [0, 0, 1, 1], [], []>} : vector<8x128xf32>, vector<128x128xf32>, vector<8x128xf32> -> vector<8x128xf32>
    %c0_162 = arith.constant 0 : index
    %c0_163 = arith.constant 0 : index
    %177 = vector.load %arg7[%c0_162, %c0_163] : memref<1x128xf32, #tpu.memory_space<vmem>>, vector<1x128xf32>
    %178 = vector.broadcast %177 : vector<1x128xf32> to vector<8x128xf32>
    %179 = arith.addf %176, %178 : vector<8x128xf32>
    %c0_164 = arith.constant 0 : index
    %c0_165 = arith.constant 0 : index
    %180 = vector.load %arg8[%c0_164, %c0_165] : memref<8x128xf32, #tpu.memory_space<vmem>>, vector<8x128xf32>
    tpu.vector_store %arg8[%c0_164, %c0_165], %179 {strides = array<i32>} : memref<8x128xf32, #tpu.memory_space<vmem>>, vector<8x128xf32>,
    return
  }
  func.func @transform_0(%arg0: i32) -> (i32, i32, i32) {
    %c0_i32 = arith.constant 0 : i32
    %c0_i32_0 = arith.constant 0 : i32
    %c0_i32_1 = arith.constant 0 : i32
    return %c0_i32, %arg0, %c0_i32_0 : i32, i32, i32
  }
  func.func @transform_1(%arg0: i32) -> (i32, i32) {
    %c0_i32 = arith.constant 0 : i32
    %c0_i32_0 = arith.constant 0 : i32
    %c0_i32_1 = arith.constant 0 : i32
    return %c0_i32, %c0_i32_0 : i32, i32
  }
  func.func @transform_2(%arg0: i32) -> (i32, i32) {
    %c0_i32 = arith.constant 0 : i32
    %c0_i32_0 = arith.constant 0 : i32
    %c0_i32_1 = arith.constant 0 : i32
    return %c0_i32, %c0_i32_0 : i32, i32
  }
  func.func @transform_3(%arg0: i32) -> (i32, i32, i32) {
    %c0_i32 = arith.constant 0 : i32
    %c0_i32_0 = arith.constant 0 : i32
    %c0_i32_1 = arith.constant 0 : i32
    %c0_i32_2 = arith.constant 0 : i32
    return %c0_i32, %c0_i32_0, %c0_i32_1 : i32, i32, i32
  }
  func.func @transform_4(%arg0: i32) -> (i32, i32) {
    %c0_i32 = arith.constant 0 : i32
    %c0_i32_0 = arith.constant 0 : i32
    %c0_i32_1 = arith.constant 0 : i32
    return %c0_i32, %c0_i32_0 : i32, i32
  }
  func.func @transform_5(%arg0: i32) -> (i32, i32) {
    %c0_i32 = arith.constant 0 : i32
    %c0_i32_0 = arith.constant 0 : i32
    %c0_i32_1 = arith.constant 0 : i32
    return %c0_i32, %c0_i32_0 : i32, i32
  }
  func.func @transform_6(%arg0: i32) -> (i32, i32) {
    %c0_i32 = arith.constant 0 : i32
    %c0_i32_0 = arith.constant 0 : i32
    %c0_i32_1 = arith.constant 0 : i32
    return %c0_i32, %c0_i32_0 : i32, i32
  }
  func.func @transform_7(%arg0: i32) -> (i32, i32) {
    %c0_i32 = arith.constant 0 : i32
    %c0_i32_0 = arith.constant 0 : i32
    return %arg0, %c0_i32 : i32, i32
  }
}

</mosaic_0001>

<bundles_post_ra>
// kernel: _dqn_forward.1
= control target key start
LH: loop header
LB: loop body
LE: loop exit
PB: predicated region body
PF: predicated region fallthrough
CT: control target
= control target key end

     0   :  { %vm7813_vm0 = vmmov 0   ;;  %vm110_vm1 = vcmask 523264   ;;  %s9776_s1 = inlined_call_operand.vmem [shape: f32[576,128], index: 1, kind: input, shape index: {}]   ;;  %s9777_s0 = inlined_call_operand.vmem [shape: f32[13,8,576], index: 0, kind: input, shape index: {}]   ;;  %s9778_s3 = inlined_call_operand.vmem [shape: f32[13,128,128], index: 3, kind: input, shape index: {}]   ;;  %s9779_s2 = inlined_call_operand.vmem [shape: f32[1,128], index: 2, kind: input, shape index: {}]   ;;  %s9780_s5 = inlined_call_operand.vmem [shape: f32[128,128], index: 5, kind: input, shape index: {}]   ;;  %s9781_s4 = inlined_call_operand.vmem [shape: f32[1,128], index: 4, kind: input, shape index: {}]   ;;  %s9782_s6 = inlined_call_operand.vmem [shape: f32[1,128], index: 6, kind: input, shape index: {}]   ;;  %s9783_s7 = inlined_call_operand.vmem [shape: f32[8,128], index: 7, kind: output, shape index: {}]  }
   0x1   :  { %v47_v0 = vld [vmem:[%s9776_s1 + $0x80] sm:$0xff]  ;;  %v48_v1 = vld [vmem:[%s9776_s1 + $0x88] sm:$0xff]  ;;  %v49_v11 = vld [vmem:[%s9776_s1 + $0x90] sm:$0xff] }
   0x2   :  { %v31_v2 = vld [vmem:[%s9776_s1] sm:$0xff]  ;;  %v7864_v3 = vpack.c.bf16 %v48_v1, %v47_v0  ;;  %v32_v4 = vld [vmem:[%s9776_s1 + $0x8] sm:$0xff]  ;;  %v50_v13 = vld [vmem:[%s9776_s1 + $0x98] sm:$0xff] }
   0x3   :  { %v79_v5 = vld [vmem:[%s9776_s1 + $0x180] sm:$0xff]  ;;  %v80_v6 = vld [vmem:[%s9776_s1 + $0x188] sm:$0xff]  ;;  %v7875_v7 = vpack.c.bf16 %v32_v4, %v31_v2  ;;  %v33_v14 = vld [vmem:[%s9776_s1 + $0x10] sm:$0xff]  ;;  %v7902_v16 = vpack.c.bf16 %v50_v13, %v49_v11 }
   0x4   :  { %v7877_v8 = vpack.c.bf16 %v80_v6, %v79_v5  ;;  %v63_v9 = vld [vmem:[%s9776_s1 + $0x100] sm:$0xff]  ;;  %v64_v10 = vld [vmem:[%s9776_s1 + $0x108] sm:$0xff]  ;;  %6484 = vmatprep.subr.bf16.mxu0 %v7864_v3  ;;  %v34_v15 = vld [vmem:[%s9776_s1 + $0x18] sm:$0xff] }
   0x5   :  { %v7889_v12 = vpack.c.bf16 %v64_v10, %v63_v9  ;;  %6486 = vmatpush3.bf16.msra.mxu0 %v7875_v7  ;;  %v7904_v17 = vpack.c.bf16 %v34_v15, %v33_v14  ;;  %v81_v18 = vld [vmem:[%s9776_s1 + $0x190] sm:$0xff]  ;;  %v82_v19 = vld [vmem:[%s9776_s1 + $0x198] sm:$0xff]  ;;  %v51_v23 = vld [vmem:[%s9776_s1 + $0xa0] sm:$0xff] }
   0x6   :  { %6516 = vmatprep.subr.bf16.mxu1 %v7877_v8  ;;  %v65_v20 = vld [vmem:[%s9776_s1 + $0x110] sm:$0xff]  ;;  %v7916_v21 = vpack.c.bf16 %v82_v19, %v81_v18  ;;  %v66_v22 = vld [vmem:[%s9776_s1 + $0x118] sm:$0xff]  ;;  %v52_v24 = vld [vmem:[%s9776_s1 + $0xa8] sm:$0xff]  ;;  %6488 = vmatprep.subr.bf16.mxu0 %v7902_v16 }
   0x7   :  { %6518 = vmatpush3.bf16.msra.mxu1 %v7889_v12  ;;  %v7928_v25 = vpack.c.bf16 %v66_v22, %v65_v20  ;;  %v7930_v26 = vpack.c.bf16 %v52_v24, %v51_v23  ;;  %v35_v27 = vld [vmem:[%s9776_s1 + $0x20] sm:$0xff]  ;;  %v36_v28 = vld [vmem:[%s9776_s1 + $0x28] sm:$0xff]  ;;  %v53_v35 = vld [vmem:[%s9776_s1 + $0xb0] sm:$0xff] }
   0x8   :  { %v83_v29 = vld [vmem:[%s9776_s1 + $0x1a0] sm:$0xff]  ;;  %6520 = vmatprep.subr.bf16.mxu1 %v7916_v21  ;;  %v84_v30 = vld [vmem:[%s9776_s1 + $0x1a8] sm:$0xff]  ;;  %v7952_v33 = vpack.c.bf16 %v36_v28, %v35_v27  ;;  %v54_v36 = vld [vmem:[%s9776_s1 + $0xb8] sm:$0xff] }
   0x9   :  { %v67_v31 = vld [vmem:[%s9776_s1 + $0x120] sm:$0xff]  ;;  %v68_v32 = vld [vmem:[%s9776_s1 + $0x128] sm:$0xff]  ;;  %6490 = vmatpush3.bf16.msra.mxu0 %v7904_v17  ;;  %v7954_v34 = vpack.c.bf16 %v84_v30, %v83_v29  ;;  %v37_v37 = vld [vmem:[%s9776_s1 + $0x30] sm:$0xff]  ;;  %v7969_v39 = vpack.c.bf16 %v54_v36, %v53_v35 }
   0xa   :  { %6492 = vmatprep.subr.bf16.mxu0 %v7930_v26  ;;  %v7967_v38 = vpack.c.bf16 %v68_v32, %v67_v31  ;;  %v38_v40 = vld [vmem:[%s9776_s1 + $0x38] sm:$0xff]  ;;  %v85_v41 = vld [vmem:[%s9776_s1 + $0x1b0] sm:$0xff]  ;;  %v55_v46 = vld [vmem:[%s9776_s1 + $0xc0] sm:$0xff] }
   0xb   :  { %6522 = vmatpush3.bf16.msra.mxu1 %v7928_v25  ;;  %v86_v42 = vld [vmem:[%s9776_s1 + $0x1b8] sm:$0xff]  ;;  %v69_v44 = vld [vmem:[%s9776_s1 + $0x130] sm:$0xff]  ;;  %v56_v47 = vld [vmem:[%s9776_s1 + $0xc8] sm:$0xff]  ;;  %v7996_v48 = vpack.c.bf16 %v38_v40, %v37_v37 }
   0xc   :  { %6524 = vmatprep.subr.bf16.mxu1 %v7954_v34  ;;  %v7981_v43 = vpack.c.bf16 %v86_v42, %v85_v41  ;;  %v70_v45 = vld [vmem:[%s9776_s1 + $0x138] sm:$0xff]  ;;  %v87_v49 = vld [vmem:[%s9776_s1 + $0x1c0] sm:$0xff]  ;;  %v88_v50 = vld [vmem:[%s9776_s1 + $0x1c8] sm:$0xff]  ;;  %v8008_v52 = vpack.c.bf16 %v56_v47, %v55_v46 }
   0xd   :  { %6494 = vmatpush3.bf16.msra.mxu0 %v7952_v33  ;;  %v8006_v51 = vpack.c.bf16 %v70_v45, %v69_v44  ;;  %v39_v53 = vld [vmem:[%s9776_s1 + $0x40] sm:$0xff]  ;;  %v40_v54 = vld [vmem:[%s9776_s1 + $0x48] sm:$0xff]  ;;  %v8020_v56 = vpack.c.bf16 %v88_v50, %v87_v49  ;;  %v57_v58 = vld [vmem:[%s9776_s1 + $0xd0] sm:$0xff] }
   0xe   :  { %6496 = vmatprep.subr.bf16.mxu0 %v7969_v39  ;;  %v71_v55 = vld [vmem:[%s9776_s1 + $0x140] sm:$0xff]  ;;  %v72_v57 = vld [vmem:[%s9776_s1 + $0x148] sm:$0xff]  ;;  %v58_v59 = vld [vmem:[%s9776_s1 + $0xd8] sm:$0xff]  ;;  %v8038_v62 = vpack.c.bf16 %v40_v54, %v39_v53 }
   0xf   :  { %6526 = vmatpush3.bf16.msra.mxu1 %v7967_v38  ;;  %v89_v60 = vld [vmem:[%s9776_s1 + $0x1d0] sm:$0xff]  ;;  %v90_v61 = vld [vmem:[%s9776_s1 + $0x1d8] sm:$0xff]  ;;  %v8042_v63 = vpack.c.bf16 %v72_v57, %v71_v55  ;;  %v8044_v0 = vpack.c.bf16 %v58_v59, %v57_v58  ;;  %v59_v9 = vld [vmem:[%s9776_s1 + $0xe0] sm:$0xff]  ;;  %v7812_v55 = vmov 0.0|0.0  }
  0x10   :  { %6528 = vmatprep.subr.bf16.mxu1 %v7981_v43  ;;  %v41_v1 = vld [vmem:[%s9776_s1 + $0x50] sm:$0xff]  ;;  %v42_v2 = vld [vmem:[%s9776_s1 + $0x58] sm:$0xff]  ;;  %v8056_v5 = vpack.c.bf16 %v90_v61, %v89_v60  ;;  %v60_v10 = vld [vmem:[%s9776_s1 + $0xe8] sm:$0xff] }
  0x11   :  { %6498 = vmatpush3.bf16.msra.mxu0 %v7996_v48  ;;  %v73_v4 = vld [vmem:[%s9776_s1 + $0x150] sm:$0xff]  ;;  %v74_v6 = vld [vmem:[%s9776_s1 + $0x158] sm:$0xff]  ;;  %v91_v11 = vld [vmem:[%s9776_s1 + $0x1e0] sm:$0xff]  ;;  %v8074_v14 = vpack.c.bf16 %v42_v2, %v41_v1  ;;  %v8086_v20 = vpack.c.bf16 %v60_v10, %v59_v9 }
  0x12   :  { %6500 = vmatprep.subr.bf16.mxu0 %v8008_v52  ;;  %v92_v13 = vld [vmem:[%s9776_s1 + $0x1e8] sm:$0xff]  ;;  %v43_v15 = vld [vmem:[%s9776_s1 + $0x60] sm:$0xff]  ;;  %v8084_v19 = vpack.c.bf16 %v74_v6, %v73_v4  ;;  %v61_v28 = vld [vmem:[%s9776_s1 + $0xf0] sm:$0xff]  ;;  %v7814_v4 = vmov 0.0  }
  0x13   :  { %6530 = vmatpush3.bf16.msra.mxu1 %v8006_v51  ;;  %v27_v18 = vld [vmem:[%s9777_s0 + $0x8] sm:$0xff]  ;;  %v75_v23 = vld [vmem:[%s9776_s1 + $0x160] sm:$0xff]  ;;  %v8098_v27 = vpack.c.bf16 %v92_v13, %v91_v11  ;;  %v62_v29 = vld [vmem:[%s9776_s1 + $0xf8] sm:$0xff] }
  0x14   :  { %6532 = vmatprep.subr.bf16.mxu1 %v8020_v56  ;;  %v44_v22 = vld [vmem:[%s9776_s1 + $0x68] sm:$0xff]  ;;  %178 = vmatprep.mubr.f32.mxu0 %v27_v18  ;;  %v29_v30 = vld [vmem:[%s9777_s0 + $0x18] sm:$0xff]  ;;  %v93_v31 = vld [vmem:[%s9776_s1 + $0x1f0] sm:$0xff]  ;;  %v8122_v37 = vpack.c.bf16 %v62_v29, %v61_v28 }
  0x15   :  { %6502 = vmatpush3.bf16.msra.mxu0 %v8038_v62  ;;  %v76_v24 = vld [vmem:[%s9776_s1 + $0x168] sm:$0xff]  ;;  %v94_v32 = vld [vmem:[%s9776_s1 + $0x1f8] sm:$0xff]  ;;  %248 = vmatprep.mubr.f32.mxu1 %v29_v30  ;;  %v8116_v35 = vpack.c.bf16 %v44_v22, %v43_v15  ;;  %v45_v40 = vld [vmem:[%s9776_s1 + $0x70] sm:$0xff] }
  0x16   :  { %6504 = vmatprep.subr.bf16.mxu0 %v8044_v0  ;;  %v8120_v36 = vpack.c.bf16 %v76_v24, %v75_v23  ;;  %v46_v41 = vld [vmem:[%s9776_s1 + $0x78] sm:$0xff]  ;;  %v8131_v42 = vpack.c.bf16 %v94_v32, %v93_v31  ;;  %v77_v44 = vld [vmem:[%s9776_s1 + $0x170] sm:$0xff]  ;;  %v95_v49 = vld [vmem:[%s9776_s1 + $0x200] sm:$0xff] }
  0x17   :  { %6534 = vmatpush3.bf16.msra.mxu1 %v8042_v63  ;;  %v78_v45 = vld [vmem:[%s9776_s1 + $0x178] sm:$0xff]  ;;  %v8140_v46 = vpack.c.bf16 %v46_v41, %v45_v40  ;;  %v96_v50 = vld [vmem:[%s9776_s1 + $0x208] sm:$0xff]  ;;  %v26_v53 = vld [vmem:[%s9777_s0] sm:$0xff] }
  0x18   :  { %6536 = vmatprep.subr.bf16.mxu1 %v8056_v5  ;;  %v8144_v47 = vpack.c.bf16 %v78_v45, %v77_v44  ;;  %v8157_v54 = vpack.c.bf16 %v96_v50, %v95_v49  ;;  %v28_v57 = vld [vmem:[%s9777_s0 + $0x10] sm:$0xff]  ;;  %v98_v59 = vld [vmem:[%s9776_s1 + $0x218] sm:$0xff]  ;;  %v99_v1 = vld [vmem:[%s9776_s1 + $0x220] sm:$0xff] }
  0x19   :  { %6506 = vmatpush3.bf16.msra.mxu0 %v8074_v14  ;;  %v97_v58 = vld [vmem:[%s9776_s1 + $0x210] sm:$0xff]  ;;  %v100_v2 = vld [vmem:[%s9776_s1 + $0x228] sm:$0xff]  ;;  %v102_v10 = vld [vmem:[%s9776_s1 + $0x238] sm:$0xff] }
  0x1a   :  { %6508 = vmatprep.subr.bf16.mxu0 %v8086_v20  ;;  %v8172_v60 = vpack.c.bf16 %v98_v59, %v97_v58  ;;  %v4216_v61 = vld [vmem:[%s9777_s0 + $0x30] sm:$0xff]  ;;  %v8189_v6 = vpack.c.bf16 %v100_v2, %v99_v1  ;;  %v30_v13 = vld [vmem:[%s9777_s0 + $0x20] sm:$0xff]  ;;  %v4215_v18 = vld [vmem:[%s9777_s0 + $0x28] sm:$0xff] }
  0x1b   :  { %6538 = vmatpush3.bf16.msra.mxu1 %v8084_v19  ;;  %v101_v9 = vld [vmem:[%s9776_s1 + $0x230] sm:$0xff]  ;;  %v4218_v15 = vld [vmem:[%s9777_s0 + $0x40] sm:$0xff]  ;;  %v326_v23 = vld [vmem:[%s9778_s3 + $0x8] sm:$0xff] }
  0x1c   :  { %6540 = vmatprep.subr.bf16.mxu1 %v8098_v27  ;;  %v8201_v11 = vpack.c.bf16 %v102_v10, %v101_v9  ;;  %v325_v22 = vld [vmem:[%s9778_s3] sm:$0xff]  ;;  %v4217_v24 = vld [vmem:[%s9777_s0 + $0x38] sm:$0xff]  ;;  %v4219_v28 = vld [vmem:[%s9777_s0 + $0x48] sm:$0xff] }
  0x1d   :  { %6510 = vmatpush3.bf16.msra.mxu0 %v8116_v35  ;;  %v6660_v29 = vpack.c.bf16 %v326_v23, %v325_v22  ;;  %v327_v30 = vld [vmem:[%s9778_s3 + $0x10] sm:$0xff]  ;;  %v328_v31 = vld [vmem:[%s9778_s3 + $0x18] sm:$0xff]  ;;  %v329_v40 = vld [vmem:[%s9778_s3 + $0x20] sm:$0xff] }
  0x1e   :  { %6512 = vmatprep.subr.bf16.mxu0 %v8122_v37  ;;  %v6663_v32 = vpack.c.bf16 %v328_v31, %v327_v30  ;;  %v330_v41 = vld [vmem:[%s9778_s3 + $0x28] sm:$0xff]  ;;  %v331_v45 = vld [vmem:[%s9778_s3 + $0x30] sm:$0xff]  ;;  %v332_v49 = vld [vmem:[%s9778_s3 + $0x38] sm:$0xff] }
  0x1f   :  { %6542 = vmatpush3.bf16.msra.mxu1 %v8120_v36  ;;  %v6666_v44 = vpack.c.bf16 %v330_v41, %v329_v40  ;;  %v6669_v50 = vpack.c.bf16 %v332_v49, %v331_v45  ;;  %v335_v59 = vld [vmem:[%s9778_s3 + $0x50] sm:$0xff]  ;;  %v337_v2 = vld [vmem:[%s9778_s3 + $0x60] sm:$0xff]  ;;  %v338_v9 = vld [vmem:[%s9778_s3 + $0x68] sm:$0xff] }
  0x20   :  { %6544 = vmatprep.subr.bf16.mxu1 %v8131_v42  ;;  %v6678_v10 = vpack.c.bf16 %v338_v9, %v337_v2  ;;  %v4221_v22 = vld [vmem:[%s9778_s3 + $0x80] sm:$0xff]  ;;  %v4222_v23 = vld [vmem:[%s9778_s3 + $0x88] sm:$0xff]  ;;  %v4227_v41 = vld [vmem:[%s9778_s3 + $0xb0] sm:$0xff] }
  0x21   :  { %6514 = vmatpush3.bf16.msra.mxu0 %v8140_v46  ;;  %v4225_v31 = vld [vmem:[%s9778_s3 + $0xa0] sm:$0xff]  ;;  %v4235_v9 = vld [vmem:[%s9778_s3 + $0xf0] sm:$0xff] }
  0x22   :  { %6547 = vmatprep.subr.bf16.mxu0 %v7812_v55  ;;  %v4229_v49 = vld [vmem:[%s9778_s3 + $0xc0] sm:$0xff] }
  0x23   :  { %6546 = vmatpush3.bf16.msra.mxu1 %v8144_v47 }
  0x24   :  { %6560 = vmatprep.subr.bf16.mxu1 %v7864_v3  ;;  %179 = vmatmul.mubr.f32.vlgmr.msra.gmra.mrb[0].mxu0 %v26_v53  ;;  %v333_v53 = vld [vmem:[%s9778_s3 + $0x40] sm:$0xff] }
  0x25   :  { %6549 = vmatpush3.bf16.msra.mxu0 %v8157_v54  ;;  %5762 = vmatprep.mubr.msk.f32.mxu0 %vm7813_vm0, %v7814_v4 }
  0x26   :  { %249 = vmatmul.mubr.f32.vlgmr.msra.gmra.mrb[0].mxu1 %v28_v57  ;;  %6550 = vmatprep.subr.bf16.mxu0 %v7812_v55  ;;  %v334_v57 = vld [vmem:[%s9778_s3 + $0x48] sm:$0xff] }
  0x27   :  { %6562 = vmatpush3.bf16.msra.mxu1 %v7875_v7  ;;  %414 = vmatprep.mubr.f32.mxu1 %v4216_v61  ;;  %v6672_v58 = vpack.c.bf16 %v334_v57, %v333_v53  ;;  %v336_v61 = vld [vmem:[%s9778_s3 + $0x58] sm:$0xff]  ;;  %v4231_v57 = vld [vmem:[%s9778_s3 + $0xd0] sm:$0xff] }
  0x28   :  { %6564 = vmatprep.subr.bf16.mxu1 %v7902_v16  ;;  %v6675_v1 = vpack.c.bf16 %v336_v61, %v335_v59  ;;  %v4233_v61 = vld [vmem:[%s9778_s3 + $0xe0] sm:$0xff] }
  0x29   :  { %6552 = vmatpush3.bf16.msra.mxu0 %v8172_v60 }
  0x2a   :  { %6553 = vmatprep.subr.bf16.mxu0 %v7812_v55 }
  0x2b   :  { %6566 = vmatpush3.bf16.msra.mxu1 %v7904_v17 }
  0x2c   :  { %6568 = vmatprep.subr.bf16.mxu1 %v7930_v26 }
  0x2d   :  { %6555 = vmatpush3.bf16.msra.mxu0 %v8189_v6 }
  0x2e   :  { %6556 = vmatprep.subr.bf16.mxu0 %v7812_v55 }
  0x2f   :  { %6570 = vmatpush3.bf16.msra.mxu1 %v7952_v33 }
  0x30   :  { %6572 = vmatprep.subr.bf16.mxu1 %v7969_v39 }
  0x31   :  { %6558 = vmatpush3.bf16.msra.mxu0 %v8201_v11 }
  0x32   :  { %6592 = vmatprep.subr.bf16.mxu0 %v7877_v8 }
  0x33   :  { %6574 = vmatpush3.bf16.msra.mxu1 %v7996_v48 }
  0x34   :  { %6576 = vmatprep.subr.bf16.mxu1 %v8008_v52  ;;  %5763 = vmatmul.mubr.msk.f32.vlgmr.msra.gmra.mrb[2].mxu0 %vm110_vm1, %v30_v13  ;;  %v339_v13 = vld [vmem:[%s9778_s3 + $0x70] sm:$0xff] }
  0x35   :  { %6594 = vmatpush3.bf16.msra.mxu0 %v7889_v12  ;;  %484 = vmatprep.mubr.f32.mxu0 %v4218_v15  ;;  %v340_v15 = vld [vmem:[%s9778_s3 + $0x78] sm:$0xff] }
  0x36   :  { %6596 = vmatprep.subr.bf16.mxu0 %v7916_v21 }
  0x37   :  { %6578 = vmatpush3.bf16.msra.mxu1 %v8038_v62 }
  0x38   :  { %6580 = vmatprep.subr.bf16.mxu1 %v8044_v0 }
  0x39   :  { %6598 = vmatpush3.bf16.msra.mxu0 %v7928_v25 }
  0x3a   :  { %6600 = vmatprep.subr.bf16.mxu0 %v7954_v34 }
  0x3b   :  { %6582 = vmatpush3.bf16.msra.mxu1 %v8074_v14 }
  0x3c   :  { %6584 = vmatprep.subr.bf16.mxu1 %v8086_v20 }
  0x3d   :  { %6602 = vmatpush3.bf16.msra.mxu0 %v7967_v38 }
  0x3e   :  { %6604 = vmatprep.subr.bf16.mxu0 %v7981_v43 }
  0x3f   :  { %6586 = vmatpush3.bf16.msra.mxu1 %v8116_v35 }
  0x40   :  { %6588 = vmatprep.subr.bf16.mxu1 %v8122_v37 }
  0x41   :  { %6606 = vmatpush3.bf16.msra.mxu0 %v8006_v51 }
  0x42   :  { %6608 = vmatprep.subr.bf16.mxu0 %v8020_v56 }
  0x43   :  { %6590 = vmatpush3.bf16.msra.mxu1 %v8140_v46 }
  0x44   :  { %6623 = vmatprep.subr.bf16.mxu1 %v7812_v55 }
  0x45   :  { %6610 = vmatpush3.bf16.msra.mxu0 %v8042_v63 }
  0x46   :  { %415 = vmatmul.mubr.f32.vlgmr.msra.gmra.mrb[2].mxu1 %v4215_v18  ;;  %6612 = vmatprep.subr.bf16.mxu0 %v8056_v5  ;;  %v6681_v18 = vpack.c.bf16 %v340_v15, %v339_v13 }
  0x47   :  { %6625 = vmatpush3.bf16.msra.mxu1 %v8157_v54  ;;  %5781 = vmatprep.mubr.msk.f32.mxu1 %vm7813_vm0, %v7814_v4 }
  0x48   :  { %6626 = vmatprep.subr.bf16.mxu1 %v7812_v55 }
  0x49   :  { %6614 = vmatpush3.bf16.msra.mxu0 %v8084_v19 }
  0x4a   :  { %6616 = vmatprep.subr.bf16.mxu0 %v8098_v27 }
  0x4b   :  { %6628 = vmatpush3.bf16.msra.mxu1 %v8172_v60 }
  0x4c   :  { %6629 = vmatprep.subr.bf16.mxu1 %v7812_v55 }
  0x4d   :  { %6618 = vmatpush3.bf16.msra.mxu0 %v8120_v36 }
  0x4e   :  { %6620 = vmatprep.subr.bf16.mxu0 %v8131_v42 }
  0x4f   :  { %6631 = vmatpush3.bf16.msra.mxu1 %v8189_v6 }
  0x50   :  { %6632 = vmatprep.subr.bf16.mxu1 %v7812_v55 }
  0x51   :  { %6622 = vmatpush3.bf16.msra.mxu0 %v8144_v47 }
  0x52   :  { %6635 = vmatprep.subr.bf16.mxu0 %v7812_v55 }
  0x53   :  { %6634 = vmatpush3.bf16.msra.mxu1 %v8201_v11 }
  0x54   :  { %6659 = vmatprep.subr.bf16.mxu1 %v7812_v55  ;;  %485 = vmatmul.mubr.f32.vlgmr.msra.gmra.mrb[4].mxu0 %v4217_v24  ;;  %v4223_v24 = vld [vmem:[%s9778_s3 + $0x90] sm:$0xff] }
  0x55   :  { %5816 = vmatprep.mubr.msk.f32.mxu0 %vm7813_vm0, %v7814_v4 }
  0x56   :  { %5782 = vmatmul.mubr.msk.f32.vlgmr.msra.gmra.mrb[4].mxu1 %vm110_vm1, %v4219_v28  ;;  %v6636_v28 = vpack.c.bf16 %v4222_v23, %v4221_v22 }
  0x57   :  { %6661 = vmatpush3.bf16.msra.mxu1 %v6660_v29  ;;  %5851 = vmatprep.mubr.msk.f32.mxu1 %vm7813_vm0, %v7814_v4  ;;  %v4224_v29 = vld [vmem:[%s9778_s3 + $0x98] sm:$0xff] }
  0x58   :  { %6662 = vmatprep.subr.bf16.mxu1 %v7812_v55  ;;  %6637 = vmatpush3.bf16.msra.mxu0 %v6636_v28  ;;  %v6639_v30 = vpack.c.bf16 %v4224_v29, %v4223_v24 }
  0x59   :  { %6638 = vmatprep.subr.bf16.mxu0 %v7812_v55 }
  0x5b   :  { %6664 = vmatpush3.bf16.msra.mxu1 %v6663_v32  ;;  %v4226_v32 = vld [vmem:[%s9778_s3 + $0xa8] sm:$0xff] }
  0x5c   :  { %6665 = vmatprep.subr.bf16.mxu1 %v7812_v55  ;;  %6640 = vmatpush3.bf16.msra.mxu0 %v6639_v30  ;;  %v6642_v40 = vpack.c.bf16 %v4226_v32, %v4225_v31 }
  0x5d   :  { %6641 = vmatprep.subr.bf16.mxu0 %v7812_v55 }
  0x5f   :  { %6667 = vmatpush3.bf16.msra.mxu1 %v6666_v44  ;;  %v4228_v44 = vld [vmem:[%s9778_s3 + $0xb8] sm:$0xff] }
  0x60   :  { %6668 = vmatprep.subr.bf16.mxu1 %v7812_v55  ;;  %6643 = vmatpush3.bf16.msra.mxu0 %v6642_v40  ;;  %v6645_v45 = vpack.c.bf16 %v4228_v44, %v4227_v41 }
  0x61   :  { %6644 = vmatprep.subr.bf16.mxu0 %v7812_v55 }
  0x63   :  { %6670 = vmatpush3.bf16.msra.mxu1 %v6669_v50  ;;  %v4230_v50 = vld [vmem:[%s9778_s3 + $0xc8] sm:$0xff] }
  0x64   :  { %6671 = vmatprep.subr.bf16.mxu1 %v7812_v55  ;;  %6646 = vmatpush3.bf16.msra.mxu0 %v6645_v45  ;;  %v6648_v53 = vpack.c.bf16 %v4230_v50, %v4229_v49  ;;  %v4240_v45 = vld [vmem:[%s9777_s0 + $0x68] sm:$0xff] }
  0x65   :  { %6647 = vmatprep.subr.bf16.mxu0 %v7812_v55 }
  0x67   :  { %6673 = vmatpush3.bf16.msra.mxu1 %v6672_v58  ;;  %v4232_v58 = vld [vmem:[%s9778_s3 + $0xd8] sm:$0xff] }
  0x68   :  { %6674 = vmatprep.subr.bf16.mxu1 %v7812_v55  ;;  %6649 = vmatpush3.bf16.msra.mxu0 %v6648_v53  ;;  %v6651_v59 = vpack.c.bf16 %v4232_v58, %v4231_v57 }
  0x69   :  { %6650 = vmatprep.subr.bf16.mxu0 %v7812_v55 }
  0x6b   :  { %6676 = vmatpush3.bf16.msra.mxu1 %v6675_v1  ;;  %v4234_v1 = vld [vmem:[%s9778_s3 + $0xe8] sm:$0xff] }
  0x6c   :  { %6677 = vmatprep.subr.bf16.mxu1 %v7812_v55  ;;  %6652 = vmatpush3.bf16.msra.mxu0 %v6651_v59  ;;  %v6654_v2 = vpack.c.bf16 %v4234_v1, %v4233_v61 }
  0x6d   :  { %6653 = vmatprep.subr.bf16.mxu0 %v7812_v55 }
  0x6f   :  { %6679 = vmatpush3.bf16.msra.mxu1 %v6678_v10  ;;  %v4236_v10 = vld [vmem:[%s9778_s3 + $0xf8] sm:$0xff] }
  0x70   :  { %6680 = vmatprep.subr.bf16.mxu1 %v7812_v55  ;;  %6655 = vmatpush3.bf16.msra.mxu0 %v6654_v2  ;;  %v6657_v13 = vpack.c.bf16 %v4236_v10, %v4235_v9  ;;  %v4239_v9 = vld [vmem:[%s9777_s0 + $0x60] sm:$0xff] }
  0x71   :  { %6656 = vmatprep.subr.bf16.mxu0 %v7812_v55 }
  0x73   :  { %6682 = vmatpush3.bf16.msra.mxu1 %v6681_v18  ;;  %v8380_v18 = vld [vmem:[%s9779_s2] ss:$0 sm:$0xff] }
  0x74   :  { %6716 = vmatprep.subr.bf16.mxu1 %v7877_v8  ;;  %6658 = vmatpush3.bf16.msra.mxu0 %v6657_v13 }
  0x75   :  { %6684 = vmatprep.subr.bf16.mxu0 %v7864_v3 }
  0xf7   :  { %v4513_v15 = vpop.f32.mrb[0].mxu0 }
  0xf8   :  { %v4514_v22 = vpop.f32.mrb[1].mxu0 }
  0xf9   :  { %v4548_v23 = vpop.f32.mrb[0].mxu1  ;;  %v4515_v24 = vadd.f32 %v4514_v22, %v4513_v15  ;;  %v4238_v22 = vld [vmem:[%s9777_s0 + $0x58] sm:$0xff] }
  0xfa   :  { %v4549_v28 = vpop.f32.mrb[1].mxu1 }
  0xfb   :  { %v4550_v29 = vadd.f32 %v4549_v28, %v4548_v23  ;;  %v181_v30 = vadd.f32 %v4515_v24, %v8380_v18  ;;  %v4237_v23 = vld [vmem:[%s9777_s0 + $0x50] sm:$0xff]  ;;  %v4243_v28 = vld [vmem:[%s9778_s3 + $0x100] sm:$0xff] }
  0xfc   :  { %v4241_v24 = vld [vmem:[%s9777_s0 + $0x70] sm:$0xff] }
  0xfd   :  { %v251_v31 = vadd.f32 %v4550_v29, %v181_v30  ;;  %v4244_v29 = vld [vmem:[%s9778_s3 + $0x108] sm:$0xff]  ;;  %v4245_v30 = vld [vmem:[%s9778_s3 + $0x110] sm:$0xff] }
 0x107   :  { %v320_v32 = vpop.f32.mrb[2].mxu0 }
 0x108   :  { %v321_v40 = vadd.f32 %v320_v32, %v251_v31  ;;  %v5764_v41 = vpop.f32.mrb[3].mxu0  ;;  %v6760_v31 = vpack.c.bf16 %v4244_v29, %v4243_v28  ;;  %v4246_v32 = vld [vmem:[%s9778_s3 + $0x118] sm:$0xff] }
 0x109   :  { %v4247_v41 = vld [vmem:[%s9778_s3 + $0x120] sm:$0xff]  ;;  %v4259_v28 = vld [vmem:[%s9777_s0 + $0x78] sm:$0xff] }
 0x10a   :  { %v324_v44 = vmax.f32 %v321_v40, 0.0  ;;  %v6763_v40 = vpack.c.bf16 %v4246_v32, %v4245_v30  ;;  %v4263_v29 = vld [vmem:[%s9777_s0 + $0x98] sm:$0xff] }
 0x10c   :  { %5852 = vmatmul.mubr.f32.vlgmr.msra.gmra.mrb[6].mxu1 %v324_v44  ;;  %v4248_v44 = vld [vmem:[%s9778_s3 + $0x128] sm:$0xff] }
 0x10d   :  { %6718 = vmatpush3.bf16.msra.mxu1 %v7889_v12  ;;  %861 = vmatprep.mubr.f32.mxu1 %v4240_v45  ;;  %v6766_v45 = vpack.c.bf16 %v4248_v44, %v4247_v41 }
 0x10e   :  { %6720 = vmatprep.subr.bf16.mxu1 %v7916_v21 }
 0x111   :  { %6722 = vmatpush3.bf16.msra.mxu1 %v7928_v25 }
 0x112   :  { %6724 = vmatprep.subr.bf16.mxu1 %v7954_v34 }
 0x115   :  { %6726 = vmatpush3.bf16.msra.mxu1 %v7967_v38 }
 0x116   :  { %6728 = vmatprep.subr.bf16.mxu1 %v7981_v43 }
 0x119   :  { %v4592_v49 = vpop.f32.mrb[2].mxu1  ;;  %6730 = vmatpush3.bf16.msra.mxu1 %v8006_v51 }
 0x11a   :  { %v4593_v50 = vpop.f32.mrb[3].mxu1  ;;  %6732 = vmatprep.subr.bf16.mxu1 %v8020_v56 }
 0x11b   :  { %v4594_v53 = vadd.f32 %v4593_v50, %v4592_v49  ;;  %v4249_v49 = vld [vmem:[%s9778_s3 + $0x130] sm:$0xff]  ;;  %v4250_v50 = vld [vmem:[%s9778_s3 + $0x138] sm:$0xff] }
 0x11d   :  { %6734 = vmatpush3.bf16.msra.mxu1 %v8042_v63  ;;  %v417_v61 = vadd.f32 %v4594_v53, %v8380_v18  ;;  %v6769_v53 = vpack.c.bf16 %v4250_v50, %v4249_v49 }
 0x11e   :  { %6736 = vmatprep.subr.bf16.mxu1 %v8056_v5 }
 0x121   :  { %6738 = vmatpush3.bf16.msra.mxu1 %v8084_v19 }
 0x122   :  { %6740 = vmatprep.subr.bf16.mxu1 %v8098_v27 }
 0x125   :  { %6742 = vmatpush3.bf16.msra.mxu1 %v8120_v36 }
 0x126   :  { %6744 = vmatprep.subr.bf16.mxu1 %v8131_v42 }
 0x127   :  { %v4627_v57 = vpop.f32.mrb[4].mxu0 }
 0x128   :  { %v4628_v58 = vpop.f32.mrb[5].mxu0 }
 0x129   :  { %v556_v59 = vpop.f32.mrb[4].mxu1  ;;  %v4629_v1 = vadd.f32 %v4628_v58, %v4627_v57  ;;  %6746 = vmatpush3.bf16.msra.mxu1 %v8144_v47  ;;  %v4251_v57 = vld [vmem:[%s9778_s3 + $0x140] sm:$0xff]  ;;  %v4252_v58 = vld [vmem:[%s9778_s3 + $0x148] sm:$0xff] }
 0x12a   :  { %v5783_v2 = vpop.f32.mrb[5].mxu1  ;;  %6759 = vmatprep.subr.bf16.mxu1 %v7812_v55 }
 0x12b   :  { %v487_v10 = vadd.f32 %v4629_v1, %v417_v61  ;;  %v4253_v61 = vld [vmem:[%s9778_s3 + $0x150] sm:$0xff]  ;;  %v4254_v1 = vld [vmem:[%s9778_s3 + $0x158] sm:$0xff] }
 0x12c   :  { %862 = vmatmul.mubr.f32.vlgmr.msra.gmra.mrb[8].mxu1 %v4239_v9  ;;  %v6775_v2 = vpack.c.bf16 %v4254_v1, %v4253_v61  ;;  %v4255_v9 = vld [vmem:[%s9778_s3 + $0x160] sm:$0xff] }
 0x12d   :  { %v557_v13 = vadd.f32 %v556_v59, %v487_v10  ;;  %5905 = vmatprep.mubr.msk.f32.mxu1 %vm7813_vm0, %v7814_v4  ;;  %6761 = vmatpush3.bf16.msra.mxu1 %v6760_v31  ;;  %v6772_v59 = vpack.c.bf16 %v4252_v58, %v4251_v57  ;;  %v4256_v10 = vld [vmem:[%s9778_s3 + $0x168] sm:$0xff] }
 0x12e   :  { %6762 = vmatprep.subr.bf16.mxu1 %v7812_v55 }
 0x12f   :  { %v560_v15 = vmax.f32 %v557_v13, 0.0  ;;  %v6778_v13 = vpack.c.bf16 %v4256_v10, %v4255_v9  ;;  %v4262_v10 = vld [vmem:[%s9777_s0 + $0x90] sm:$0xff] }
 0x131   :  { %5817 = vmatmul.mubr.f32.vlgmr.msra.gmra.mrb[6].mxu0 %v560_v15  ;;  %6764 = vmatpush3.bf16.msra.mxu1 %v6763_v40  ;;  %v4257_v15 = vld [vmem:[%s9778_s3 + $0x170] sm:$0xff] }
 0x132   :  { %6686 = vmatpush3.bf16.msra.mxu0 %v7875_v7  ;;  %791 = vmatprep.mubr.f32.mxu0 %v4238_v22  ;;  %v4258_v22 = vld [vmem:[%s9778_s3 + $0x178] sm:$0xff] }
 0x133   :  { %6688 = vmatprep.subr.bf16.mxu0 %v7902_v16  ;;  %6765 = vmatprep.subr.bf16.mxu1 %v7812_v55 }
 0x135   :  { %6767 = vmatpush3.bf16.msra.mxu1 %v6766_v45 }
 0x136   :  { %6690 = vmatpush3.bf16.msra.mxu0 %v7904_v17  ;;  %6768 = vmatprep.subr.bf16.mxu1 %v7812_v55 }
 0x137   :  { %6692 = vmatprep.subr.bf16.mxu0 %v7930_v26 }
 0x139   :  { %6770 = vmatpush3.bf16.msra.mxu1 %v6769_v53 }
 0x13a   :  { %6694 = vmatpush3.bf16.msra.mxu0 %v7952_v33  ;;  %6771 = vmatprep.subr.bf16.mxu1 %v7812_v55 }
 0x13b   :  { %6696 = vmatprep.subr.bf16.mxu0 %v7969_v39 }
 0x13d   :  { %6773 = vmatpush3.bf16.msra.mxu1 %v6772_v59 }
 0x13e   :  { %6698 = vmatpush3.bf16.msra.mxu0 %v7996_v48  ;;  %6774 = vmatprep.subr.bf16.mxu1 %v7812_v55 }
 0x13f   :  { %6700 = vmatprep.subr.bf16.mxu0 %v8008_v52 }
 0x141   :  { %6776 = vmatpush3.bf16.msra.mxu1 %v6775_v2 }
 0x142   :  { %6702 = vmatpush3.bf16.msra.mxu0 %v8038_v62  ;;  %6777 = vmatprep.subr.bf16.mxu1 %v7812_v55 }
 0x143   :  { %6704 = vmatprep.subr.bf16.mxu0 %v8044_v0 }
 0x145   :  { %6779 = vmatpush3.bf16.msra.mxu1 %v6778_v13  ;;  %v4261_v13 = vld [vmem:[%s9777_s0 + $0x88] sm:$0xff] }
 0x146   :  { %6706 = vmatpush3.bf16.msra.mxu0 %v8074_v14  ;;  %6780 = vmatprep.subr.bf16.mxu1 %v7812_v55 }
 0x147   :  { %6708 = vmatprep.subr.bf16.mxu0 %v8086_v20 }
 0x14a   :  { %6710 = vmatpush3.bf16.msra.mxu0 %v8116_v35 }
 0x14b   :  { %6712 = vmatprep.subr.bf16.mxu0 %v8122_v37 }
 0x14e   :  { %6714 = vmatpush3.bf16.msra.mxu0 %v8140_v46 }
 0x14f   :  { %6747 = vmatprep.subr.bf16.mxu0 %v7812_v55 }
 0x151   :  { %792 = vmatmul.mubr.f32.vlgmr.msra.gmra.mrb[8].mxu0 %v4237_v23  ;;  %v6781_v23 = vpack.c.bf16 %v4258_v22, %v4257_v15  ;;  %v4265_v15 = vld [vmem:[%s9778_s3 + $0x180] sm:$0xff]  ;;  %v4266_v22 = vld [vmem:[%s9778_s3 + $0x188] sm:$0xff] }
 0x152   :  { %6749 = vmatpush3.bf16.msra.mxu0 %v8157_v54  ;;  %5870 = vmatprep.mubr.msk.f32.mxu0 %vm7813_vm0, %v7814_v4 }
 0x153   :  { %6750 = vmatprep.subr.bf16.mxu0 %v7812_v55  ;;  %6782 = vmatpush3.bf16.msra.mxu1 %v6781_v23  ;;  %v4267_v23 = vld [vmem:[%s9778_s3 + $0x190] sm:$0xff] }
 0x154   :  { %6816 = vmatprep.subr.bf16.mxu1 %v7877_v8 }
 0x156   :  { %6752 = vmatpush3.bf16.msra.mxu0 %v8172_v60 }
 0x157   :  { %6753 = vmatprep.subr.bf16.mxu0 %v7812_v55 }
 0x15a   :  { %6755 = vmatpush3.bf16.msra.mxu0 %v8189_v6 }
 0x15b   :  { %6756 = vmatprep.subr.bf16.mxu0 %v7812_v55 }
 0x15e   :  { %6758 = vmatpush3.bf16.msra.mxu0 %v8201_v11 }
 0x15f   :  { %6784 = vmatprep.subr.bf16.mxu0 %v7864_v3 }
 0x161   :  { %5871 = vmatmul.mubr.msk.f32.vlgmr.msra.gmra.mrb[10].mxu0 %vm110_vm1, %v4241_v24  ;;  %v4260_v24 = vld [vmem:[%s9777_s0 + $0x80] sm:$0xff] }
 0x162   :  { %6786 = vmatpush3.bf16.msra.mxu0 %v7875_v7  ;;  %1099 = vmatprep.mubr.f32.mxu0 %v4260_v24  ;;  %v6860_v24 = vpack.c.bf16 %v4266_v22, %v4265_v15  ;;  %v4279_v15 = vld [vmem:[%s9778_s3 + $0x1f0] sm:$0xff]  ;;  %v4280_v22 = vld [vmem:[%s9778_s3 + $0x1f8] sm:$0xff] }
 0x163   :  { %6788 = vmatprep.subr.bf16.mxu0 %v7902_v16 }
 0x166   :  { %6790 = vmatpush3.bf16.msra.mxu0 %v7904_v17 }
 0x167   :  { %6792 = vmatprep.subr.bf16.mxu0 %v7930_v26 }
 0x16a   :  { %6794 = vmatpush3.bf16.msra.mxu0 %v7952_v33 }
 0x16b   :  { %6796 = vmatprep.subr.bf16.mxu0 %v7969_v39 }
 0x16e   :  { %6798 = vmatpush3.bf16.msra.mxu0 %v7996_v48 }
 0x16f   :  { %6800 = vmatprep.subr.bf16.mxu0 %v8008_v52 }
 0x172   :  { %6802 = vmatpush3.bf16.msra.mxu0 %v8038_v62 }
 0x173   :  { %6804 = vmatprep.subr.bf16.mxu0 %v8044_v0 }
 0x176   :  { %6806 = vmatpush3.bf16.msra.mxu0 %v8074_v14 }
 0x177   :  { %6808 = vmatprep.subr.bf16.mxu0 %v8086_v20 }
 0x17a   :  { %6810 = vmatpush3.bf16.msra.mxu0 %v8116_v35 }
 0x17b   :  { %6812 = vmatprep.subr.bf16.mxu0 %v8122_v37 }
 0x17e   :  { %6814 = vmatpush3.bf16.msra.mxu0 %v8140_v46 }
 0x17f   :  { %6847 = vmatprep.subr.bf16.mxu0 %v7812_v55 }
 0x181   :  { %1100 = vmatmul.mubr.f32.vlgmr.msra.gmra.mrb[12].mxu0 %v4259_v28  ;;  %v4268_v28 = vld [vmem:[%s9778_s3 + $0x198] sm:$0xff] }
 0x182   :  { %6849 = vmatpush3.bf16.msra.mxu0 %v8157_v54  ;;  %5924 = vmatprep.mubr.msk.f32.mxu0 %vm7813_vm0, %v7814_v4 }
 0x183   :  { %6850 = vmatprep.subr.bf16.mxu0 %v7812_v55 }
 0x186   :  { %6852 = vmatpush3.bf16.msra.mxu0 %v8172_v60 }
 0x187   :  { %6853 = vmatprep.subr.bf16.mxu0 %v7812_v55 }
 0x18a   :  { %6855 = vmatpush3.bf16.msra.mxu0 %v8189_v6 }
 0x18b   :  { %6856 = vmatprep.subr.bf16.mxu0 %v7812_v55 }
 0x18e   :  { %6858 = vmatpush3.bf16.msra.mxu0 %v8201_v11 }
 0x18f   :  { %6859 = vmatprep.subr.bf16.mxu0 %v7812_v55 }
 0x191   :  { %5925 = vmatmul.mubr.msk.f32.vlgmr.msra.gmra.mrb[14].mxu0 %vm110_vm1, %v4263_v29  ;;  %v6863_v29 = vpack.c.bf16 %v4268_v28, %v4267_v23 }
 0x192   :  { %5959 = vmatprep.mubr.msk.f32.mxu0 %vm7813_vm0, %v7814_v4  ;;  %6861 = vmatpush3.bf16.msra.mxu0 %v6860_v24  ;;  %v6881_v24 = vpack.c.bf16 %v4280_v22, %v4279_v15  ;;  %v4291_v22 = vld [vmem:[%s9778_s3 + $0x220] sm:$0xff] }
 0x193   :  { %6862 = vmatprep.subr.bf16.mxu0 %v7812_v55 }
 0x196   :  { %6864 = vmatpush3.bf16.msra.mxu0 %v6863_v29  ;;  %v4282_v29 = vld [vmem:[%s9777_s0 + $0xa8] sm:$0xff] }
 0x197   :  { %6865 = vmatprep.subr.bf16.mxu0 %v7812_v55 }
 0x1df   :  { %v714_v30 = vpop.f32.mrb[6].mxu1 }
 0x1e0   :  { %v5853_v31 = vpop.f32.mrb[7].mxu1 }
 0x1e1   :  { %v4270_v31 = vld [vmem:[%s9778_s3 + $0x1a8] sm:$0xff] }
 0x1ff   :  { %v4740_v32 = vpop.f32.mrb[8].mxu1 }
 0x200   :  { %v4741_v40 = vpop.f32.mrb[9].mxu1 }
 0x201   :  { %v4742_v41 = vadd.f32 %v4741_v40, %v4740_v32  ;;  %v4271_v40 = vld [vmem:[%s9778_s3 + $0x1b0] sm:$0xff] }
 0x204   :  { %v644_v44 = vpop.f32.mrb[6].mxu0 }
 0x205   :  { %v8538_v45 = vadd.f32 %v714_v30, %v644_v44  ;;  %v5818_v49 = vpop.f32.mrb[7].mxu0  ;;  %v4269_v30 = vld [vmem:[%s9778_s3 + $0x1a0] sm:$0xff] }
 0x206   :  { %v6866_v32 = vpack.c.bf16 %v4270_v31, %v4269_v30  ;;  %v4273_v49 = vld [vmem:[%s9778_s3 + $0x1c0] sm:$0xff] }
 0x207   :  { %v4281_v30 = vld [vmem:[%s9777_s0 + $0xa0] sm:$0xff] }
 0x208   :  { %6867 = vmatpush3.bf16.msra.mxu0 %v6866_v32  ;;  %v4285_v31 = vld [vmem:[%s9777_s0 + $0xc0] sm:$0xff] }
 0x209   :  { %6868 = vmatprep.subr.bf16.mxu0 %v7812_v55 }
 0x224   :  { %v4705_v50 = vpop.f32.mrb[8].mxu0 }
 0x225   :  { %v4706_v53 = vpop.f32.mrb[9].mxu0 }
 0x226   :  { %v4707_v57 = vadd.f32 %v4706_v53, %v4705_v50  ;;  %v4274_v50 = vld [vmem:[%s9778_s3 + $0x1c8] sm:$0xff] }
 0x227   :  { %v6872_v53 = vpack.c.bf16 %v4274_v50, %v4273_v49 }
 0x228   :  { %v794_v58 = vadd.f32 %v4707_v57, %v8380_v18  ;;  %v4275_v57 = vld [vmem:[%s9778_s3 + $0x1d0] sm:$0xff] }
 0x22a   :  { %v864_v59 = vadd.f32 %v4742_v41, %v794_v58  ;;  %v4272_v41 = vld [vmem:[%s9778_s3 + $0x1b8] sm:$0xff] }
 0x22b   :  { %v6869_v44 = vpack.c.bf16 %v4272_v41, %v4271_v40  ;;  %v4276_v58 = vld [vmem:[%s9778_s3 + $0x1d8] sm:$0xff] }
 0x22d   :  { %6870 = vmatpush3.bf16.msra.mxu0 %v6869_v44 }
 0x22e   :  { %6871 = vmatprep.subr.bf16.mxu0 %v7812_v55 }
 0x231   :  { %6873 = vmatpush3.bf16.msra.mxu0 %v6872_v53 }
 0x232   :  { %6874 = vmatprep.subr.bf16.mxu0 %v7812_v55 }
 0x234   :  { %v933_v61 = vpop.f32.mrb[10].mxu0 }
 0x235   :  { %v934_v1 = vadd.f32 %v933_v61, %v864_v59  ;;  %v5872_v2 = vpop.f32.mrb[11].mxu0 }
 0x237   :  { %v937_v9 = vmax.f32 %v934_v1, 0.0  ;;  %v6875_v1 = vpack.c.bf16 %v4276_v58, %v4275_v57 }
 0x239   :  { %5906 = vmatmul.mubr.f32.vlgmr.msra.gmra.mrb[10].mxu1 %v937_v9  ;;  %6876 = vmatpush3.bf16.msra.mxu0 %v6875_v1  ;;  %v4277_v9 = vld [vmem:[%s9778_s3 + $0x1e0] sm:$0xff] }
 0x23a   :  { %6818 = vmatpush3.bf16.msra.mxu1 %v7889_v12  ;;  %1169 = vmatprep.mubr.f32.mxu1 %v4262_v10  ;;  %v4278_v10 = vld [vmem:[%s9778_s3 + $0x1e8] sm:$0xff]  ;;  %v4287_v1 = vld [vmem:[%s9778_s3 + $0x200] sm:$0xff] }
 0x23b   :  { %6820 = vmatprep.subr.bf16.mxu1 %v7916_v21  ;;  %6877 = vmatprep.subr.bf16.mxu0 %v7812_v55 }
 0x23e   :  { %6822 = vmatpush3.bf16.msra.mxu1 %v7928_v25 }
 0x23f   :  { %6824 = vmatprep.subr.bf16.mxu1 %v7954_v34 }
 0x242   :  { %6826 = vmatpush3.bf16.msra.mxu1 %v7967_v38 }
 0x243   :  { %6828 = vmatprep.subr.bf16.mxu1 %v7981_v43 }
 0x246   :  { %6830 = vmatpush3.bf16.msra.mxu1 %v8006_v51 }
 0x247   :  { %6832 = vmatprep.subr.bf16.mxu1 %v8020_v56 }
 0x24a   :  { %6834 = vmatpush3.bf16.msra.mxu1 %v8042_v63 }
 0x24b   :  { %6836 = vmatprep.subr.bf16.mxu1 %v8056_v5 }
 0x24e   :  { %6838 = vmatpush3.bf16.msra.mxu1 %v8084_v19 }
 0x24f   :  { %6840 = vmatprep.subr.bf16.mxu1 %v8098_v27 }
 0x252   :  { %6842 = vmatpush3.bf16.msra.mxu1 %v8120_v36 }
 0x253   :  { %6844 = vmatprep.subr.bf16.mxu1 %v8131_v42 }
 0x254   :  { %v4801_v59 = vpop.f32.mrb[12].mxu0 }
 0x255   :  { %v4802_v61 = vpop.f32.mrb[13].mxu0 }
 0x256   :  { %6846 = vmatpush3.bf16.msra.mxu1 %v8144_v47  ;;  %v4803_v2 = vadd.f32 %v4802_v61, %v4801_v59  ;;  %v4284_v61 = vld [vmem:[%s9777_s0 + $0xb8] sm:$0xff] }
 0x257   :  { %6884 = vmatprep.subr.bf16.mxu1 %v7864_v3 }
 0x258   :  { %v1102_v50 = vadd.f32 %v4803_v2, %v8380_v18  ;;  %v4288_v2 = vld [vmem:[%s9778_s3 + $0x208] sm:$0xff] }
 0x259   :  { %1170 = vmatmul.mubr.f32.vlgmr.msra.gmra.mrb[12].mxu1 %v4261_v13  ;;  %v6878_v13 = vpack.c.bf16 %v4278_v10, %v4277_v9  ;;  %v4289_v9 = vld [vmem:[%s9778_s3 + $0x210] sm:$0xff]  ;;  %v6960_v10 = vpack.c.bf16 %v4288_v2, %v4287_v1  ;;  %v4302_v2 = vld [vmem:[%s9778_s3 + $0x278] sm:$0xff] }
 0x25a   :  { %6886 = vmatpush3.bf16.msra.mxu1 %v7875_v7  ;;  %1407 = vmatprep.mubr.f32.mxu1 %v4282_v29  ;;  %v4294_v29 = vld [vmem:[%s9778_s3 + $0x238] sm:$0xff]  ;;  %v4301_v1 = vld [vmem:[%s9778_s3 + $0x270] sm:$0xff] }
 0x25b   :  { %6888 = vmatprep.subr.bf16.mxu1 %v7902_v16  ;;  %6879 = vmatpush3.bf16.msra.mxu0 %v6878_v13  ;;  %v4290_v13 = vld [vmem:[%s9778_s3 + $0x218] sm:$0xff] }
 0x25c   :  { %6880 = vmatprep.subr.bf16.mxu0 %v7812_v55  ;;  %v6963_v15 = vpack.c.bf16 %v4290_v13, %v4289_v9 }
 0x25e   :  { %6890 = vmatpush3.bf16.msra.mxu1 %v7904_v17 }
 0x25f   :  { %6892 = vmatprep.subr.bf16.mxu1 %v7930_v26  ;;  %6882 = vmatpush3.bf16.msra.mxu0 %v6881_v24 }
 0x260   :  { %6916 = vmatprep.subr.bf16.mxu0 %v7877_v8 }
 0x262   :  { %6894 = vmatpush3.bf16.msra.mxu1 %v7952_v33 }
 0x263   :  { %6896 = vmatprep.subr.bf16.mxu1 %v7969_v39 }
 0x264   :  { %v1241_v23 = vpop.f32.mrb[14].mxu0 }
 0x265   :  { %v5926_v28 = vpop.f32.mrb[15].mxu0 }
 0x266   :  { %6898 = vmatpush3.bf16.msra.mxu1 %v7996_v48  ;;  %v4293_v28 = vld [vmem:[%s9778_s3 + $0x230] sm:$0xff] }
 0x267   :  { %6900 = vmatprep.subr.bf16.mxu1 %v8008_v52 }
 0x26a   :  { %6902 = vmatpush3.bf16.msra.mxu1 %v8038_v62 }
 0x26b   :  { %6904 = vmatprep.subr.bf16.mxu1 %v8044_v0 }
 0x26e   :  { %6906 = vmatpush3.bf16.msra.mxu1 %v8074_v14 }
 0x26f   :  { %6908 = vmatprep.subr.bf16.mxu1 %v8086_v20 }
 0x272   :  { %6910 = vmatpush3.bf16.msra.mxu1 %v8116_v35 }
 0x273   :  { %6912 = vmatprep.subr.bf16.mxu1 %v8122_v37 }
 0x276   :  { %6914 = vmatpush3.bf16.msra.mxu1 %v8140_v46 }
 0x277   :  { %6947 = vmatprep.subr.bf16.mxu1 %v7812_v55 }
 0x279   :  { %1408 = vmatmul.mubr.f32.vlgmr.msra.gmra.mrb[14].mxu1 %v4281_v30  ;;  %v6969_v30 = vpack.c.bf16 %v4294_v29, %v4293_v28 }
 0x27a   :  { %6949 = vmatpush3.bf16.msra.mxu1 %v8157_v54  ;;  %5978 = vmatprep.mubr.msk.f32.mxu1 %vm7813_vm0, %v7814_v4 }
 0x27b   :  { %6950 = vmatprep.subr.bf16.mxu1 %v7812_v55 }
 0x27e   :  { %6952 = vmatpush3.bf16.msra.mxu1 %v8172_v60 }
 0x27f   :  { %6953 = vmatprep.subr.bf16.mxu1 %v7812_v55 }
 0x282   :  { %6955 = vmatpush3.bf16.msra.mxu1 %v8189_v6 }
 0x283   :  { %6956 = vmatprep.subr.bf16.mxu1 %v7812_v55 }
 0x286   :  { %6958 = vmatpush3.bf16.msra.mxu1 %v8201_v11 }
 0x287   :  { %6959 = vmatprep.subr.bf16.mxu1 %v7812_v55 }
 0x289   :  { %5979 = vmatmul.mubr.msk.f32.vlgmr.msra.gmra.mrb[16].mxu1 %vm110_vm1, %v4285_v31  ;;  %v4295_v31 = vld [vmem:[%s9778_s3 + $0x240] sm:$0xff] }
 0x28a   :  { %6013 = vmatprep.mubr.msk.f32.mxu1 %vm7813_vm0, %v7814_v4  ;;  %6961 = vmatpush3.bf16.msra.mxu1 %v6960_v10  ;;  %v6981_v10 = vpack.c.bf16 %v4302_v2, %v4301_v1  ;;  %v4313_v2 = vld [vmem:[%s9778_s3 + $0x2a0] sm:$0xff] }
 0x28b   :  { %6962 = vmatprep.subr.bf16.mxu1 %v7812_v55 }
 0x28e   :  { %6964 = vmatpush3.bf16.msra.mxu1 %v6963_v15  ;;  %v4304_v15 = vld [vmem:[%s9777_s0 + $0xd0] sm:$0xff] }
 0x28f   :  { %6965 = vmatprep.subr.bf16.mxu1 %v7812_v55 }
 0x30c   :  { %v1021_v32 = vpop.f32.mrb[10].mxu1 }
 0x30d   :  { %v8658_v40 = vadd.f32 %v1021_v32, %v8538_v45  ;;  %v5907_v41 = vpop.f32.mrb[11].mxu1  ;;  %v4283_v45 = vld [vmem:[%s9777_s0 + $0xb0] sm:$0xff]  ;;  %v4296_v32 = vld [vmem:[%s9778_s3 + $0x248] sm:$0xff] }
 0x30e   :  { %v6972_v41 = vpack.c.bf16 %v4296_v32, %v4295_v31 }
 0x32c   :  { %v4836_v44 = vpop.f32.mrb[12].mxu1 }
 0x32d   :  { %v4837_v49 = vpop.f32.mrb[13].mxu1 }
 0x32e   :  { %v4838_v53 = vadd.f32 %v4837_v49, %v4836_v44  ;;  %v4297_v44 = vld [vmem:[%s9778_s3 + $0x250] sm:$0xff]  ;;  %v4298_v49 = vld [vmem:[%s9778_s3 + $0x258] sm:$0xff] }
 0x330   :  { %v1172_v57 = vadd.f32 %v4838_v53, %v1102_v50 }
 0x332   :  { %v1242_v58 = vadd.f32 %v1241_v23, %v1172_v57  ;;  %v4292_v23 = vld [vmem:[%s9778_s3 + $0x228] sm:$0xff]  ;;  %v6975_v57 = vpack.c.bf16 %v4298_v49, %v4297_v44 }
 0x333   :  { %v6966_v24 = vpack.c.bf16 %v4292_v23, %v4291_v22  ;;  %v4303_v22 = vld [vmem:[%s9777_s0 + $0xc8] sm:$0xff] }
 0x334   :  { %v1245_v59 = vmax.f32 %v1242_v58, 0.0  ;;  %v4307_v23 = vld [vmem:[%s9777_s0 + $0xe8] sm:$0xff] }
 0x335   :  { %6967 = vmatpush3.bf16.msra.mxu1 %v6966_v24 }
 0x336   :  { %5960 = vmatmul.mubr.f32.vlgmr.msra.gmra.mrb[16].mxu0 %v1245_v59  ;;  %6968 = vmatprep.subr.bf16.mxu1 %v7812_v55  ;;  %v4299_v59 = vld [vmem:[%s9778_s3 + $0x260] sm:$0xff] }
 0x337   :  { %6918 = vmatpush3.bf16.msra.mxu0 %v7889_v12  ;;  %1477 = vmatprep.mubr.f32.mxu0 %v4284_v61  ;;  %v4300_v61 = vld [vmem:[%s9778_s3 + $0x268] sm:$0xff] }
 0x338   :  { %6920 = vmatprep.subr.bf16.mxu0 %v7916_v21 }
 0x339   :  { %6970 = vmatpush3.bf16.msra.mxu1 %v6969_v30 }
 0x33a   :  { %6971 = vmatprep.subr.bf16.mxu1 %v7812_v55 }
 0x33b   :  { %6922 = vmatpush3.bf16.msra.mxu0 %v7928_v25 }
 0x33c   :  { %6924 = vmatprep.subr.bf16.mxu0 %v7954_v34 }
 0x33d   :  { %6973 = vmatpush3.bf16.msra.mxu1 %v6972_v41 }
 0x33e   :  { %6974 = vmatprep.subr.bf16.mxu1 %v7812_v55 }
 0x33f   :  { %6926 = vmatpush3.bf16.msra.mxu0 %v7967_v38 }
 0x340   :  { %6928 = vmatprep.subr.bf16.mxu0 %v7981_v43 }
 0x341   :  { %6976 = vmatpush3.bf16.msra.mxu1 %v6975_v57  ;;  %v4309_v57 = vld [vmem:[%s9778_s3 + $0x280] sm:$0xff] }
 0x342   :  { %6977 = vmatprep.subr.bf16.mxu1 %v7812_v55 }
 0x343   :  { %6930 = vmatpush3.bf16.msra.mxu0 %v8006_v51 }
 0x344   :  { %6932 = vmatprep.subr.bf16.mxu0 %v8020_v56 }
 0x347   :  { %6934 = vmatpush3.bf16.msra.mxu0 %v8042_v63 }
 0x348   :  { %6936 = vmatprep.subr.bf16.mxu0 %v8056_v5 }
 0x34b   :  { %6938 = vmatpush3.bf16.msra.mxu0 %v8084_v19 }
 0x34c   :  { %6940 = vmatprep.subr.bf16.mxu0 %v8098_v27  ;;  %v4897_v50 = vpop.f32.mrb[14].mxu1 }
 0x34d   :  { %v4898_v53 = vpop.f32.mrb[15].mxu1 }
 0x34e   :  { %v4899_v58 = vadd.f32 %v4898_v53, %v4897_v50  ;;  %v4306_v53 = vld [vmem:[%s9777_s0 + $0xe0] sm:$0xff] }
 0x34f   :  { %6942 = vmatpush3.bf16.msra.mxu0 %v8120_v36 }
 0x350   :  { %6944 = vmatprep.subr.bf16.mxu0 %v8131_v42  ;;  %v1410_v32 = vadd.f32 %v4899_v58, %v8380_v18  ;;  %v4310_v58 = vld [vmem:[%s9778_s3 + $0x288] sm:$0xff] }
 0x353   :  { %6946 = vmatpush3.bf16.msra.mxu0 %v8144_v47 }
 0x354   :  { %6984 = vmatprep.subr.bf16.mxu0 %v7864_v3 }
 0x356   :  { %1478 = vmatmul.mubr.f32.vlgmr.msra.gmra.mrb[18].mxu0 %v4283_v45  ;;  %v6978_v45 = vpack.c.bf16 %v4300_v61, %v4299_v59  ;;  %v4311_v59 = vld [vmem:[%s9778_s3 + $0x290] sm:$0xff]  ;;  %v7060_v61 = vpack.c.bf16 %v4310_v58, %v4309_v57  ;;  %v4324_v58 = vld [vmem:[%s9778_s3 + $0x2f8] sm:$0xff] }
 0x357   :  { %6986 = vmatpush3.bf16.msra.mxu0 %v7875_v7  ;;  %1715 = vmatprep.mubr.f32.mxu0 %v4304_v15  ;;  %v4316_v15 = vld [vmem:[%s9778_s3 + $0x2b8] sm:$0xff]  ;;  %v4323_v57 = vld [vmem:[%s9778_s3 + $0x2f0] sm:$0xff] }
 0x358   :  { %6988 = vmatprep.subr.bf16.mxu0 %v7902_v16  ;;  %6979 = vmatpush3.bf16.msra.mxu1 %v6978_v45  ;;  %v4312_v45 = vld [vmem:[%s9778_s3 + $0x298] sm:$0xff] }
 0x359   :  { %6980 = vmatprep.subr.bf16.mxu1 %v7812_v55  ;;  %v7063_v1 = vpack.c.bf16 %v4312_v45, %v4311_v59 }
 0x35b   :  { %6990 = vmatpush3.bf16.msra.mxu0 %v7904_v17 }
 0x35c   :  { %6992 = vmatprep.subr.bf16.mxu0 %v7930_v26  ;;  %v1549_v9 = vpop.f32.mrb[16].mxu1  ;;  %6982 = vmatpush3.bf16.msra.mxu1 %v6981_v10 }
 0x35d   :  { %v5980_v13 = vpop.f32.mrb[17].mxu1  ;;  %7016 = vmatprep.subr.bf16.mxu1 %v7877_v8 }
 0x35e   :  { %v4315_v13 = vld [vmem:[%s9778_s3 + $0x2b0] sm:$0xff] }
 0x35f   :  { %6994 = vmatpush3.bf16.msra.mxu0 %v7952_v33 }
 0x360   :  { %6996 = vmatprep.subr.bf16.mxu0 %v7969_v39 }
 0x363   :  { %6998 = vmatpush3.bf16.msra.mxu0 %v7996_v48 }
 0x364   :  { %7000 = vmatprep.subr.bf16.mxu0 %v8008_v52 }
 0x367   :  { %7002 = vmatpush3.bf16.msra.mxu0 %v8038_v62 }
 0x368   :  { %7004 = vmatprep.subr.bf16.mxu0 %v8044_v0 }
 0x36b   :  { %7006 = vmatpush3.bf16.msra.mxu0 %v8074_v14 }
 0x36c   :  { %7008 = vmatprep.subr.bf16.mxu0 %v8086_v20 }
 0x36f   :  { %7010 = vmatpush3.bf16.msra.mxu0 %v8116_v35 }
 0x370   :  { %7012 = vmatprep.subr.bf16.mxu0 %v8122_v37 }
 0x373   :  { %7014 = vmatpush3.bf16.msra.mxu0 %v8140_v46 }
 0x374   :  { %7047 = vmatprep.subr.bf16.mxu0 %v7812_v55 }
 0x376   :  { %1716 = vmatmul.mubr.f32.vlgmr.msra.gmra.mrb[20].mxu0 %v4303_v22  ;;  %v7069_v22 = vpack.c.bf16 %v4316_v15, %v4315_v13 }
 0x377   :  { %7049 = vmatpush3.bf16.msra.mxu0 %v8157_v54  ;;  %6032 = vmatprep.mubr.msk.f32.mxu0 %vm7813_vm0, %v7814_v4 }
 0x378   :  { %7050 = vmatprep.subr.bf16.mxu0 %v7812_v55 }
 0x37b   :  { %7052 = vmatpush3.bf16.msra.mxu0 %v8172_v60 }
 0x37c   :  { %7053 = vmatprep.subr.bf16.mxu0 %v7812_v55 }
 0x37f   :  { %7055 = vmatpush3.bf16.msra.mxu0 %v8189_v6 }
 0x380   :  { %7056 = vmatprep.subr.bf16.mxu0 %v7812_v55 }
 0x383   :  { %7058 = vmatpush3.bf16.msra.mxu0 %v8201_v11 }
 0x384   :  { %7059 = vmatprep.subr.bf16.mxu0 %v7812_v55 }
 0x386   :  { %6033 = vmatmul.mubr.msk.f32.vlgmr.msra.gmra.mrb[22].mxu0 %vm110_vm1, %v4307_v23  ;;  %v4317_v23 = vld [vmem:[%s9778_s3 + $0x2c0] sm:$0xff] }
 0x387   :  { %6067 = vmatprep.mubr.msk.f32.mxu0 %vm7813_vm0, %v7814_v4  ;;  %7061 = vmatpush3.bf16.msra.mxu0 %v7060_v61  ;;  %v7081_v61 = vpack.c.bf16 %v4324_v58, %v4323_v57  ;;  %v4335_v57 = vld [vmem:[%s9778_s3 + $0x320] sm:$0xff]  ;;  %v4336_v58 = vld [vmem:[%s9778_s3 + $0x328] sm:$0xff] }
 0x388   :  { %7062 = vmatprep.subr.bf16.mxu0 %v7812_v55 }
 0x38b   :  { %7064 = vmatpush3.bf16.msra.mxu0 %v7063_v1  ;;  %v4326_v1 = vld [vmem:[%s9777_s0 + $0xf8] sm:$0xff] }
 0x38c   :  { %7065 = vmatprep.subr.bf16.mxu0 %v7812_v55 }
 0x409   :  { %v1329_v24 = vpop.f32.mrb[16].mxu0 }
 0x40a   :  { %v8778_v28 = vadd.f32 %v1329_v24, %v8658_v40  ;;  %v5961_v29 = vpop.f32.mrb[17].mxu0  ;;  %v4305_v40 = vld [vmem:[%s9777_s0 + $0xd8] sm:$0xff]  ;;  %v4318_v24 = vld [vmem:[%s9778_s3 + $0x2c8] sm:$0xff] }
 0x40b   :  { %v7072_v29 = vpack.c.bf16 %v4318_v24, %v4317_v23 }
 0x429   :  { %v4932_v30 = vpop.f32.mrb[18].mxu0 }
 0x42a   :  { %v4933_v31 = vpop.f32.mrb[19].mxu0 }
 0x42b   :  { %v4934_v41 = vadd.f32 %v4933_v31, %v4932_v30  ;;  %v4319_v30 = vld [vmem:[%s9778_s3 + $0x2d0] sm:$0xff]  ;;  %v4320_v31 = vld [vmem:[%s9778_s3 + $0x2d8] sm:$0xff] }
 0x42d   :  { %v1480_v44 = vadd.f32 %v4934_v41, %v1410_v32 }
 0x42f   :  { %v1550_v49 = vadd.f32 %v1549_v9, %v1480_v44  ;;  %v4314_v9 = vld [vmem:[%s9778_s3 + $0x2a8] sm:$0xff]  ;;  %v7075_v44 = vpack.c.bf16 %v4320_v31, %v4319_v30 }
 0x430   :  { %v7066_v10 = vpack.c.bf16 %v4314_v9, %v4313_v2  ;;  %v4325_v2 = vld [vmem:[%s9777_s0 + $0xf0] sm:$0xff] }
 0x431   :  { %v1553_v50 = vmax.f32 %v1550_v49, 0.0  ;;  %v4329_v9 = vld [vmem:[%s9777_s0 + $0x110] sm:$0xff] }
 0x432   :  { %7067 = vmatpush3.bf16.msra.mxu0 %v7066_v10 }
 0x433   :  { %6014 = vmatmul.mubr.f32.vlgmr.msra.gmra.mrb[18].mxu1 %v1553_v50  ;;  %7068 = vmatprep.subr.bf16.mxu0 %v7812_v55  ;;  %v4321_v50 = vld [vmem:[%s9778_s3 + $0x2e0] sm:$0xff] }
 0x434   :  { %7018 = vmatpush3.bf16.msra.mxu1 %v7889_v12  ;;  %1785 = vmatprep.mubr.f32.mxu1 %v4306_v53  ;;  %v4322_v53 = vld [vmem:[%s9778_s3 + $0x2e8] sm:$0xff] }
 0x435   :  { %7020 = vmatprep.subr.bf16.mxu1 %v7916_v21 }
 0x436   :  { %7070 = vmatpush3.bf16.msra.mxu0 %v7069_v22 }
 0x437   :  { %7071 = vmatprep.subr.bf16.mxu0 %v7812_v55 }
 0x438   :  { %7022 = vmatpush3.bf16.msra.mxu1 %v7928_v25 }
 0x439   :  { %7024 = vmatprep.subr.bf16.mxu1 %v7954_v34 }
 0x43a   :  { %7073 = vmatpush3.bf16.msra.mxu0 %v7072_v29 }
 0x43b   :  { %7074 = vmatprep.subr.bf16.mxu0 %v7812_v55 }
 0x43c   :  { %7026 = vmatpush3.bf16.msra.mxu1 %v7967_v38 }
 0x43d   :  { %7028 = vmatprep.subr.bf16.mxu1 %v7981_v43 }
 0x43e   :  { %7076 = vmatpush3.bf16.msra.mxu0 %v7075_v44  ;;  %v4332_v44 = vld [vmem:[%s9778_s3 + $0x308] sm:$0xff] }
 0x43f   :  { %7077 = vmatprep.subr.bf16.mxu0 %v7812_v55 }
 0x440   :  { %7030 = vmatpush3.bf16.msra.mxu1 %v8006_v51 }
 0x441   :  { %7032 = vmatprep.subr.bf16.mxu1 %v8020_v56 }
 0x444   :  { %7034 = vmatpush3.bf16.msra.mxu1 %v8042_v63 }
 0x445   :  { %7036 = vmatprep.subr.bf16.mxu1 %v8056_v5 }
 0x448   :  { %7038 = vmatpush3.bf16.msra.mxu1 %v8084_v19 }
 0x449   :  { %7040 = vmatprep.subr.bf16.mxu1 %v8098_v27  ;;  %v4993_v32 = vpop.f32.mrb[20].mxu0 }
 0x44a   :  { %v4994_v41 = vpop.f32.mrb[21].mxu0 }
 0x44b   :  { %v4995_v49 = vadd.f32 %v4994_v41, %v4993_v32  ;;  %v4328_v41 = vld [vmem:[%s9777_s0 + $0x108] sm:$0xff] }
 0x44c   :  { %7042 = vmatpush3.bf16.msra.mxu1 %v8120_v36 }
 0x44d   :  { %7044 = vmatprep.subr.bf16.mxu1 %v8131_v42  ;;  %v1718_v24 = vadd.f32 %v4995_v49, %v8380_v18  ;;  %v4327_v18 = vld [vmem:[%s9777_s0 + $0x100] sm:$0xff]  ;;  %v4333_v49 = vld [vmem:[%s9778_s3 + $0x310] sm:$0xff] }
 0x450   :  { %7046 = vmatpush3.bf16.msra.mxu1 %v8144_v47 }
 0x451   :  { %7084 = vmatprep.subr.bf16.mxu1 %v7864_v3 }
 0x453   :  { %1786 = vmatmul.mubr.f32.vlgmr.msra.gmra.mrb[20].mxu1 %v4305_v40  ;;  %v7078_v40 = vpack.c.bf16 %v4322_v53, %v4321_v50  ;;  %v4334_v53 = vld [vmem:[%s9778_s3 + $0x318] sm:$0xff] }
 0x454   :  { %7086 = vmatpush3.bf16.msra.mxu1 %v7875_v7  ;;  %2023 = vmatprep.mubr.f32.mxu1 %v4326_v1 }
 0x455   :  { %7088 = vmatprep.subr.bf16.mxu1 %v7902_v16  ;;  %7079 = vmatpush3.bf16.msra.mxu0 %v7078_v40  ;;  %v7163_v40 = vpack.c.bf16 %v4334_v53, %v4333_v49  ;;  %v4348_v53 = vld [vmem:[%s9777_s0 + $0x120] sm:$0xff] }
 0x456   :  { %7080 = vmatprep.subr.bf16.mxu0 %v7812_v55 }
 0x458   :  { %7090 = vmatpush3.bf16.msra.mxu1 %v7904_v17 }
 0x459   :  { %7092 = vmatprep.subr.bf16.mxu1 %v7930_v26  ;;  %v1857_v59 = vpop.f32.mrb[22].mxu0  ;;  %7082 = vmatpush3.bf16.msra.mxu0 %v7081_v61  ;;  %v4337_v61 = vld [vmem:[%s9778_s3 + $0x330] sm:$0xff] }
 0x45a   :  { %v6034_v45 = vpop.f32.mrb[23].mxu0  ;;  %7116 = vmatprep.subr.bf16.mxu0 %v7877_v8 }
 0x45b   :  { %v4338_v45 = vld [vmem:[%s9778_s3 + $0x338] sm:$0xff] }
 0x45c   :  { %7094 = vmatpush3.bf16.msra.mxu1 %v7952_v33  ;;  %v7169_v1 = vpack.c.bf16 %v4338_v45, %v4337_v61 }
 0x45d   :  { %7096 = vmatprep.subr.bf16.mxu1 %v7969_v39 }
 0x460   :  { %7098 = vmatpush3.bf16.msra.mxu1 %v7996_v48 }
 0x461   :  { %7100 = vmatprep.subr.bf16.mxu1 %v8008_v52 }
 0x464   :  { %7102 = vmatpush3.bf16.msra.mxu1 %v8038_v62 }
 0x465   :  { %7104 = vmatprep.subr.bf16.mxu1 %v8044_v0 }
 0x468   :  { %7106 = vmatpush3.bf16.msra.mxu1 %v8074_v14 }
 0x469   :  { %7108 = vmatprep.subr.bf16.mxu1 %v8086_v20 }
 0x46c   :  { %7110 = vmatpush3.bf16.msra.mxu1 %v8116_v35 }
 0x46d   :  { %7112 = vmatprep.subr.bf16.mxu1 %v8122_v37 }
 0x470   :  { %7114 = vmatpush3.bf16.msra.mxu1 %v8140_v46 }
 0x471   :  { %7147 = vmatprep.subr.bf16.mxu1 %v7812_v55 }
 0x473   :  { %2024 = vmatmul.mubr.f32.vlgmr.msra.gmra.mrb[22].mxu1 %v4325_v2  ;;  %v4339_v2 = vld [vmem:[%s9778_s3 + $0x340] sm:$0xff] }
 0x474   :  { %7149 = vmatpush3.bf16.msra.mxu1 %v8157_v54  ;;  %6086 = vmatprep.mubr.msk.f32.mxu1 %vm7813_vm0, %v7814_v4 }
 0x475   :  { %7150 = vmatprep.subr.bf16.mxu1 %v7812_v55 }
 0x478   :  { %7152 = vmatpush3.bf16.msra.mxu1 %v8172_v60 }
 0x479   :  { %7153 = vmatprep.subr.bf16.mxu1 %v7812_v55 }
 0x47c   :  { %7155 = vmatpush3.bf16.msra.mxu1 %v8189_v6 }
 0x47d   :  { %7156 = vmatprep.subr.bf16.mxu1 %v7812_v55 }
 0x480   :  { %7158 = vmatpush3.bf16.msra.mxu1 %v8201_v11 }
 0x481   :  { %7159 = vmatprep.subr.bf16.mxu1 %v7812_v55 }
 0x483   :  { %6087 = vmatmul.mubr.msk.f32.vlgmr.msra.gmra.mrb[24].mxu1 %vm110_vm1, %v4329_v9  ;;  %v4340_v9 = vld [vmem:[%s9778_s3 + $0x348] sm:$0xff] }
 0x484   :  { %6121 = vmatprep.mubr.msk.f32.mxu1 %vm7813_vm0, %v7814_v4 }
 0x506   :  { %v1637_v10 = vpop.f32.mrb[18].mxu1 }
 0x507   :  { %v8898_v13 = vadd.f32 %v1637_v10, %v8778_v28  ;;  %v6015_v15 = vpop.f32.mrb[19].mxu1  ;;  %v4331_v28 = vld [vmem:[%s9778_s3 + $0x300] sm:$0xff]  ;;  %v7172_v10 = vpack.c.bf16 %v4340_v9, %v4339_v2 }
 0x508   :  { %v7160_v50 = vpack.c.bf16 %v4332_v44, %v4331_v28  ;;  %v4341_v15 = vld [vmem:[%s9778_s3 + $0x350] sm:$0xff]  ;;  %v4346_v28 = vld [vmem:[%s9778_s3 + $0x378] sm:$0xff]  ;;  %v9023_v2 = vld [vmem:[%s9779_s2] ss:$0 sm:$0xff] }
 0x50a   :  { %7161 = vmatpush3.bf16.msra.mxu1 %v7160_v50 }
 0x50b   :  { %7162 = vmatprep.subr.bf16.mxu1 %v7812_v55 }
 0x50e   :  { %7164 = vmatpush3.bf16.msra.mxu1 %v7163_v40  ;;  %v4347_v40 = vld [vmem:[%s9777_s0 + $0x118] sm:$0xff] }
 0x50f   :  { %7165 = vmatprep.subr.bf16.mxu1 %v7812_v55 }
 0x526   :  { %v5028_v22 = vpop.f32.mrb[20].mxu1 }
 0x527   :  { %v5029_v23 = vpop.f32.mrb[21].mxu1 }
 0x528   :  { %v5030_v29 = vadd.f32 %v5029_v23, %v5028_v22  ;;  %v4342_v22 = vld [vmem:[%s9778_s3 + $0x358] sm:$0xff] }
 0x52a   :  { %v1788_v30 = vadd.f32 %v5030_v29, %v1718_v24  ;;  %v7175_v29 = vpack.c.bf16 %v4342_v22, %v4341_v15 }
 0x52c   :  { %v1858_v31 = vadd.f32 %v1857_v59, %v1788_v30  ;;  %v7166_v59 = vpack.c.bf16 %v4336_v58, %v4335_v57  ;;  %v4351_v57 = vld [vmem:[%s9777_s0 + $0x138] sm:$0xff] }
 0x52e   :  { %v1861_v32 = vmax.f32 %v1858_v31, 0.0  ;;  %7167 = vmatpush3.bf16.msra.mxu1 %v7166_v59  ;;  %v4343_v31 = vld [vmem:[%s9778_s3 + $0x360] sm:$0xff] }
 0x52f   :  { %7168 = vmatprep.subr.bf16.mxu1 %v7812_v55 }
 0x530   :  { %6068 = vmatmul.mubr.f32.vlgmr.msra.gmra.mrb[24].mxu0 %v1861_v32  ;;  %v4344_v32 = vld [vmem:[%s9778_s3 + $0x368] sm:$0xff] }
 0x531   :  { %7118 = vmatpush3.bf16.msra.mxu0 %v7889_v12  ;;  %2093 = vmatprep.mubr.f32.mxu0 %v4328_v41  ;;  %v7178_v41 = vpack.c.bf16 %v4344_v32, %v4343_v31  ;;  %v4355_v31 = vld [vmem:[%s9778_s3 + $0x390] sm:$0xff] }
 0x532   :  { %7120 = vmatprep.subr.bf16.mxu0 %v7916_v21  ;;  %7170 = vmatpush3.bf16.msra.mxu1 %v7169_v1 }
 0x533   :  { %7171 = vmatprep.subr.bf16.mxu1 %v7812_v55 }
 0x535   :  { %7122 = vmatpush3.bf16.msra.mxu0 %v7928_v25 }
 0x536   :  { %7124 = vmatprep.subr.bf16.mxu0 %v7954_v34  ;;  %7173 = vmatpush3.bf16.msra.mxu1 %v7172_v10 }
 0x537   :  { %7174 = vmatprep.subr.bf16.mxu1 %v7812_v55 }
 0x539   :  { %7126 = vmatpush3.bf16.msra.mxu0 %v7967_v38 }
 0x53a   :  { %7128 = vmatprep.subr.bf16.mxu0 %v7981_v43  ;;  %7176 = vmatpush3.bf16.msra.mxu1 %v7175_v29  ;;  %v4353_v29 = vld [vmem:[%s9778_s3 + $0x380] sm:$0xff] }
 0x53b   :  { %7177 = vmatprep.subr.bf16.mxu1 %v7812_v55 }
 0x53d   :  { %7130 = vmatpush3.bf16.msra.mxu0 %v8006_v51 }
 0x53e   :  { %7132 = vmatprep.subr.bf16.mxu0 %v8020_v56  ;;  %7179 = vmatpush3.bf16.msra.mxu1 %v7178_v41  ;;  %v4356_v41 = vld [vmem:[%s9778_s3 + $0x398] sm:$0xff] }
 0x53f   :  { %7180 = vmatprep.subr.bf16.mxu1 %v7812_v55 }
 0x541   :  { %7134 = vmatpush3.bf16.msra.mxu0 %v8042_v63 }
 0x542   :  { %7136 = vmatprep.subr.bf16.mxu0 %v8056_v5 }
 0x545   :  { %7138 = vmatpush3.bf16.msra.mxu0 %v8084_v19 }
 0x546   :  { %7140 = vmatprep.subr.bf16.mxu0 %v8098_v27  ;;  %v5089_v23 = vpop.f32.mrb[22].mxu1 }
 0x547   :  { %v5090_v24 = vpop.f32.mrb[23].mxu1 }
 0x548   :  { %v5091_v30 = vadd.f32 %v5090_v24, %v5089_v23  ;;  %v4350_v24 = vld [vmem:[%s9777_s0 + $0x130] sm:$0xff] }
 0x549   :  { %7142 = vmatpush3.bf16.msra.mxu0 %v8120_v36 }
 0x54a   :  { %7144 = vmatprep.subr.bf16.mxu0 %v8131_v42  ;;  %v2026_v9 = vadd.f32 %v9023_v2, %v5091_v30  ;;  %v4354_v30 = vld [vmem:[%s9778_s3 + $0x388] sm:$0xff] }
 0x54b   :  { %v7260_v32 = vpack.c.bf16 %v4354_v30, %v4353_v29  ;;  %v4367_v29 = vld [vmem:[%s9778_s3 + $0x3f0] sm:$0xff]  ;;  %v4368_v30 = vld [vmem:[%s9778_s3 + $0x3f8] sm:$0xff] }
 0x54d   :  { %7146 = vmatpush3.bf16.msra.mxu0 %v8144_v47 }
 0x54e   :  { %7184 = vmatprep.subr.bf16.mxu0 %v7864_v3 }
 0x550   :  { %2094 = vmatmul.mubr.f32.vlgmr.msra.gmra.mrb[26].mxu0 %v4327_v18  ;;  %v4345_v18 = vld [vmem:[%s9778_s3 + $0x370] sm:$0xff] }
 0x551   :  { %7186 = vmatpush3.bf16.msra.mxu0 %v7875_v7  ;;  %v7181_v49 = vpack.c.bf16 %v4346_v28, %v4345_v18  ;;  %2331 = vmatprep.mubr.f32.mxu0 %v4348_v53  ;;  %v7263_v18 = vpack.c.bf16 %v4356_v41, %v4355_v31  ;;  %v4357_v28 = vld [vmem:[%s9778_s3 + $0x3a0] sm:$0xff]  ;;  %v4360_v53 = vld [vmem:[%s9778_s3 + $0x3b8] sm:$0xff] }
 0x552   :  { %7188 = vmatprep.subr.bf16.mxu0 %v7902_v16 }
 0x553   :  { %7182 = vmatpush3.bf16.msra.mxu1 %v7181_v49 }
 0x554   :  { %7216 = vmatprep.subr.bf16.mxu1 %v7877_v8 }
 0x555   :  { %7190 = vmatpush3.bf16.msra.mxu0 %v7904_v17 }
 0x556   :  { %7192 = vmatprep.subr.bf16.mxu0 %v7930_v26  ;;  %v2165_v44 = vpop.f32.mrb[24].mxu1 }
 0x557   :  { %v6088_v50 = vpop.f32.mrb[25].mxu1 }
 0x558   :  { %v4359_v50 = vld [vmem:[%s9778_s3 + $0x3b0] sm:$0xff] }
 0x559   :  { %7194 = vmatpush3.bf16.msra.mxu0 %v7952_v33 }
 0x55a   :  { %7196 = vmatprep.subr.bf16.mxu0 %v7969_v39 }
 0x55d   :  { %7198 = vmatpush3.bf16.msra.mxu0 %v7996_v48 }
 0x55e   :  { %7200 = vmatprep.subr.bf16.mxu0 %v8008_v52 }
 0x561   :  { %7202 = vmatpush3.bf16.msra.mxu0 %v8038_v62 }
 0x562   :  { %7204 = vmatprep.subr.bf16.mxu0 %v8044_v0 }
 0x565   :  { %7206 = vmatpush3.bf16.msra.mxu0 %v8074_v14 }
 0x566   :  { %7208 = vmatprep.subr.bf16.mxu0 %v8086_v20 }
 0x569   :  { %7210 = vmatpush3.bf16.msra.mxu0 %v8116_v35 }
 0x56a   :  { %7212 = vmatprep.subr.bf16.mxu0 %v8122_v37 }
 0x56d   :  { %7214 = vmatpush3.bf16.msra.mxu0 %v8140_v46 }
 0x56e   :  { %7247 = vmatprep.subr.bf16.mxu0 %v7812_v55 }
 0x570   :  { %2332 = vmatmul.mubr.f32.vlgmr.msra.gmra.mrb[28].mxu0 %v4347_v40  ;;  %v7269_v40 = vpack.c.bf16 %v4360_v53, %v4359_v50 }
 0x571   :  { %7249 = vmatpush3.bf16.msra.mxu0 %v8157_v54  ;;  %6140 = vmatprep.mubr.msk.f32.mxu0 %vm7813_vm0, %v7814_v4 }
 0x572   :  { %7250 = vmatprep.subr.bf16.mxu0 %v7812_v55 }
 0x575   :  { %7252 = vmatpush3.bf16.msra.mxu0 %v8172_v60 }
 0x576   :  { %7253 = vmatprep.subr.bf16.mxu0 %v7812_v55 }
 0x579   :  { %7255 = vmatpush3.bf16.msra.mxu0 %v8189_v6 }
 0x57a   :  { %7256 = vmatprep.subr.bf16.mxu0 %v7812_v55 }
 0x57d   :  { %7258 = vmatpush3.bf16.msra.mxu0 %v8201_v11 }
 0x57e   :  { %7259 = vmatprep.subr.bf16.mxu0 %v7812_v55 }
 0x580   :  { %6141 = vmatmul.mubr.msk.f32.vlgmr.msra.gmra.mrb[30].mxu0 %vm110_vm1, %v4351_v57  ;;  %v4361_v57 = vld [vmem:[%s9778_s3 + $0x3c0] sm:$0xff] }
 0x581   :  { %6175 = vmatprep.mubr.msk.f32.mxu0 %vm7813_vm0, %v7814_v4  ;;  %7261 = vmatpush3.bf16.msra.mxu0 %v7260_v32  ;;  %v7281_v32 = vpack.c.bf16 %v4368_v30, %v4367_v29  ;;  %v4379_v30 = vld [vmem:[%s9778_s3 + $0x420] sm:$0xff] }
 0x582   :  { %7262 = vmatprep.subr.bf16.mxu0 %v7812_v55 }
 0x585   :  { %7264 = vmatpush3.bf16.msra.mxu0 %v7263_v18  ;;  %v4370_v18 = vld [vmem:[%s9777_s0 + $0x148] sm:$0xff] }
 0x586   :  { %7265 = vmatprep.subr.bf16.mxu0 %v7812_v55 }
 0x603   :  { %v1945_v58 = vpop.f32.mrb[24].mxu0 }
 0x604   :  { %v9018_v59 = vadd.f32 %v1945_v58, %v8898_v13  ;;  %v6069_v61 = vpop.f32.mrb[25].mxu0  ;;  %v4349_v13 = vld [vmem:[%s9777_s0 + $0x128] sm:$0xff] }
 0x605   :  { %v4362_v58 = vld [vmem:[%s9778_s3 + $0x3c8] sm:$0xff] }
 0x606   :  { %v7272_v61 = vpack.c.bf16 %v4362_v58, %v4361_v57 }
 0x623   :  { %v5124_v45 = vpop.f32.mrb[26].mxu0 }
 0x624   :  { %v5125_v1 = vpop.f32.mrb[27].mxu0 }
 0x625   :  { %v5126_v10 = vadd.f32 %v5125_v1, %v5124_v45  ;;  %v4363_v45 = vld [vmem:[%s9778_s3 + $0x3d0] sm:$0xff]  ;;  %v4364_v1 = vld [vmem:[%s9778_s3 + $0x3d8] sm:$0xff] }
 0x627   :  { %v2096_v15 = vadd.f32 %v5126_v10, %v2026_v9 }
 0x629   :  { %v2166_v22 = vadd.f32 %v2165_v44, %v2096_v15  ;;  %v4358_v44 = vld [vmem:[%s9778_s3 + $0x3a8] sm:$0xff]  ;;  %v7275_v15 = vpack.c.bf16 %v4364_v1, %v4363_v45 }
 0x62a   :  { %v7266_v49 = vpack.c.bf16 %v4358_v44, %v4357_v28  ;;  %v4369_v28 = vld [vmem:[%s9777_s0 + $0x140] sm:$0xff] }
 0x62b   :  { %v2169_v23 = vmax.f32 %v2166_v22, 0.0  ;;  %v4373_v44 = vld [vmem:[%s9777_s0 + $0x160] sm:$0xff] }
 0x62c   :  { %7267 = vmatpush3.bf16.msra.mxu0 %v7266_v49 }
 0x62d   :  { %6122 = vmatmul.mubr.f32.vlgmr.msra.gmra.mrb[26].mxu1 %v2169_v23  ;;  %7268 = vmatprep.subr.bf16.mxu0 %v7812_v55  ;;  %v4365_v23 = vld [vmem:[%s9778_s3 + $0x3e0] sm:$0xff] }
 0x62e   :  { %7218 = vmatpush3.bf16.msra.mxu1 %v7889_v12  ;;  %2401 = vmatprep.mubr.f32.mxu1 %v4350_v24  ;;  %v4366_v24 = vld [vmem:[%s9778_s3 + $0x3e8] sm:$0xff] }
 0x62f   :  { %7220 = vmatprep.subr.bf16.mxu1 %v7916_v21 }
 0x630   :  { %7270 = vmatpush3.bf16.msra.mxu0 %v7269_v40 }
 0x631   :  { %7271 = vmatprep.subr.bf16.mxu0 %v7812_v55 }
 0x632   :  { %7222 = vmatpush3.bf16.msra.mxu1 %v7928_v25 }
 0x633   :  { %7224 = vmatprep.subr.bf16.mxu1 %v7954_v34 }
 0x634   :  { %7273 = vmatpush3.bf16.msra.mxu0 %v7272_v61 }
 0x635   :  { %7274 = vmatprep.subr.bf16.mxu0 %v7812_v55 }
 0x636   :  { %7226 = vmatpush3.bf16.msra.mxu1 %v7967_v38 }
 0x637   :  { %7228 = vmatprep.subr.bf16.mxu1 %v7981_v43 }
 0x638   :  { %7276 = vmatpush3.bf16.msra.mxu0 %v7275_v15  ;;  %v4375_v15 = vld [vmem:[%s9778_s3 + $0x400] sm:$0xff] }
 0x639   :  { %7277 = vmatprep.subr.bf16.mxu0 %v7812_v55 }
 0x63a   :  { %7230 = vmatpush3.bf16.msra.mxu1 %v8006_v51 }
 0x63b   :  { %7232 = vmatprep.subr.bf16.mxu1 %v8020_v56 }
 0x63e   :  { %7234 = vmatpush3.bf16.msra.mxu1 %v8042_v63 }
 0x63f   :  { %7236 = vmatprep.subr.bf16.mxu1 %v8056_v5 }
 0x642   :  { %7238 = vmatpush3.bf16.msra.mxu1 %v8084_v19 }
 0x643   :  { %7240 = vmatprep.subr.bf16.mxu1 %v8098_v27  ;;  %v5185_v9 = vpop.f32.mrb[28].mxu0 }
 0x644   :  { %v5186_v10 = vpop.f32.mrb[29].mxu0 }
 0x645   :  { %v5187_v22 = vadd.f32 %v5186_v10, %v5185_v9  ;;  %v4372_v10 = vld [vmem:[%s9777_s0 + $0x158] sm:$0xff] }
 0x646   :  { %7242 = vmatpush3.bf16.msra.mxu1 %v8120_v36 }
 0x647   :  { %7244 = vmatprep.subr.bf16.mxu1 %v8131_v42  ;;  %v2334_v58 = vadd.f32 %v9023_v2, %v5187_v22  ;;  %v4376_v22 = vld [vmem:[%s9778_s3 + $0x408] sm:$0xff] }
 0x64a   :  { %7246 = vmatpush3.bf16.msra.mxu1 %v8144_v47 }
 0x64b   :  { %7284 = vmatprep.subr.bf16.mxu1 %v7864_v3 }
 0x64d   :  { %2402 = vmatmul.mubr.f32.vlgmr.msra.gmra.mrb[28].mxu1 %v4349_v13  ;;  %v7278_v13 = vpack.c.bf16 %v4366_v24, %v4365_v23  ;;  %v4377_v23 = vld [vmem:[%s9778_s3 + $0x410] sm:$0xff]  ;;  %v7360_v24 = vpack.c.bf16 %v4376_v22, %v4375_v15  ;;  %v4390_v22 = vld [vmem:[%s9778_s3 + $0x478] sm:$0xff] }
 0x64e   :  { %7286 = vmatpush3.bf16.msra.mxu1 %v7875_v7  ;;  %2639 = vmatprep.mubr.f32.mxu1 %v4370_v18  ;;  %v4382_v18 = vld [vmem:[%s9778_s3 + $0x438] sm:$0xff]  ;;  %v4389_v15 = vld [vmem:[%s9778_s3 + $0x470] sm:$0xff] }
 0x64f   :  { %7288 = vmatprep.subr.bf16.mxu1 %v7902_v16  ;;  %7279 = vmatpush3.bf16.msra.mxu0 %v7278_v13  ;;  %v4378_v13 = vld [vmem:[%s9778_s3 + $0x418] sm:$0xff] }
 0x650   :  { %7280 = vmatprep.subr.bf16.mxu0 %v7812_v55  ;;  %v7363_v29 = vpack.c.bf16 %v4378_v13, %v4377_v23 }
 0x652   :  { %7290 = vmatpush3.bf16.msra.mxu1 %v7904_v17 }
 0x653   :  { %7292 = vmatprep.subr.bf16.mxu1 %v7930_v26  ;;  %v2473_v31 = vpop.f32.mrb[30].mxu0  ;;  %7282 = vmatpush3.bf16.msra.mxu0 %v7281_v32 }
 0x654   :  { %v6142_v41 = vpop.f32.mrb[31].mxu0  ;;  %7316 = vmatprep.subr.bf16.mxu0 %v7877_v8 }
 0x655   :  { %v4381_v41 = vld [vmem:[%s9778_s3 + $0x430] sm:$0xff] }
 0x656   :  { %7294 = vmatpush3.bf16.msra.mxu1 %v7952_v33 }
 0x657   :  { %7296 = vmatprep.subr.bf16.mxu1 %v7969_v39 }
 0x65a   :  { %7298 = vmatpush3.bf16.msra.mxu1 %v7996_v48 }
 0x65b   :  { %7300 = vmatprep.subr.bf16.mxu1 %v8008_v52 }
 0x65e   :  { %7302 = vmatpush3.bf16.msra.mxu1 %v8038_v62 }
 0x65f   :  { %7304 = vmatprep.subr.bf16.mxu1 %v8044_v0 }
 0x662   :  { %7306 = vmatpush3.bf16.msra.mxu1 %v8074_v14 }
 0x663   :  { %7308 = vmatprep.subr.bf16.mxu1 %v8086_v20 }
 0x666   :  { %7310 = vmatpush3.bf16.msra.mxu1 %v8116_v35 }
 0x667   :  { %7312 = vmatprep.subr.bf16.mxu1 %v8122_v37 }
 0x66a   :  { %7314 = vmatpush3.bf16.msra.mxu1 %v8140_v46 }
 0x66b   :  { %7347 = vmatprep.subr.bf16.mxu1 %v7812_v55 }
 0x66d   :  { %2640 = vmatmul.mubr.f32.vlgmr.msra.gmra.mrb[30].mxu1 %v4369_v28  ;;  %v7369_v28 = vpack.c.bf16 %v4382_v18, %v4381_v41 }
 0x66e   :  { %7349 = vmatpush3.bf16.msra.mxu1 %v8157_v54  ;;  %6194 = vmatprep.mubr.msk.f32.mxu1 %vm7813_vm0, %v7814_v4 }
 0x66f   :  { %7350 = vmatprep.subr.bf16.mxu1 %v7812_v55 }
 0x672   :  { %7352 = vmatpush3.bf16.msra.mxu1 %v8172_v60 }
 0x673   :  { %7353 = vmatprep.subr.bf16.mxu1 %v7812_v55 }
 0x676   :  { %7355 = vmatpush3.bf16.msra.mxu1 %v8189_v6 }
 0x677   :  { %7356 = vmatprep.subr.bf16.mxu1 %v7812_v55 }
 0x67a   :  { %7358 = vmatpush3.bf16.msra.mxu1 %v8201_v11 }
 0x67b   :  { %7359 = vmatprep.subr.bf16.mxu1 %v7812_v55 }
 0x67d   :  { %6195 = vmatmul.mubr.msk.f32.vlgmr.msra.gmra.mrb[32].mxu1 %vm110_vm1, %v4373_v44  ;;  %v4383_v44 = vld [vmem:[%s9778_s3 + $0x440] sm:$0xff] }
 0x67e   :  { %6229 = vmatprep.mubr.msk.f32.mxu1 %vm7813_vm0, %v7814_v4  ;;  %7361 = vmatpush3.bf16.msra.mxu1 %v7360_v24  ;;  %v7381_v24 = vpack.c.bf16 %v4390_v22, %v4389_v15  ;;  %v4401_v22 = vld [vmem:[%s9778_s3 + $0x4a0] sm:$0xff] }
 0x67f   :  { %7362 = vmatprep.subr.bf16.mxu1 %v7812_v55 }
 0x682   :  { %7364 = vmatpush3.bf16.msra.mxu1 %v7363_v29  ;;  %v4392_v29 = vld [vmem:[%s9777_s0 + $0x170] sm:$0xff] }
 0x683   :  { %7365 = vmatprep.subr.bf16.mxu1 %v7812_v55 }
 0x700   :  { %v2253_v49 = vpop.f32.mrb[26].mxu1 }
 0x701   :  { %v9143_v50 = vadd.f32 %v2253_v49, %v9018_v59  ;;  %v6123_v53 = vpop.f32.mrb[27].mxu1  ;;  %v4371_v59 = vld [vmem:[%s9777_s0 + $0x150] sm:$0xff]  ;;  %v4384_v49 = vld [vmem:[%s9778_s3 + $0x448] sm:$0xff] }
 0x702   :  { %v7372_v53 = vpack.c.bf16 %v4384_v49, %v4383_v44 }
 0x720   :  { %v5220_v40 = vpop.f32.mrb[28].mxu1 }
 0x721   :  { %v5221_v57 = vpop.f32.mrb[29].mxu1 }
 0x722   :  { %v5222_v61 = vadd.f32 %v5221_v57, %v5220_v40  ;;  %v4385_v40 = vld [vmem:[%s9778_s3 + $0x450] sm:$0xff]  ;;  %v4386_v57 = vld [vmem:[%s9778_s3 + $0x458] sm:$0xff] }
 0x724   :  { %v2404_v45 = vadd.f32 %v5222_v61, %v2334_v58 }
 0x726   :  { %v2474_v1 = vadd.f32 %v2473_v31, %v2404_v45  ;;  %v4380_v31 = vld [vmem:[%s9778_s3 + $0x428] sm:$0xff]  ;;  %v7375_v45 = vpack.c.bf16 %v4386_v57, %v4385_v40 }
 0x727   :  { %v7366_v32 = vpack.c.bf16 %v4380_v31, %v4379_v30  ;;  %v4391_v30 = vld [vmem:[%s9777_s0 + $0x168] sm:$0xff] }
 0x728   :  { %v2477_v9 = vmax.f32 %v2474_v1, 0.0  ;;  %v4395_v31 = vld [vmem:[%s9777_s0 + $0x188] sm:$0xff] }
 0x729   :  { %7367 = vmatpush3.bf16.msra.mxu1 %v7366_v32 }
 0x72a   :  { %6176 = vmatmul.mubr.f32.vlgmr.msra.gmra.mrb[32].mxu0 %v2477_v9  ;;  %7368 = vmatprep.subr.bf16.mxu1 %v7812_v55  ;;  %v4387_v9 = vld [vmem:[%s9778_s3 + $0x460] sm:$0xff] }
 0x72b   :  { %7318 = vmatpush3.bf16.msra.mxu0 %v7889_v12  ;;  %2709 = vmatprep.mubr.f32.mxu0 %v4372_v10  ;;  %v4388_v10 = vld [vmem:[%s9778_s3 + $0x468] sm:$0xff] }
 0x72c   :  { %7320 = vmatprep.subr.bf16.mxu0 %v7916_v21 }
 0x72d   :  { %7370 = vmatpush3.bf16.msra.mxu1 %v7369_v28 }
 0x72e   :  { %7371 = vmatprep.subr.bf16.mxu1 %v7812_v55 }
 0x72f   :  { %7322 = vmatpush3.bf16.msra.mxu0 %v7928_v25 }
 0x730   :  { %7324 = vmatprep.subr.bf16.mxu0 %v7954_v34 }
 0x731   :  { %7373 = vmatpush3.bf16.msra.mxu1 %v7372_v53 }
 0x732   :  { %7374 = vmatprep.subr.bf16.mxu1 %v7812_v55 }
 0x733   :  { %7326 = vmatpush3.bf16.msra.mxu0 %v7967_v38 }
 0x734   :  { %7328 = vmatprep.subr.bf16.mxu0 %v7981_v43 }
 0x735   :  { %7376 = vmatpush3.bf16.msra.mxu1 %v7375_v45  ;;  %v4397_v45 = vld [vmem:[%s9778_s3 + $0x480] sm:$0xff] }
 0x736   :  { %7377 = vmatprep.subr.bf16.mxu1 %v7812_v55 }
 0x737   :  { %7330 = vmatpush3.bf16.msra.mxu0 %v8006_v51 }
 0x738   :  { %7332 = vmatprep.subr.bf16.mxu0 %v8020_v56 }
 0x73b   :  { %7334 = vmatpush3.bf16.msra.mxu0 %v8042_v63 }
 0x73c   :  { %7336 = vmatprep.subr.bf16.mxu0 %v8056_v5 }
 0x73f   :  { %7338 = vmatpush3.bf16.msra.mxu0 %v8084_v19 }
 0x740   :  { %7340 = vmatprep.subr.bf16.mxu0 %v8098_v27  ;;  %v5281_v58 = vpop.f32.mrb[30].mxu1 }
 0x741   :  { %v5282_v61 = vpop.f32.mrb[31].mxu1 }
 0x742   :  { %v5283_v1 = vadd.f32 %v5282_v61, %v5281_v58  ;;  %v4394_v61 = vld [vmem:[%s9777_s0 + $0x180] sm:$0xff] }
 0x743   :  { %7342 = vmatpush3.bf16.msra.mxu0 %v8120_v36 }
 0x744   :  { %7344 = vmatprep.subr.bf16.mxu0 %v8131_v42  ;;  %v2642_v49 = vadd.f32 %v9023_v2, %v5283_v1  ;;  %v4398_v1 = vld [vmem:[%s9778_s3 + $0x488] sm:$0xff] }
 0x747   :  { %7346 = vmatpush3.bf16.msra.mxu0 %v8144_v47 }
 0x748   :  { %7384 = vmatprep.subr.bf16.mxu0 %v7864_v3 }
 0x74a   :  { %2710 = vmatmul.mubr.f32.vlgmr.msra.gmra.mrb[34].mxu0 %v4371_v59  ;;  %v7378_v59 = vpack.c.bf16 %v4388_v10, %v4387_v9  ;;  %v4399_v9 = vld [vmem:[%s9778_s3 + $0x490] sm:$0xff]  ;;  %v7460_v10 = vpack.c.bf16 %v4398_v1, %v4397_v45  ;;  %v4412_v1 = vld [vmem:[%s9778_s3 + $0x4f8] sm:$0xff] }
 0x74b   :  { %7386 = vmatpush3.bf16.msra.mxu0 %v7875_v7  ;;  %2947 = vmatprep.mubr.f32.mxu0 %v4392_v29  ;;  %v4404_v29 = vld [vmem:[%s9778_s3 + $0x4b8] sm:$0xff]  ;;  %v4411_v45 = vld [vmem:[%s9778_s3 + $0x4f0] sm:$0xff] }
 0x74c   :  { %7388 = vmatprep.subr.bf16.mxu0 %v7902_v16  ;;  %7379 = vmatpush3.bf16.msra.mxu1 %v7378_v59  ;;  %v4400_v59 = vld [vmem:[%s9778_s3 + $0x498] sm:$0xff] }
 0x74d   :  { %7380 = vmatprep.subr.bf16.mxu1 %v7812_v55  ;;  %v7463_v15 = vpack.c.bf16 %v4400_v59, %v4399_v9 }
 0x74f   :  { %7390 = vmatpush3.bf16.msra.mxu0 %v7904_v17 }
 0x750   :  { %7392 = vmatprep.subr.bf16.mxu0 %v7930_v26  ;;  %v2781_v23 = vpop.f32.mrb[32].mxu1  ;;  %7382 = vmatpush3.bf16.msra.mxu1 %v7381_v24 }
 0x751   :  { %v6196_v13 = vpop.f32.mrb[33].mxu1  ;;  %7416 = vmatprep.subr.bf16.mxu1 %v7877_v8 }
 0x752   :  { %v4403_v13 = vld [vmem:[%s9778_s3 + $0x4b0] sm:$0xff] }
 0x753   :  { %7394 = vmatpush3.bf16.msra.mxu0 %v7952_v33 }
 0x754   :  { %7396 = vmatprep.subr.bf16.mxu0 %v7969_v39 }
 0x757   :  { %7398 = vmatpush3.bf16.msra.mxu0 %v7996_v48 }
 0x758   :  { %7400 = vmatprep.subr.bf16.mxu0 %v8008_v52 }
 0x75b   :  { %7402 = vmatpush3.bf16.msra.mxu0 %v8038_v62 }
 0x75c   :  { %7404 = vmatprep.subr.bf16.mxu0 %v8044_v0 }
 0x75f   :  { %7406 = vmatpush3.bf16.msra.mxu0 %v8074_v14 }
 0x760   :  { %7408 = vmatprep.subr.bf16.mxu0 %v8086_v20 }
 0x763   :  { %7410 = vmatpush3.bf16.msra.mxu0 %v8116_v35 }
 0x764   :  { %7412 = vmatprep.subr.bf16.mxu0 %v8122_v37 }
 0x767   :  { %7414 = vmatpush3.bf16.msra.mxu0 %v8140_v46 }
 0x768   :  { %7447 = vmatprep.subr.bf16.mxu0 %v7812_v55 }
 0x76a   :  { %2948 = vmatmul.mubr.f32.vlgmr.msra.gmra.mrb[36].mxu0 %v4391_v30  ;;  %v7469_v30 = vpack.c.bf16 %v4404_v29, %v4403_v13 }
 0x76b   :  { %7449 = vmatpush3.bf16.msra.mxu0 %v8157_v54  ;;  %6248 = vmatprep.mubr.msk.f32.mxu0 %vm7813_vm0, %v7814_v4 }
 0x76c   :  { %7450 = vmatprep.subr.bf16.mxu0 %v7812_v55 }
 0x76f   :  { %7452 = vmatpush3.bf16.msra.mxu0 %v8172_v60 }
 0x770   :  { %7453 = vmatprep.subr.bf16.mxu0 %v7812_v55 }
 0x773   :  { %7455 = vmatpush3.bf16.msra.mxu0 %v8189_v6 }
 0x774   :  { %7456 = vmatprep.subr.bf16.mxu0 %v7812_v55 }
 0x777   :  { %7458 = vmatpush3.bf16.msra.mxu0 %v8201_v11 }
 0x778   :  { %7459 = vmatprep.subr.bf16.mxu0 %v7812_v55 }
 0x77a   :  { %6249 = vmatmul.mubr.msk.f32.vlgmr.msra.gmra.mrb[38].mxu0 %vm110_vm1, %v4395_v31  ;;  %v4405_v31 = vld [vmem:[%s9778_s3 + $0x4c0] sm:$0xff] }
 0x77b   :  { %6283 = vmatprep.mubr.msk.f32.mxu0 %vm7813_vm0, %v7814_v4  ;;  %7461 = vmatpush3.bf16.msra.mxu0 %v7460_v10  ;;  %v7481_v10 = vpack.c.bf16 %v4412_v1, %v4411_v45  ;;  %v4423_v1 = vld [vmem:[%s9778_s3 + $0x520] sm:$0xff] }
 0x77c   :  { %7462 = vmatprep.subr.bf16.mxu0 %v7812_v55 }
 0x77f   :  { %7464 = vmatpush3.bf16.msra.mxu0 %v7463_v15  ;;  %v4414_v15 = vld [vmem:[%s9777_s0 + $0x198] sm:$0xff] }
 0x780   :  { %7465 = vmatprep.subr.bf16.mxu0 %v7812_v55 }
 0x7fd   :  { %v2561_v32 = vpop.f32.mrb[32].mxu0 }
 0x7fe   :  { %v9263_v41 = vadd.f32 %v2561_v32, %v9143_v50  ;;  %v6177_v18 = vpop.f32.mrb[33].mxu0  ;;  %v4393_v50 = vld [vmem:[%s9777_s0 + $0x178] sm:$0xff]  ;;  %v4406_v32 = vld [vmem:[%s9778_s3 + $0x4c8] sm:$0xff] }
 0x7ff   :  { %v7472_v18 = vpack.c.bf16 %v4406_v32, %v4405_v31 }
 0x81d   :  { %v5316_v28 = vpop.f32.mrb[34].mxu0 }
 0x81e   :  { %v5317_v44 = vpop.f32.mrb[35].mxu0 }
 0x81f   :  { %v5318_v53 = vadd.f32 %v5317_v44, %v5316_v28  ;;  %v4407_v28 = vld [vmem:[%s9778_s3 + $0x4d0] sm:$0xff]  ;;  %v4408_v44 = vld [vmem:[%s9778_s3 + $0x4d8] sm:$0xff] }
 0x821   :  { %v2712_v40 = vadd.f32 %v5318_v53, %v2642_v49 }
 0x823   :  { %v2782_v57 = vadd.f32 %v2781_v23, %v2712_v40  ;;  %v4402_v23 = vld [vmem:[%s9778_s3 + $0x4a8] sm:$0xff]  ;;  %v7475_v40 = vpack.c.bf16 %v4408_v44, %v4407_v28 }
 0x824   :  { %v7466_v24 = vpack.c.bf16 %v4402_v23, %v4401_v22  ;;  %v4413_v22 = vld [vmem:[%s9777_s0 + $0x190] sm:$0xff] }
 0x825   :  { %v2785_v58 = vmax.f32 %v2782_v57, 0.0  ;;  %v4417_v23 = vld [vmem:[%s9777_s0 + $0x1b0] sm:$0xff] }
 0x826   :  { %7467 = vmatpush3.bf16.msra.mxu0 %v7466_v24 }
 0x827   :  { %6230 = vmatmul.mubr.f32.vlgmr.msra.gmra.mrb[34].mxu1 %v2785_v58  ;;  %7468 = vmatprep.subr.bf16.mxu0 %v7812_v55  ;;  %v4409_v58 = vld [vmem:[%s9778_s3 + $0x4e0] sm:$0xff] }
 0x828   :  { %7418 = vmatpush3.bf16.msra.mxu1 %v7889_v12  ;;  %3017 = vmatprep.mubr.f32.mxu1 %v4394_v61  ;;  %v4410_v61 = vld [vmem:[%s9778_s3 + $0x4e8] sm:$0xff] }
 0x829   :  { %7420 = vmatprep.subr.bf16.mxu1 %v7916_v21 }
 0x82a   :  { %7470 = vmatpush3.bf16.msra.mxu0 %v7469_v30 }
 0x82b   :  { %7471 = vmatprep.subr.bf16.mxu0 %v7812_v55 }
 0x82c   :  { %7422 = vmatpush3.bf16.msra.mxu1 %v7928_v25 }
 0x82d   :  { %7424 = vmatprep.subr.bf16.mxu1 %v7954_v34 }
 0x82e   :  { %7473 = vmatpush3.bf16.msra.mxu0 %v7472_v18 }
 0x82f   :  { %7474 = vmatprep.subr.bf16.mxu0 %v7812_v55 }
 0x830   :  { %7426 = vmatpush3.bf16.msra.mxu1 %v7967_v38 }
 0x831   :  { %7428 = vmatprep.subr.bf16.mxu1 %v7981_v43 }
 0x832   :  { %7476 = vmatpush3.bf16.msra.mxu0 %v7475_v40  ;;  %v4419_v40 = vld [vmem:[%s9778_s3 + $0x500] sm:$0xff] }
 0x833   :  { %7477 = vmatprep.subr.bf16.mxu0 %v7812_v55 }
 0x834   :  { %7430 = vmatpush3.bf16.msra.mxu1 %v8006_v51 }
 0x835   :  { %7432 = vmatprep.subr.bf16.mxu1 %v8020_v56 }
 0x838   :  { %7434 = vmatpush3.bf16.msra.mxu1 %v8042_v63 }
 0x839   :  { %7436 = vmatprep.subr.bf16.mxu1 %v8056_v5 }
 0x83c   :  { %7438 = vmatpush3.bf16.msra.mxu1 %v8084_v19 }
 0x83d   :  { %7440 = vmatprep.subr.bf16.mxu1 %v8098_v27  ;;  %v5377_v49 = vpop.f32.mrb[36].mxu0 }
 0x83e   :  { %v5378_v53 = vpop.f32.mrb[37].mxu0 }
 0x83f   :  { %v5379_v57 = vadd.f32 %v5378_v53, %v5377_v49  ;;  %v4416_v53 = vld [vmem:[%s9777_s0 + $0x1a8] sm:$0xff] }
 0x840   :  { %7442 = vmatpush3.bf16.msra.mxu1 %v8120_v36 }
 0x841   :  { %7444 = vmatprep.subr.bf16.mxu1 %v8131_v42  ;;  %v2950_v32 = vadd.f32 %v9023_v2, %v5379_v57  ;;  %v4420_v57 = vld [vmem:[%s9778_s3 + $0x508] sm:$0xff] }
 0x844   :  { %7446 = vmatpush3.bf16.msra.mxu1 %v8144_v47 }
 0x845   :  { %7484 = vmatprep.subr.bf16.mxu1 %v7864_v3 }
 0x847   :  { %3018 = vmatmul.mubr.f32.vlgmr.msra.gmra.mrb[36].mxu1 %v4393_v50  ;;  %v7478_v50 = vpack.c.bf16 %v4410_v61, %v4409_v58  ;;  %v4421_v58 = vld [vmem:[%s9778_s3 + $0x510] sm:$0xff]  ;;  %v7560_v61 = vpack.c.bf16 %v4420_v57, %v4419_v40  ;;  %v4434_v57 = vld [vmem:[%s9778_s3 + $0x578] sm:$0xff] }
 0x848   :  { %7486 = vmatpush3.bf16.msra.mxu1 %v7875_v7  ;;  %3255 = vmatprep.mubr.f32.mxu1 %v4414_v15  ;;  %v4426_v15 = vld [vmem:[%s9778_s3 + $0x538] sm:$0xff]  ;;  %v4433_v40 = vld [vmem:[%s9778_s3 + $0x570] sm:$0xff] }
 0x849   :  { %7488 = vmatprep.subr.bf16.mxu1 %v7902_v16  ;;  %7479 = vmatpush3.bf16.msra.mxu0 %v7478_v50  ;;  %v4422_v50 = vld [vmem:[%s9778_s3 + $0x518] sm:$0xff] }
 0x84a   :  { %7480 = vmatprep.subr.bf16.mxu0 %v7812_v55  ;;  %v7563_v45 = vpack.c.bf16 %v4422_v50, %v4421_v58 }
 0x84c   :  { %7490 = vmatpush3.bf16.msra.mxu1 %v7904_v17 }
 0x84d   :  { %7492 = vmatprep.subr.bf16.mxu1 %v7930_v26  ;;  %v3089_v9 = vpop.f32.mrb[38].mxu0  ;;  %7482 = vmatpush3.bf16.msra.mxu0 %v7481_v10 }
 0x84e   :  { %v6250_v59 = vpop.f32.mrb[39].mxu0  ;;  %7516 = vmatprep.subr.bf16.mxu0 %v7877_v8 }
 0x84f   :  { %v4425_v59 = vld [vmem:[%s9778_s3 + $0x530] sm:$0xff] }
 0x850   :  { %7494 = vmatpush3.bf16.msra.mxu1 %v7952_v33 }
 0x851   :  { %7496 = vmatprep.subr.bf16.mxu1 %v7969_v39 }
 0x854   :  { %7498 = vmatpush3.bf16.msra.mxu1 %v7996_v48 }
 0x855   :  { %7500 = vmatprep.subr.bf16.mxu1 %v8008_v52 }
 0x858   :  { %7502 = vmatpush3.bf16.msra.mxu1 %v8038_v62 }
 0x859   :  { %7504 = vmatprep.subr.bf16.mxu1 %v8044_v0 }
 0x85c   :  { %7506 = vmatpush3.bf16.msra.mxu1 %v8074_v14 }
 0x85d   :  { %7508 = vmatprep.subr.bf16.mxu1 %v8086_v20 }
 0x860   :  { %7510 = vmatpush3.bf16.msra.mxu1 %v8116_v35 }
 0x861   :  { %7512 = vmatprep.subr.bf16.mxu1 %v8122_v37 }
 0x864   :  { %7514 = vmatpush3.bf16.msra.mxu1 %v8140_v46 }
 0x865   :  { %7547 = vmatprep.subr.bf16.mxu1 %v7812_v55 }
 0x867   :  { %3256 = vmatmul.mubr.f32.vlgmr.msra.gmra.mrb[38].mxu1 %v4413_v22  ;;  %v7569_v22 = vpack.c.bf16 %v4426_v15, %v4425_v59 }
 0x868   :  { %7549 = vmatpush3.bf16.msra.mxu1 %v8157_v54  ;;  %6302 = vmatprep.mubr.msk.f32.mxu1 %vm7813_vm0, %v7814_v4 }
 0x869   :  { %7550 = vmatprep.subr.bf16.mxu1 %v7812_v55 }
 0x86c   :  { %7552 = vmatpush3.bf16.msra.mxu1 %v8172_v60 }
 0x86d   :  { %7553 = vmatprep.subr.bf16.mxu1 %v7812_v55 }
 0x870   :  { %7555 = vmatpush3.bf16.msra.mxu1 %v8189_v6 }
 0x871   :  { %7556 = vmatprep.subr.bf16.mxu1 %v7812_v55 }
 0x874   :  { %7558 = vmatpush3.bf16.msra.mxu1 %v8201_v11 }
 0x875   :  { %7559 = vmatprep.subr.bf16.mxu1 %v7812_v55 }
 0x877   :  { %6303 = vmatmul.mubr.msk.f32.vlgmr.msra.gmra.mrb[40].mxu1 %vm110_vm1, %v4417_v23  ;;  %v4427_v23 = vld [vmem:[%s9778_s3 + $0x540] sm:$0xff] }
 0x878   :  { %6337 = vmatprep.mubr.msk.f32.mxu1 %vm7813_vm0, %v7814_v4  ;;  %7561 = vmatpush3.bf16.msra.mxu1 %v7560_v61  ;;  %v7581_v61 = vpack.c.bf16 %v4434_v57, %v4433_v40  ;;  %v4454_v40 = vld [vmem:[%s9778_s3 + $0x5e8] sm:$0xff] }
 0x879   :  { %7562 = vmatprep.subr.bf16.mxu1 %v7812_v55 }
 0x87c   :  { %7564 = vmatpush3.bf16.msra.mxu1 %v7563_v45  ;;  %v4436_v45 = vld [vmem:[%s9777_s0 + $0x1c0] sm:$0xff] }
 0x87d   :  { %7565 = vmatprep.subr.bf16.mxu1 %v7812_v55 }
 0x8fa   :  { %v2869_v24 = vpop.f32.mrb[34].mxu1 }
 0x8fb   :  { %v9383_v13 = vadd.f32 %v2869_v24, %v9263_v41  ;;  %v6231_v29 = vpop.f32.mrb[35].mxu1  ;;  %v4415_v41 = vld [vmem:[%s9777_s0 + $0x1a0] sm:$0xff]  ;;  %v4428_v24 = vld [vmem:[%s9778_s3 + $0x548] sm:$0xff] }
 0x8fc   :  { %v7572_v29 = vpack.c.bf16 %v4428_v24, %v4427_v23 }
 0x91a   :  { %v5412_v30 = vpop.f32.mrb[36].mxu1 }
 0x91b   :  { %v5413_v31 = vpop.f32.mrb[37].mxu1 }
 0x91c   :  { %v5414_v18 = vadd.f32 %v5413_v31, %v5412_v30  ;;  %v4429_v30 = vld [vmem:[%s9778_s3 + $0x550] sm:$0xff]  ;;  %v4430_v31 = vld [vmem:[%s9778_s3 + $0x558] sm:$0xff] }
 0x91e   :  { %v3020_v28 = vadd.f32 %v5414_v18, %v2950_v32 }
 0x920   :  { %v3090_v44 = vadd.f32 %v3089_v9, %v3020_v28  ;;  %v4424_v9 = vld [vmem:[%s9778_s3 + $0x528] sm:$0xff]  ;;  %v7575_v28 = vpack.c.bf16 %v4430_v31, %v4429_v30 }
 0x921   :  { %v7566_v10 = vpack.c.bf16 %v4424_v9, %v4423_v1  ;;  %v4435_v1 = vld [vmem:[%s9777_s0 + $0x1b8] sm:$0xff] }
 0x922   :  { %v3093_v49 = vmax.f32 %v3090_v44, 0.0  ;;  %v4439_v9 = vld [vmem:[%s9777_s0 + $0x1d8] sm:$0xff] }
 0x923   :  { %7567 = vmatpush3.bf16.msra.mxu1 %v7566_v10 }
 0x924   :  { %6284 = vmatmul.mubr.f32.vlgmr.msra.gmra.mrb[40].mxu0 %v3093_v49  ;;  %7568 = vmatprep.subr.bf16.mxu1 %v7812_v55  ;;  %v4431_v49 = vld [vmem:[%s9778_s3 + $0x560] sm:$0xff] }
 0x925   :  { %7518 = vmatpush3.bf16.msra.mxu0 %v7889_v12  ;;  %3325 = vmatprep.mubr.f32.mxu0 %v4416_v53  ;;  %v4432_v53 = vld [vmem:[%s9778_s3 + $0x568] sm:$0xff] }
 0x926   :  { %7520 = vmatprep.subr.bf16.mxu0 %v7916_v21 }
 0x927   :  { %7570 = vmatpush3.bf16.msra.mxu1 %v7569_v22 }
 0x928   :  { %7571 = vmatprep.subr.bf16.mxu1 %v7812_v55 }
 0x929   :  { %7522 = vmatpush3.bf16.msra.mxu0 %v7928_v25 }
 0x92a   :  { %7524 = vmatprep.subr.bf16.mxu0 %v7954_v34 }
 0x92b   :  { %7573 = vmatpush3.bf16.msra.mxu1 %v7572_v29 }
 0x92c   :  { %7574 = vmatprep.subr.bf16.mxu1 %v7812_v55 }
 0x92d   :  { %7526 = vmatpush3.bf16.msra.mxu0 %v7967_v38 }
 0x92e   :  { %7528 = vmatprep.subr.bf16.mxu0 %v7981_v43 }
 0x92f   :  { %7576 = vmatpush3.bf16.msra.mxu1 %v7575_v28 }
 0x930   :  { %7577 = vmatprep.subr.bf16.mxu1 %v7812_v55 }
 0x931   :  { %7530 = vmatpush3.bf16.msra.mxu0 %v8006_v51 }
 0x932   :  { %7532 = vmatprep.subr.bf16.mxu0 %v8020_v56 }
 0x935   :  { %7534 = vmatpush3.bf16.msra.mxu0 %v8042_v63 }
 0x936   :  { %7536 = vmatprep.subr.bf16.mxu0 %v8056_v5 }
 0x939   :  { %7538 = vmatpush3.bf16.msra.mxu0 %v8084_v19 }
 0x93a   :  { %7540 = vmatprep.subr.bf16.mxu0 %v8098_v27  ;;  %v5473_v32 = vpop.f32.mrb[38].mxu1 }
 0x93b   :  { %v5474_v18 = vpop.f32.mrb[39].mxu1 }
 0x93c   :  { %v5475_v44 = vadd.f32 %v5474_v18, %v5473_v32  ;;  %v4438_v18 = vld [vmem:[%s9777_s0 + $0x1d0] sm:$0xff] }
 0x93d   :  { %7542 = vmatpush3.bf16.msra.mxu0 %v8120_v36 }
 0x93e   :  { %7544 = vmatprep.subr.bf16.mxu0 %v8131_v42  ;;  %v3258_v24 = vadd.f32 %v9023_v2, %v5475_v44  ;;  %v4437_v2 = vld [vmem:[%s9777_s0 + $0x1c8] sm:$0xff] }
 0x941   :  { %7546 = vmatpush3.bf16.msra.mxu0 %v8144_v47 }
 0x942   :  { %7584 = vmatprep.subr.bf16.mxu0 %v7864_v3 }
 0x944   :  { %3326 = vmatmul.mubr.f32.vlgmr.msra.gmra.mrb[42].mxu0 %v4415_v41  ;;  %v7578_v41 = vpack.c.bf16 %v4432_v53, %v4431_v49 }
 0x945   :  { %7586 = vmatpush3.bf16.msra.mxu0 %v7875_v7  ;;  %3563 = vmatprep.mubr.f32.mxu0 %v4436_v45 }
 0x946   :  { %7588 = vmatprep.subr.bf16.mxu0 %v7902_v16  ;;  %7579 = vmatpush3.bf16.msra.mxu1 %v7578_v41  ;;  %v4453_v41 = vld [vmem:[%s9778_s3 + $0x5e0] sm:$0xff] }
 0x947   :  { %7580 = vmatprep.subr.bf16.mxu1 %v7812_v55  ;;  %v7678_v57 = vpack.c.bf16 %v4454_v40, %v4453_v41  ;;  %v4122_v41 = vld [vmem:[%s9780_s5 + $0x38] sm:$0xff] }
 0x949   :  { %7590 = vmatpush3.bf16.msra.mxu0 %v7904_v17 }
 0x94a   :  { %7592 = vmatprep.subr.bf16.mxu0 %v7930_v26  ;;  %v3397_v58 = vpop.f32.mrb[40].mxu1  ;;  %7582 = vmatpush3.bf16.msra.mxu1 %v7581_v61  ;;  %v4456_v61 = vld [vmem:[%s9778_s3 + $0x5f8] sm:$0xff] }
 0x94b   :  { %v6304_v50 = vpop.f32.mrb[41].mxu1  ;;  %7616 = vmatprep.subr.bf16.mxu1 %v7877_v8 }
 0x94d   :  { %7594 = vmatpush3.bf16.msra.mxu0 %v7952_v33 }
 0x94e   :  { %7596 = vmatprep.subr.bf16.mxu0 %v7969_v39 }
 0x951   :  { %7598 = vmatpush3.bf16.msra.mxu0 %v7996_v48 }
 0x952   :  { %7600 = vmatprep.subr.bf16.mxu0 %v8008_v52 }
 0x955   :  { %7602 = vmatpush3.bf16.msra.mxu0 %v8038_v62 }
 0x956   :  { %7604 = vmatprep.subr.bf16.mxu0 %v8044_v0 }
 0x959   :  { %7606 = vmatpush3.bf16.msra.mxu0 %v8074_v14 }
 0x95a   :  { %7608 = vmatprep.subr.bf16.mxu0 %v8086_v20 }
 0x95d   :  { %7610 = vmatpush3.bf16.msra.mxu0 %v8116_v35 }
 0x95e   :  { %7612 = vmatprep.subr.bf16.mxu0 %v8122_v37 }
 0x961   :  { %7614 = vmatpush3.bf16.msra.mxu0 %v8140_v46 }
 0x962   :  { %7647 = vmatprep.subr.bf16.mxu0 %v7812_v55 }
 0x964   :  { %3564 = vmatmul.mubr.f32.vlgmr.msra.gmra.mrb[44].mxu0 %v4435_v1 }
 0x965   :  { %7649 = vmatpush3.bf16.msra.mxu0 %v8157_v54  ;;  %6356 = vmatprep.mubr.msk.f32.mxu0 %vm7813_vm0, %v7814_v4 }
 0x966   :  { %7650 = vmatprep.subr.bf16.mxu0 %v7812_v55 }
 0x969   :  { %7652 = vmatpush3.bf16.msra.mxu0 %v8172_v60 }
 0x96a   :  { %7653 = vmatprep.subr.bf16.mxu0 %v7812_v55 }
 0x96d   :  { %7655 = vmatpush3.bf16.msra.mxu0 %v8189_v6 }
 0x96e   :  { %7656 = vmatprep.subr.bf16.mxu0 %v7812_v55 }
 0x971   :  { %7658 = vmatpush3.bf16.msra.mxu0 %v8201_v11 }
 0x972   :  { %7659 = vmatprep.subr.bf16.mxu0 %v7812_v55 }
 0x974   :  { %6357 = vmatmul.mubr.msk.f32.vlgmr.msra.gmra.mrb[46].mxu0 %vm110_vm1, %v4439_v9  ;;  %v4458_v9 = vld [vmem:[%s9777_s0 + $0x1e8] sm:$0xff] }
 0x975   :  { %6391 = vmatprep.mubr.msk.f32.mxu0 %vm7813_vm0, %v7814_v4 }
 0x9f7   :  { %v3177_v10 = vpop.f32.mrb[40].mxu0 }
 0x9f8   :  { %v9503_v59 = vadd.f32 %v3177_v10, %v9383_v13  ;;  %v6285_v15 = vpop.f32.mrb[41].mxu0  ;;  %v4452_v13 = vld [vmem:[%s9778_s3 + $0x5d8] sm:$0xff]  ;;  %v4457_v10 = vld [vmem:[%s9777_s0 + $0x1e0] sm:$0xff] }
 0xa17   :  { %v5508_v22 = vpop.f32.mrb[42].mxu0 }
 0xa18   :  { %v5509_v23 = vpop.f32.mrb[43].mxu0 }
 0xa19   :  { %v5510_v29 = vadd.f32 %v5509_v23, %v5508_v22 }
 0xa1b   :  { %v3328_v30 = vadd.f32 %v5510_v29, %v3258_v24 }
 0xa1d   :  { %v3398_v31 = vadd.f32 %v3397_v58, %v3328_v30  ;;  %v4455_v58 = vld [vmem:[%s9778_s3 + $0x5f0] sm:$0xff] }
 0xa1e   :  { %v7681_v45 = vpack.c.bf16 %v4456_v61, %v4455_v58  ;;  %v4124_v58 = vld [vmem:[%s9780_s5 + $0x48] sm:$0xff] }
 0xa1f   :  { %v3401_v32 = vmax.f32 %v3398_v31, 0.0 }
 0xa21   :  { %6338 = vmatmul.mubr.f32.vlgmr.msra.gmra.mrb[42].mxu1 %v3401_v32  ;;  %v4460_v32 = vld [vmem:[%s9777_s0 + $0x1f8] sm:$0xff] }
 0xa22   :  { %7618 = vmatpush3.bf16.msra.mxu1 %v7889_v12  ;;  %3633 = vmatprep.mubr.f32.mxu1 %v4438_v18  ;;  %v4474_v18 = vld [vmem:[%s9778_s3 + $0x658] sm:$0xff] }
 0xa23   :  { %7620 = vmatprep.subr.bf16.mxu1 %v7916_v21 }
 0xa26   :  { %7622 = vmatpush3.bf16.msra.mxu1 %v7928_v25 }
 0xa27   :  { %7624 = vmatprep.subr.bf16.mxu1 %v7954_v34 }
 0xa2a   :  { %7626 = vmatpush3.bf16.msra.mxu1 %v7967_v38 }
 0xa2b   :  { %7628 = vmatprep.subr.bf16.mxu1 %v7981_v43 }
 0xa2e   :  { %7630 = vmatpush3.bf16.msra.mxu1 %v8006_v51 }
 0xa2f   :  { %7632 = vmatprep.subr.bf16.mxu1 %v8020_v56 }
 0xa32   :  { %7634 = vmatpush3.bf16.msra.mxu1 %v8042_v63 }
 0xa33   :  { %7636 = vmatprep.subr.bf16.mxu1 %v8056_v5 }
 0xa36   :  { %7638 = vmatpush3.bf16.msra.mxu1 %v8084_v19 }
 0xa37   :  { %7640 = vmatprep.subr.bf16.mxu1 %v8098_v27  ;;  %v5569_v28 = vpop.f32.mrb[44].mxu0 }
 0xa38   :  { %v5570_v44 = vpop.f32.mrb[45].mxu0 }
 0xa39   :  { %v5571_v53 = vadd.f32 %v5570_v44, %v5569_v28  ;;  %v4119_v28 = vld [vmem:[%s9780_s5 + $0x20] sm:$0xff]  ;;  %v4120_v44 = vld [vmem:[%s9780_s5 + $0x28] sm:$0xff] }
 0xa3a   :  { %7642 = vmatpush3.bf16.msra.mxu1 %v8120_v36 }
 0xa3b   :  { %7644 = vmatprep.subr.bf16.mxu1 %v8131_v42 }
 0xa3e   :  { %7646 = vmatpush3.bf16.msra.mxu1 %v8144_v47 }
 0xa3f   :  { %7684 = vmatprep.subr.bf16.mxu1 %v7864_v3  ;;  %v4441_v3 = vld [vmem:[%s9778_s3 + $0x580] sm:$0xff] }
 0xa41   :  { %3634 = vmatmul.mubr.f32.vlgmr.msra.gmra.mrb[44].mxu1 %v4437_v2 }
 0xa42   :  { %7686 = vmatpush3.bf16.msra.mxu1 %v7875_v7  ;;  %v4442_v7 = vld [vmem:[%s9778_s3 + $0x588] sm:$0xff]  ;;  %3871 = vmatprep.mubr.f32.mxu1 %v4458_v9 }
 0xa43   :  { %7688 = vmatprep.subr.bf16.mxu1 %v7902_v16  ;;  %v4443_v16 = vld [vmem:[%s9778_s3 + $0x590] sm:$0xff] }
 0xa46   :  { %7690 = vmatpush3.bf16.msra.mxu1 %v7904_v17  ;;  %v7660_v17 = vpack.c.bf16 %v4442_v7, %v4441_v3 }
 0xa47   :  { %7692 = vmatprep.subr.bf16.mxu1 %v7930_v26  ;;  %v4444_v26 = vld [vmem:[%s9778_s3 + $0x598] sm:$0xff]  ;;  %v3705_v50 = vpop.f32.mrb[46].mxu0 }
 0xa48   :  { %7661 = vmatpush3.bf16.msra.mxu0 %v7660_v17  ;;  %v6358_v1 = vpop.f32.mrb[47].mxu0  ;;  %v4475_v17 = vld [vmem:[%s9778_s3 + $0x660] sm:$0xff] }
 0xa49   :  { %7662 = vmatprep.subr.bf16.mxu0 %v7812_v55 }
 0xa4a   :  { %7694 = vmatpush3.bf16.msra.mxu1 %v7952_v33  ;;  %v7663_v33 = vpack.c.bf16 %v4444_v26, %v4443_v16  ;;  %v4476_v26 = vld [vmem:[%s9778_s3 + $0x668] sm:$0xff] }
 0xa4b   :  { %7696 = vmatprep.subr.bf16.mxu1 %v7969_v39  ;;  %v4445_v39 = vld [vmem:[%s9778_s3 + $0x5a0] sm:$0xff] }
 0xa4c   :  { %7664 = vmatpush3.bf16.msra.mxu0 %v7663_v33  ;;  %v7778_v33 = vpack.c.bf16 %v4476_v26, %v4475_v17 }
 0xa4d   :  { %7665 = vmatprep.subr.bf16.mxu0 %v7812_v55 }
 0xa4e   :  { %7698 = vmatpush3.bf16.msra.mxu1 %v7996_v48  ;;  %v4446_v48 = vld [vmem:[%s9778_s3 + $0x5a8] sm:$0xff] }
 0xa4f   :  { %7700 = vmatprep.subr.bf16.mxu1 %v8008_v52  ;;  %v7666_v52 = vpack.c.bf16 %v4446_v48, %v4445_v39  ;;  %v4477_v48 = vld [vmem:[%s9778_s3 + $0x670] sm:$0xff] }
 0xa51   :  { %7667 = vmatpush3.bf16.msra.mxu0 %v7666_v52  ;;  %v4478_v52 = vld [vmem:[%s9778_s3 + $0x678] sm:$0xff] }
 0xa52   :  { %7702 = vmatpush3.bf16.msra.mxu1 %v8038_v62  ;;  %v4447_v62 = vld [vmem:[%s9778_s3 + $0x5b0] sm:$0xff]  ;;  %7668 = vmatprep.subr.bf16.mxu0 %v7812_v55 }
 0xa53   :  { %7704 = vmatprep.subr.bf16.mxu1 %v8044_v0  ;;  %v4448_v0 = vld [vmem:[%s9778_s3 + $0x5b8] sm:$0xff] }
 0xa56   :  { %7706 = vmatpush3.bf16.msra.mxu1 %v8074_v14  ;;  %v7669_v14 = vpack.c.bf16 %v4448_v0, %v4447_v62  ;;  %v7781_v0 = vpack.c.bf16 %v4478_v52, %v4477_v48 }
 0xa57   :  { %7708 = vmatprep.subr.bf16.mxu1 %v8086_v20  ;;  %v4449_v20 = vld [vmem:[%s9778_s3 + $0x5c0] sm:$0xff] }
 0xa58   :  { %7670 = vmatpush3.bf16.msra.mxu0 %v7669_v14  ;;  %v4115_v14 = vld [vmem:[%s9780_s5] sm:$0xff] }
 0xa59   :  { %7671 = vmatprep.subr.bf16.mxu0 %v7812_v55 }
 0xa5a   :  { %7710 = vmatpush3.bf16.msra.mxu1 %v8116_v35  ;;  %v4450_v35 = vld [vmem:[%s9778_s3 + $0x5c8] sm:$0xff] }
 0xa5b   :  { %7712 = vmatprep.subr.bf16.mxu1 %v8122_v37  ;;  %v7672_v37 = vpack.c.bf16 %v4450_v35, %v4449_v20  ;;  %v4116_v20 = vld [vmem:[%s9780_s5 + $0x8] sm:$0xff]  ;;  %v4117_v35 = vld [vmem:[%s9780_s5 + $0x10] sm:$0xff] }
 0xa5d   :  { %7673 = vmatpush3.bf16.msra.mxu0 %v7672_v37  ;;  %v7784_v37 = vpack.c.bf16 %v4116_v20, %v4115_v14 }
 0xa5e   :  { %7714 = vmatpush3.bf16.msra.mxu1 %v8140_v46  ;;  %v4451_v46 = vld [vmem:[%s9778_s3 + $0x5d0] sm:$0xff]  ;;  %7674 = vmatprep.subr.bf16.mxu0 %v7812_v55 }
 0xa5f   :  { %7747 = vmatprep.subr.bf16.mxu1 %v7812_v55  ;;  %v7675_v49 = vpack.c.bf16 %v4452_v13, %v4451_v46  ;;  %v4118_v46 = vld [vmem:[%s9780_s5 + $0x18] sm:$0xff] }
 0xa60   :  { %v7787_v13 = vpack.c.bf16 %v4118_v46, %v4117_v35 }
 0xa61   :  { %7676 = vmatpush3.bf16.msra.mxu0 %v7675_v49  ;;  %3872 = vmatmul.mubr.f32.vlgmr.msra.gmra.mrb[46].mxu1 %v4457_v10  ;;  %v7790_v49 = vpack.c.bf16 %v4120_v44, %v4119_v28 }
 0xa62   :  { %7677 = vmatprep.subr.bf16.mxu0 %v7812_v55  ;;  %7749 = vmatpush3.bf16.msra.mxu1 %v8157_v54 }
 0xa63   :  { %6410 = vmatprep.mubr.msk.f32.mxu1 %vm7813_vm0, %v7814_v4  ;;  %7750 = vmatprep.subr.bf16.mxu1 %v7812_v55 }
 0xa65   :  { %7679 = vmatpush3.bf16.msra.mxu0 %v7678_v57  ;;  %v4123_v57 = vld [vmem:[%s9780_s5 + $0x40] sm:$0xff] }
 0xa66   :  { %7680 = vmatprep.subr.bf16.mxu0 %v7812_v55  ;;  %7752 = vmatpush3.bf16.msra.mxu1 %v8172_v60  ;;  %v7796_v61 = vpack.c.bf16 %v4124_v58, %v4123_v57 }
 0xa67   :  { %7753 = vmatprep.subr.bf16.mxu1 %v7812_v55 }
 0xa69   :  { %7682 = vmatpush3.bf16.msra.mxu0 %v7681_v45  ;;  %v4126_v45 = vld [vmem:[%s9780_s5 + $0x58] sm:$0xff] }
 0xa6a   :  { %7716 = vmatprep.subr.bf16.mxu0 %v7877_v8  ;;  %7755 = vmatpush3.bf16.msra.mxu1 %v8189_v6  ;;  %v4461_v8 = vld [vmem:[%s9777_s0 + $0x200] sm:$0xff] }
 0xa6b   :  { %7756 = vmatprep.subr.bf16.mxu1 %v7812_v55 }
 0xa6e   :  { %7758 = vmatpush3.bf16.msra.mxu1 %v8201_v11  ;;  %v9628_v11 = vld [vmem:[%s9779_s2] ss:$0 sm:$0xff] }
 0xa6f   :  { %7759 = vmatprep.subr.bf16.mxu1 %v7812_v55  ;;  %v3566_v23 = vadd.f32 %v9628_v11, %v5571_v53  ;;  %v4121_v53 = vld [vmem:[%s9780_s5 + $0x30] sm:$0xff] }
 0xa70   :  { %v7793_v40 = vpack.c.bf16 %v4122_v41, %v4121_v53 }
 0xa71   :  { %6411 = vmatmul.mubr.msk.f32.vlgmr.msra.gmra.mrb[48].mxu1 %vm110_vm1, %v4461_v8 }
 0xa72   :  { %6445 = vmatprep.mubr.msk.f32.mxu1 %vm7813_vm0, %v7814_v4 }
 0xaf4   :  { %v3485_v54 = vpop.f32.mrb[42].mxu1 }
 0xaf5   :  { %v9623_v60 = vadd.f32 %v3485_v54, %v9503_v59  ;;  %v6339_v6 = vpop.f32.mrb[43].mxu1  ;;  %v4473_v59 = vld [vmem:[%s9778_s3 + $0x650] sm:$0xff] }
 0xaf6   :  { %v7775_v7 = vpack.c.bf16 %v4474_v18, %v4473_v59 }
 0xb14   :  { %v5604_v15 = vpop.f32.mrb[44].mxu1 }
 0xb15   :  { %v5605_v22 = vpop.f32.mrb[45].mxu1 }
 0xb16   :  { %v5606_v24 = vadd.f32 %v5605_v22, %v5604_v15 }
 0xb18   :  { %v3636_v29 = vadd.f32 %v5606_v24, %v3566_v23 }
 0xb1a   :  { %v3706_v30 = vadd.f32 %v3705_v50, %v3636_v29  ;;  %v4125_v50 = vld [vmem:[%s9780_s5 + $0x50] sm:$0xff] }
 0xb1b   :  { %v7799_v1 = vpack.c.bf16 %v4126_v45, %v4125_v50 }
 0xb1c   :  { %v3709_v31 = vmax.f32 %v3706_v30, 0.0  ;;  %v4127_v30 = vld [vmem:[%s9780_s5 + $0x60] sm:$0xff] }
 0xb1e   :  { %6392 = vmatmul.mubr.f32.vlgmr.msra.gmra.mrb[48].mxu0 %v3709_v31  ;;  %v4128_v31 = vld [vmem:[%s9780_s5 + $0x68] sm:$0xff] }
 0xb1f   :  { %7718 = vmatpush3.bf16.msra.mxu0 %v7889_v12  ;;  %3941 = vmatprep.mubr.f32.mxu0 %v4460_v32  ;;  %v4459_v12 = vld [vmem:[%s9777_s0 + $0x1f0] sm:$0xff]  ;;  %v7802_v32 = vpack.c.bf16 %v4128_v31, %v4127_v30 }
 0xb20   :  { %7720 = vmatprep.subr.bf16.mxu0 %v7916_v21  ;;  %v4463_v21 = vld [vmem:[%s9778_s3 + $0x600] sm:$0xff] }
 0xb23   :  { %7722 = vmatpush3.bf16.msra.mxu0 %v7928_v25  ;;  %v4464_v25 = vld [vmem:[%s9778_s3 + $0x608] sm:$0xff] }
 0xb24   :  { %7724 = vmatprep.subr.bf16.mxu0 %v7954_v34  ;;  %v4465_v34 = vld [vmem:[%s9778_s3 + $0x610] sm:$0xff] }
 0xb27   :  { %7726 = vmatpush3.bf16.msra.mxu0 %v7967_v38  ;;  %v7760_v38 = vpack.c.bf16 %v4464_v25, %v4463_v21  ;;  %v4479_v25 = vld [vmem:[%s9781_s4] ss:$0 sm:$0xff] }
 0xb28   :  { %7728 = vmatprep.subr.bf16.mxu0 %v7981_v43  ;;  %v4466_v43 = vld [vmem:[%s9778_s3 + $0x618] sm:$0xff] }
 0xb29   :  { %7761 = vmatpush3.bf16.msra.mxu1 %v7760_v38 }
 0xb2a   :  { %7762 = vmatprep.subr.bf16.mxu1 %v7812_v55 }
 0xb2b   :  { %7730 = vmatpush3.bf16.msra.mxu0 %v8006_v51  ;;  %v7763_v51 = vpack.c.bf16 %v4466_v43, %v4465_v34 }
 0xb2c   :  { %7732 = vmatprep.subr.bf16.mxu0 %v8020_v56  ;;  %v4467_v56 = vld [vmem:[%s9778_s3 + $0x620] sm:$0xff] }
 0xb2d   :  { %7764 = vmatpush3.bf16.msra.mxu1 %v7763_v51 }
 0xb2e   :  { %7765 = vmatprep.subr.bf16.mxu1 %v7812_v55 }
 0xb2f   :  { %7734 = vmatpush3.bf16.msra.mxu0 %v8042_v63  ;;  %v4468_v63 = vld [vmem:[%s9778_s3 + $0x628] sm:$0xff] }
 0xb30   :  { %7736 = vmatprep.subr.bf16.mxu0 %v8056_v5  ;;  %v7766_v5 = vpack.c.bf16 %v4468_v63, %v4467_v56 }
 0xb32   :  { %7767 = vmatpush3.bf16.msra.mxu1 %v7766_v5 }
 0xb33   :  { %7738 = vmatpush3.bf16.msra.mxu0 %v8084_v19  ;;  %v4469_v19 = vld [vmem:[%s9778_s3 + $0x630] sm:$0xff]  ;;  %7768 = vmatprep.subr.bf16.mxu1 %v7812_v55 }
 0xb34   :  { %7740 = vmatprep.subr.bf16.mxu0 %v8098_v27  ;;  %v4470_v27 = vld [vmem:[%s9778_s3 + $0x638] sm:$0xff]  ;;  %v5665_v2 = vpop.f32.mrb[46].mxu1 }
 0xb35   :  { %v5666_v3 = vpop.f32.mrb[47].mxu1 }
 0xb36   :  { %v5667_v16 = vadd.f32 %v5666_v3, %v5665_v2 }
 0xb37   :  { %7742 = vmatpush3.bf16.msra.mxu0 %v8120_v36  ;;  %v7769_v36 = vpack.c.bf16 %v4470_v27, %v4469_v19 }
 0xb38   :  { %7744 = vmatprep.subr.bf16.mxu0 %v8131_v42  ;;  %v4471_v42 = vld [vmem:[%s9778_s3 + $0x640] sm:$0xff]  ;;  %v3874_v15 = vadd.f32 %v9628_v11, %v5667_v16  ;;  %v4130_v11 = vld [vmem:[%s9780_s5 + $0x78] sm:$0xff] }
 0xb39   :  { %7770 = vmatpush3.bf16.msra.mxu1 %v7769_v36 }
 0xb3a   :  { %7771 = vmatprep.subr.bf16.mxu1 %v7812_v55 }
 0xb3b   :  { %7746 = vmatpush3.bf16.msra.mxu0 %v8144_v47  ;;  %v4472_v47 = vld [vmem:[%s9778_s3 + $0x648] sm:$0xff] }
 0xb3c   :  { %7783 = vmatprep.subr.bf16.mxu0 %v7812_v55 }
 0xb3e   :  { %3942 = vmatmul.mubr.f32.vlgmr.msra.gmra.mrb[50].mxu0 %v4459_v12 }
 0xb3f   :  { %6480 = vmatprep.mubr.msk.f32.mxu0 %vm7813_vm0, %v7814_v4  ;;  %v7772_v4 = vpack.c.bf16 %v4472_v47, %v4471_v42  ;;  %7785 = vmatpush3.bf16.msra.mxu0 %v7784_v37 }
 0xb40   :  { %7786 = vmatprep.subr.bf16.mxu0 %v7812_v55 }
 0xb41   :  { %7773 = vmatpush3.bf16.msra.mxu1 %v7772_v4 }
 0xb42   :  { %7774 = vmatprep.subr.bf16.mxu1 %v7812_v55 }
 0xb43   :  { %7788 = vmatpush3.bf16.msra.mxu0 %v7787_v13 }
 0xb44   :  { %v4013_v39 = vpop.f32.mrb[48].mxu1  ;;  %7789 = vmatprep.subr.bf16.mxu0 %v7812_v55 }
 0xb45   :  { %7776 = vmatpush3.bf16.msra.mxu1 %v7775_v7  ;;  %v6412_v62 = vpop.f32.mrb[49].mxu1 }
 0xb46   :  { %7777 = vmatprep.subr.bf16.mxu1 %v7812_v55 }
 0xb47   :  { %7791 = vmatpush3.bf16.msra.mxu0 %v7790_v49 }
 0xb48   :  { %7792 = vmatprep.subr.bf16.mxu0 %v7812_v55 }
 0xb49   :  { %7779 = vmatpush3.bf16.msra.mxu1 %v7778_v33 }
 0xb4a   :  { %7780 = vmatprep.subr.bf16.mxu1 %v7812_v55 }
 0xb4b   :  { %7794 = vmatpush3.bf16.msra.mxu0 %v7793_v40 }
 0xb4c   :  { %7795 = vmatprep.subr.bf16.mxu0 %v7812_v55 }
 0xb4d   :  { %7782 = vmatpush3.bf16.msra.mxu1 %v7781_v0 }
 0xb4f   :  { %7797 = vmatpush3.bf16.msra.mxu0 %v7796_v61 }
 0xb50   :  { %7798 = vmatprep.subr.bf16.mxu0 %v7812_v55 }
 0xb53   :  { %7800 = vmatpush3.bf16.msra.mxu0 %v7799_v1 }
 0xb54   :  { %7801 = vmatprep.subr.bf16.mxu0 %v7812_v55 }
 0xb57   :  { %7803 = vmatpush3.bf16.msra.mxu0 %v7802_v32 }
 0xb58   :  { %7804 = vmatprep.subr.bf16.mxu0 %v7812_v55  ;;  %v4480_v55 = vld [vmem:[%s9782_s6] ss:$0 sm:$0xff] }
 0xbf1   :  { %v3793_v9 = vpop.f32.mrb[48].mxu0 }
 0xbf2   :  { %v3797_v10 = vadd.f32 %v3793_v9, %v9623_v60  ;;  %v6393_v8 = vpop.f32.mrb[49].mxu0  ;;  %v4129_v60 = vld [vmem:[%s9780_s5 + $0x70] sm:$0xff] }
 0xbf3   :  { %v7805_v12 = vpack.c.bf16 %v4130_v11, %v4129_v60 }
 0xbf5   :  { %7806 = vmatpush3.bf16.msra.mxu0 %v7805_v12 }
 0xc11   :  { %v5700_v54 = vpop.f32.mrb[50].mxu0 }
 0xc12   :  { %v5701_v6 = vpop.f32.mrb[51].mxu0 }
 0xc13   :  { %v5702_v22 = vadd.f32 %v5701_v6, %v5700_v54 }
 0xc15   :  { %v3944_v23 = vadd.f32 %v5702_v22, %v3874_v15 }
 0xc17   :  { %v4014_v24 = vadd.f32 %v4013_v39, %v3944_v23 }
 0xc19   :  { %v4017_v29 = vmax.f32 %v4014_v24, 0.0 }
 0xc1b   :  { %6446 = vmatmul.mubr.f32.vlgmr.msra.gmra.mrb[50].mxu1 %v4017_v29 }
 0xcee   :  { %v4101_v21 = vpop.f32.mrb[50].mxu1 }
 0xcef   :  { %v4105_v34 = vadd.f32 %v4101_v21, %v3797_v10  ;;  %v6447_v38 = vpop.f32.mrb[51].mxu1 }
 0xcf1   :  { %v4113_v43 = vadd.f32 %v4479_v25, %v4105_v34 }
 0xcf3   :  { %v4114_v51 = vmax.f32 %v4113_v43, 0.0 }
 0xcf5   :  { %6481 = vmatmul.mubr.f32.vlgmr.msra.gmra.mrb[52].mxu0 %v4114_v51 }
 0xdc8   :  { %v4204_v56 = vpop.f32.mrb[52].mxu0 }
 0xdc9   :  { %v4205_v63 = vadd.f32 %v4480_v55, %v4204_v56  ;;  %v6482_v5 = vpop.f32.mrb[53].mxu0 }
 0xdcb   :  { %4208 = vst [vmem:[%s9783_s7] sm:$0xff] %v4205_v63 }

</bundles_post_ra>
